<compile_context>
chip_gen: v6e
topology: v6e:2x2x1
jax: 0.10.0
libtpu: 0.0.40
codegen_flags: <defaults>
</compile_context>

<pallas_src>
import jax
import jax.numpy as jnp
from jax import lax
from jax.experimental import pallas as pl
from jax.experimental.pallas import tpu as pltpu

C_IN = 3
C_OUT = 3
K = 3


def make_fused_conv_kernel(n, NB, H, W):
    """Kernel applying the 3x3 VALID conv `n` times on (C, NB, H*W) blocks."""
    HW = H * W
    taps = [(ky, kx) for ky in range(K) for kx in range(K)]
    shifts = [ky * W + kx for (ky, kx) in taps]   # flat tap offsets, static

    def kernel(w_ref, b_ref, x_ref, o_ref):
        # w_ref: SMEM (C_OUT*C_IN*K*K,) f32   flat OIHW weights
        # b_ref: SMEM (C_OUT,) f32
        # x_ref: VMEM (C_IN,  NB, HW) f32     channel-major, lane-dense H*W
        # o_ref: VMEM (C_OUT, NB, HW) f32     fixed-shape; valid window sliced in wrapper

        # Read every weight/bias scalar once and broadcast it to a vreg-shaped
        # array ONCE (reused by all n iterations; no per-multiply vsplat).
        wb = [[[jnp.full((NB, HW),
                         w_ref[((co * C_IN + ci) * K + ky) * K + kx],
                         dtype=jnp.float32)
                for (ky, kx) in taps]
               for ci in range(C_IN)]
              for co in range(C_OUT)]
        bb = [jnp.full((NB, HW), b_ref[co], dtype=jnp.float32)
              for co in range(C_OUT)]

        # Activations: per-channel (NB, HW) arrays, fixed shape for all n steps.
        chans = [x_ref[ci] for ci in range(C_IN)]

        for _ in range(n):
            # 9 tap-shifted copies per input channel via XLU lane rolls,
            # shared across all output channels.  roll(ch, HW - s)[f] = ch[f + s]
            # (mod HW); wrap-around garbage lands only in the discarded border.
            sh = [[chans[ci] if s == 0
                   else pltpu.roll(chans[ci], HW - s, 1)
                   for s in shifts]
                  for ci in range(C_IN)]

            new_chans = []
            for co in range(C_OUT):
                # One independent partial sum per input channel (VALU ILP).
                parts = []
                for ci in range(C_IN):
                    p = wb[co][ci][0] * sh[ci][0]
                    for t in range(1, K * K):
                        p = p + wb[co][ci][t] * sh[ci][t]
                    parts.append(p)
                new_chans.append((parts[0] + parts[1]) + (parts[2] + bb[co]))
            chans = new_chans

        # Single final, full-lane-width (unmasked) store per output channel.
        for co in range(C_OUT):
            o_ref[co] = chans[co].astype(o_ref.dtype)

    return kernel


def model_forward(x, w, bias, n):
    """Apply the 3x3 VALID conv (OIHW weights) `n` times to NCHW `x`."""
    n = int(n)   # the torch int64 tensor `n` is a static, trace-time constant
    if n == 0:
        return x

    N, C, H, W = x.shape
    assert C == C_IN
    Ho = H - n * (K - 1)
    Wo = W - n * (K - 1)
    assert Ho > 0 and Wo > 0, "input too small for n conv applications"

    HW = H * W
    w_flat = w.reshape(-1)
    # Channel-major, lane-dense layout for the kernel: (C, N, H*W).
    x_cm = jnp.transpose(x, (1, 0, 2, 3)).reshape(C_IN, N, HW)

    smem = pltpu.MemorySpace.SMEM
    vmem = pltpu.MemorySpace.VMEM

    if N <= 8:
        # Tiny batch: single kernel invocation, whole arrays resident in VMEM.
        kernel = make_fused_conv_kernel(n, N, H, W)
        out_cm = pl.pallas_call(
            kernel,
            out_shape=jax.ShapeDtypeStruct((C_OUT, N, HW), x.dtype),
            in_specs=[
                pl.BlockSpec(memory_space=smem),   # weights
                pl.BlockSpec(memory_space=smem),   # bias
                pl.BlockSpec(memory_space=vmem),   # x (whole batch)
            ],
            out_specs=pl.BlockSpec(memory_space=vmem),
        )(w_flat, bias, x_cm)
    else:
        # Larger batch: parallel grid over batch blocks of 8 (feeds the second
        # TensorCore on v7x; keeps VMEM footprint bounded and sublanes full).
        NB = 8
        kernel = make_fused_conv_kernel(n, NB, H, W)
        out_cm = pl.pallas_call(
            kernel,
            out_shape=jax.ShapeDtypeStruct((C_OUT, N, HW), x.dtype),
            grid=(pl.cdiv(N, NB),),
            in_specs=[
                pl.BlockSpec(memory_space=smem),
                pl.BlockSpec(memory_space=smem),
                pl.BlockSpec((C_IN, NB, HW), lambda i: (0, i, 0)),
            ],
            out_specs=pl.BlockSpec((C_OUT, NB, HW), lambda i: (0, i, 0)),
            compiler_params=pltpu.CompilerParams(
                dimension_semantics=("parallel",)),
        )(w_flat, bias, x_cm)

    # Valid window is anchored at (0, 0); slice once, restore NCHW.
    out = out_cm.reshape(C_OUT, N, H, W)[:, :, :Ho, :Wo]
    return jnp.transpose(out, (1, 0, 2, 3))


def reference_forward(x, w, bias, n):
    for _ in range(int(n)):
        x = lax.conv_general_dilated(
            x, w, window_strides=(1, 1), padding="VALID",
            dimension_numbers=("NCHW", "OIHW", "NCHW"),
        ) + bias[None, :, None, None]
    return x


if __name__ == "__main__":
    key = jax.random.PRNGKey(0)
    kw, kb, kx = jax.random.split(key, 3)

    n = 3  # number of conv applications (Model(n=3))

    # Deterministic synthetic parameters (Conv2d(3, 3, 3): weight OIHW, bias (3,))
    w = jax.random.normal(kw, (C_OUT, C_IN, K, K), dtype=jnp.float32) * 0.1
    bias = jax.random.normal(kb, (C_OUT,), dtype=jnp.float32) * 0.1

    # Input NCHW: batch=2, channels=3 (required by Conv2d(3,3,3)), spatial=16
    x = jax.random.normal(kx, (2, 3, 16, 16), dtype=jnp.float32)

    out = jax.block_until_ready(model_forward(x, w, bias, n))
    ref = jax.block_until_ready(reference_forward(x, w, bias, n))

    assert out.shape == ref.shape == (2, 3, 16 - 2 * n, 16 - 2 * n)
    assert jnp.allclose(out, ref, rtol=1e-4, atol=1e-5), "mismatch vs reference conv"

    print("KERNEL_OK")
</pallas_src>

<mosaic_0001>
module attributes {stable_mosaic.version = 11 : i64} {
  func.func @kernel(%arg0: memref<81xf32, #tpu.memory_space<smem>>, %arg1: memref<3xf32, #tpu.memory_space<smem>>, %arg2: memref<3x2x256xf32, #tpu.memory_space<vmem>>, %arg3: memref<3x2x256xf32, #tpu.memory_space<vmem>>) attributes {dimension_semantics = [], scalar_prefetch = 0 : i64, scratch_operands = 0 : i64, tpu.core_type = #tpu.core_type<tc>} {
    %c0 = arith.constant 0 : index
    %0 = memref.load %arg0[%c0] : memref<81xf32, #tpu.memory_space<smem>>
    %1 = vector.broadcast %0 : f32 to vector<2x256xf32>
    %c1 = arith.constant 1 : index
    %2 = memref.load %arg0[%c1] : memref<81xf32, #tpu.memory_space<smem>>
    %3 = vector.broadcast %2 : f32 to vector<2x256xf32>
    %c2 = arith.constant 2 : index
    %4 = memref.load %arg0[%c2] : memref<81xf32, #tpu.memory_space<smem>>
    %5 = vector.broadcast %4 : f32 to vector<2x256xf32>
    %c3 = arith.constant 3 : index
    %6 = memref.load %arg0[%c3] : memref<81xf32, #tpu.memory_space<smem>>
    %7 = vector.broadcast %6 : f32 to vector<2x256xf32>
    %c4 = arith.constant 4 : index
    %8 = memref.load %arg0[%c4] : memref<81xf32, #tpu.memory_space<smem>>
    %9 = vector.broadcast %8 : f32 to vector<2x256xf32>
    %c5 = arith.constant 5 : index
    %10 = memref.load %arg0[%c5] : memref<81xf32, #tpu.memory_space<smem>>
    %11 = vector.broadcast %10 : f32 to vector<2x256xf32>
    %c6 = arith.constant 6 : index
    %12 = memref.load %arg0[%c6] : memref<81xf32, #tpu.memory_space<smem>>
    %13 = vector.broadcast %12 : f32 to vector<2x256xf32>
    %c7 = arith.constant 7 : index
    %14 = memref.load %arg0[%c7] : memref<81xf32, #tpu.memory_space<smem>>
    %15 = vector.broadcast %14 : f32 to vector<2x256xf32>
    %c8 = arith.constant 8 : index
    %16 = memref.load %arg0[%c8] : memref<81xf32, #tpu.memory_space<smem>>
    %17 = vector.broadcast %16 : f32 to vector<2x256xf32>
    %c9 = arith.constant 9 : index
    %18 = memref.load %arg0[%c9] : memref<81xf32, #tpu.memory_space<smem>>
    %19 = vector.broadcast %18 : f32 to vector<2x256xf32>
    %c10 = arith.constant 10 : index
    %20 = memref.load %arg0[%c10] : memref<81xf32, #tpu.memory_space<smem>>
    %21 = vector.broadcast %20 : f32 to vector<2x256xf32>
    %c11 = arith.constant 11 : index
    %22 = memref.load %arg0[%c11] : memref<81xf32, #tpu.memory_space<smem>>
    %23 = vector.broadcast %22 : f32 to vector<2x256xf32>
    %c12 = arith.constant 12 : index
    %24 = memref.load %arg0[%c12] : memref<81xf32, #tpu.memory_space<smem>>
    %25 = vector.broadcast %24 : f32 to vector<2x256xf32>
    %c13 = arith.constant 13 : index
    %26 = memref.load %arg0[%c13] : memref<81xf32, #tpu.memory_space<smem>>
    %27 = vector.broadcast %26 : f32 to vector<2x256xf32>
    %c14 = arith.constant 14 : index
    %28 = memref.load %arg0[%c14] : memref<81xf32, #tpu.memory_space<smem>>
    %29 = vector.broadcast %28 : f32 to vector<2x256xf32>
    %c15 = arith.constant 15 : index
    %30 = memref.load %arg0[%c15] : memref<81xf32, #tpu.memory_space<smem>>
    %31 = vector.broadcast %30 : f32 to vector<2x256xf32>
    %c16 = arith.constant 16 : index
    %32 = memref.load %arg0[%c16] : memref<81xf32, #tpu.memory_space<smem>>
    %33 = vector.broadcast %32 : f32 to vector<2x256xf32>
    %c17 = arith.constant 17 : index
    %34 = memref.load %arg0[%c17] : memref<81xf32, #tpu.memory_space<smem>>
    %35 = vector.broadcast %34 : f32 to vector<2x256xf32>
    %c18 = arith.constant 18 : index
    %36 = memref.load %arg0[%c18] : memref<81xf32, #tpu.memory_space<smem>>
    %37 = vector.broadcast %36 : f32 to vector<2x256xf32>
    %c19 = arith.constant 19 : index
    %38 = memref.load %arg0[%c19] : memref<81xf32, #tpu.memory_space<smem>>
    %39 = vector.broadcast %38 : f32 to vector<2x256xf32>
    %c20 = arith.constant 20 : index
    %40 = memref.load %arg0[%c20] : memref<81xf32, #tpu.memory_space<smem>>
    %41 = vector.broadcast %40 : f32 to vector<2x256xf32>
    %c21 = arith.constant 21 : index
    %42 = memref.load %arg0[%c21] : memref<81xf32, #tpu.memory_space<smem>>
    %43 = vector.broadcast %42 : f32 to vector<2x256xf32>
    %c22 = arith.constant 22 : index
    %44 = memref.load %arg0[%c22] : memref<81xf32, #tpu.memory_space<smem>>
    %45 = vector.broadcast %44 : f32 to vector<2x256xf32>
    %c23 = arith.constant 23 : index
    %46 = memref.load %arg0[%c23] : memref<81xf32, #tpu.memory_space<smem>>
    %47 = vector.broadcast %46 : f32 to vector<2x256xf32>
    %c24 = arith.constant 24 : index
    %48 = memref.load %arg0[%c24] : memref<81xf32, #tpu.memory_space<smem>>
    %49 = vector.broadcast %48 : f32 to vector<2x256xf32>
    %c25 = arith.constant 25 : index
    %50 = memref.load %arg0[%c25] : memref<81xf32, #tpu.memory_space<smem>>
    %51 = vector.broadcast %50 : f32 to vector<2x256xf32>
    %c26 = arith.constant 26 : index
    %52 = memref.load %arg0[%c26] : memref<81xf32, #tpu.memory_space<smem>>
    %53 = vector.broadcast %52 : f32 to vector<2x256xf32>
    %c27 = arith.constant 27 : index
    %54 = memref.load %arg0[%c27] : memref<81xf32, #tpu.memory_space<smem>>
    %55 = vector.broadcast %54 : f32 to vector<2x256xf32>
    %c28 = arith.constant 28 : index
    %56 = memref.load %arg0[%c28] : memref<81xf32, #tpu.memory_space<smem>>
    %57 = vector.broadcast %56 : f32 to vector<2x256xf32>
    %c29 = arith.constant 29 : index
    %58 = memref.load %arg0[%c29] : memref<81xf32, #tpu.memory_space<smem>>
    %59 = vector.broadcast %58 : f32 to vector<2x256xf32>
    %c30 = arith.constant 30 : index
    %60 = memref.load %arg0[%c30] : memref<81xf32, #tpu.memory_space<smem>>
    %61 = vector.broadcast %60 : f32 to vector<2x256xf32>
    %c31 = arith.constant 31 : index
    %62 = memref.load %arg0[%c31] : memref<81xf32, #tpu.memory_space<smem>>
    %63 = vector.broadcast %62 : f32 to vector<2x256xf32>
    %c32 = arith.constant 32 : index
    %64 = memref.load %arg0[%c32] : memref<81xf32, #tpu.memory_space<smem>>
    %65 = vector.broadcast %64 : f32 to vector<2x256xf32>
    %c33 = arith.constant 33 : index
    %66 = memref.load %arg0[%c33] : memref<81xf32, #tpu.memory_space<smem>>
    %67 = vector.broadcast %66 : f32 to vector<2x256xf32>
    %c34 = arith.constant 34 : index
    %68 = memref.load %arg0[%c34] : memref<81xf32, #tpu.memory_space<smem>>
    %69 = vector.broadcast %68 : f32 to vector<2x256xf32>
    %c35 = arith.constant 35 : index
    %70 = memref.load %arg0[%c35] : memref<81xf32, #tpu.memory_space<smem>>
    %71 = vector.broadcast %70 : f32 to vector<2x256xf32>
    %c36 = arith.constant 36 : index
    %72 = memref.load %arg0[%c36] : memref<81xf32, #tpu.memory_space<smem>>
    %73 = vector.broadcast %72 : f32 to vector<2x256xf32>
    %c37 = arith.constant 37 : index
    %74 = memref.load %arg0[%c37] : memref<81xf32, #tpu.memory_space<smem>>
    %75 = vector.broadcast %74 : f32 to vector<2x256xf32>
    %c38 = arith.constant 38 : index
    %76 = memref.load %arg0[%c38] : memref<81xf32, #tpu.memory_space<smem>>
    %77 = vector.broadcast %76 : f32 to vector<2x256xf32>
    %c39 = arith.constant 39 : index
    %78 = memref.load %arg0[%c39] : memref<81xf32, #tpu.memory_space<smem>>
    %79 = vector.broadcast %78 : f32 to vector<2x256xf32>
    %c40 = arith.constant 40 : index
    %80 = memref.load %arg0[%c40] : memref<81xf32, #tpu.memory_space<smem>>
    %81 = vector.broadcast %80 : f32 to vector<2x256xf32>
    %c41 = arith.constant 41 : index
    %82 = memref.load %arg0[%c41] : memref<81xf32, #tpu.memory_space<smem>>
    %83 = vector.broadcast %82 : f32 to vector<2x256xf32>
    %c42 = arith.constant 42 : index
    %84 = memref.load %arg0[%c42] : memref<81xf32, #tpu.memory_space<smem>>
    %85 = vector.broadcast %84 : f32 to vector<2x256xf32>
    %c43 = arith.constant 43 : index
    %86 = memref.load %arg0[%c43] : memref<81xf32, #tpu.memory_space<smem>>
    %87 = vector.broadcast %86 : f32 to vector<2x256xf32>
    %c44 = arith.constant 44 : index
    %88 = memref.load %arg0[%c44] : memref<81xf32, #tpu.memory_space<smem>>
    %89 = vector.broadcast %88 : f32 to vector<2x256xf32>
    %c45 = arith.constant 45 : index
    %90 = memref.load %arg0[%c45] : memref<81xf32, #tpu.memory_space<smem>>
    %91 = vector.broadcast %90 : f32 to vector<2x256xf32>
    %c46 = arith.constant 46 : index
    %92 = memref.load %arg0[%c46] : memref<81xf32, #tpu.memory_space<smem>>
    %93 = vector.broadcast %92 : f32 to vector<2x256xf32>
    %c47 = arith.constant 47 : index
    %94 = memref.load %arg0[%c47] : memref<81xf32, #tpu.memory_space<smem>>
    %95 = vector.broadcast %94 : f32 to vector<2x256xf32>
    %c48 = arith.constant 48 : index
    %96 = memref.load %arg0[%c48] : memref<81xf32, #tpu.memory_space<smem>>
    %97 = vector.broadcast %96 : f32 to vector<2x256xf32>
    %c49 = arith.constant 49 : index
    %98 = memref.load %arg0[%c49] : memref<81xf32, #tpu.memory_space<smem>>
    %99 = vector.broadcast %98 : f32 to vector<2x256xf32>
    %c50 = arith.constant 50 : index
    %100 = memref.load %arg0[%c50] : memref<81xf32, #tpu.memory_space<smem>>
    %101 = vector.broadcast %100 : f32 to vector<2x256xf32>
    %c51 = arith.constant 51 : index
    %102 = memref.load %arg0[%c51] : memref<81xf32, #tpu.memory_space<smem>>
    %103 = vector.broadcast %102 : f32 to vector<2x256xf32>
    %c52 = arith.constant 52 : index
    %104 = memref.load %arg0[%c52] : memref<81xf32, #tpu.memory_space<smem>>
    %105 = vector.broadcast %104 : f32 to vector<2x256xf32>
    %c53 = arith.constant 53 : index
    %106 = memref.load %arg0[%c53] : memref<81xf32, #tpu.memory_space<smem>>
    %107 = vector.broadcast %106 : f32 to vector<2x256xf32>
    %c54 = arith.constant 54 : index
    %108 = memref.load %arg0[%c54] : memref<81xf32, #tpu.memory_space<smem>>
    %109 = vector.broadcast %108 : f32 to vector<2x256xf32>
    %c55 = arith.constant 55 : index
    %110 = memref.load %arg0[%c55] : memref<81xf32, #tpu.memory_space<smem>>
    %111 = vector.broadcast %110 : f32 to vector<2x256xf32>
    %c56 = arith.constant 56 : index
    %112 = memref.load %arg0[%c56] : memref<81xf32, #tpu.memory_space<smem>>
    %113 = vector.broadcast %112 : f32 to vector<2x256xf32>
    %c57 = arith.constant 57 : index
    %114 = memref.load %arg0[%c57] : memref<81xf32, #tpu.memory_space<smem>>
    %115 = vector.broadcast %114 : f32 to vector<2x256xf32>
    %c58 = arith.constant 58 : index
    %116 = memref.load %arg0[%c58] : memref<81xf32, #tpu.memory_space<smem>>
    %117 = vector.broadcast %116 : f32 to vector<2x256xf32>
    %c59 = arith.constant 59 : index
    %118 = memref.load %arg0[%c59] : memref<81xf32, #tpu.memory_space<smem>>
    %119 = vector.broadcast %118 : f32 to vector<2x256xf32>
    %c60 = arith.constant 60 : index
    %120 = memref.load %arg0[%c60] : memref<81xf32, #tpu.memory_space<smem>>
    %121 = vector.broadcast %120 : f32 to vector<2x256xf32>
    %c61 = arith.constant 61 : index
    %122 = memref.load %arg0[%c61] : memref<81xf32, #tpu.memory_space<smem>>
    %123 = vector.broadcast %122 : f32 to vector<2x256xf32>
    %c62 = arith.constant 62 : index
    %124 = memref.load %arg0[%c62] : memref<81xf32, #tpu.memory_space<smem>>
    %125 = vector.broadcast %124 : f32 to vector<2x256xf32>
    %c63 = arith.constant 63 : index
    %126 = memref.load %arg0[%c63] : memref<81xf32, #tpu.memory_space<smem>>
    %127 = vector.broadcast %126 : f32 to vector<2x256xf32>
    %c64 = arith.constant 64 : index
    %128 = memref.load %arg0[%c64] : memref<81xf32, #tpu.memory_space<smem>>
    %129 = vector.broadcast %128 : f32 to vector<2x256xf32>
    %c65 = arith.constant 65 : index
    %130 = memref.load %arg0[%c65] : memref<81xf32, #tpu.memory_space<smem>>
    %131 = vector.broadcast %130 : f32 to vector<2x256xf32>
    %c66 = arith.constant 66 : index
    %132 = memref.load %arg0[%c66] : memref<81xf32, #tpu.memory_space<smem>>
    %133 = vector.broadcast %132 : f32 to vector<2x256xf32>
    %c67 = arith.constant 67 : index
    %134 = memref.load %arg0[%c67] : memref<81xf32, #tpu.memory_space<smem>>
    %135 = vector.broadcast %134 : f32 to vector<2x256xf32>
    %c68 = arith.constant 68 : index
    %136 = memref.load %arg0[%c68] : memref<81xf32, #tpu.memory_space<smem>>
    %137 = vector.broadcast %136 : f32 to vector<2x256xf32>
    %c69 = arith.constant 69 : index
    %138 = memref.load %arg0[%c69] : memref<81xf32, #tpu.memory_space<smem>>
    %139 = vector.broadcast %138 : f32 to vector<2x256xf32>
    %c70 = arith.constant 70 : index
    %140 = memref.load %arg0[%c70] : memref<81xf32, #tpu.memory_space<smem>>
    %141 = vector.broadcast %140 : f32 to vector<2x256xf32>
    %c71 = arith.constant 71 : index
    %142 = memref.load %arg0[%c71] : memref<81xf32, #tpu.memory_space<smem>>
    %143 = vector.broadcast %142 : f32 to vector<2x256xf32>
    %c72 = arith.constant 72 : index
    %144 = memref.load %arg0[%c72] : memref<81xf32, #tpu.memory_space<smem>>
    %145 = vector.broadcast %144 : f32 to vector<2x256xf32>
    %c73 = arith.constant 73 : index
    %146 = memref.load %arg0[%c73] : memref<81xf32, #tpu.memory_space<smem>>
    %147 = vector.broadcast %146 : f32 to vector<2x256xf32>
    %c74 = arith.constant 74 : index
    %148 = memref.load %arg0[%c74] : memref<81xf32, #tpu.memory_space<smem>>
    %149 = vector.broadcast %148 : f32 to vector<2x256xf32>
    %c75 = arith.constant 75 : index
    %150 = memref.load %arg0[%c75] : memref<81xf32, #tpu.memory_space<smem>>
    %151 = vector.broadcast %150 : f32 to vector<2x256xf32>
    %c76 = arith.constant 76 : index
    %152 = memref.load %arg0[%c76] : memref<81xf32, #tpu.memory_space<smem>>
    %153 = vector.broadcast %152 : f32 to vector<2x256xf32>
    %c77 = arith.constant 77 : index
    %154 = memref.load %arg0[%c77] : memref<81xf32, #tpu.memory_space<smem>>
    %155 = vector.broadcast %154 : f32 to vector<2x256xf32>
    %c78 = arith.constant 78 : index
    %156 = memref.load %arg0[%c78] : memref<81xf32, #tpu.memory_space<smem>>
    %157 = vector.broadcast %156 : f32 to vector<2x256xf32>
    %c79 = arith.constant 79 : index
    %158 = memref.load %arg0[%c79] : memref<81xf32, #tpu.memory_space<smem>>
    %159 = vector.broadcast %158 : f32 to vector<2x256xf32>
    %c80 = arith.constant 80 : index
    %160 = memref.load %arg0[%c80] : memref<81xf32, #tpu.memory_space<smem>>
    %161 = vector.broadcast %160 : f32 to vector<2x256xf32>
    %c0_0 = arith.constant 0 : index
    %162 = memref.load %arg1[%c0_0] : memref<3xf32, #tpu.memory_space<smem>>
    %163 = vector.broadcast %162 : f32 to vector<2x256xf32>
    %c1_1 = arith.constant 1 : index
    %164 = memref.load %arg1[%c1_1] : memref<3xf32, #tpu.memory_space<smem>>
    %165 = vector.broadcast %164 : f32 to vector<2x256xf32>
    %c2_2 = arith.constant 2 : index
    %166 = memref.load %arg1[%c2_2] : memref<3xf32, #tpu.memory_space<smem>>
    %167 = vector.broadcast %166 : f32 to vector<2x256xf32>
    %c0_3 = arith.constant 0 : index
    %c0_4 = arith.constant 0 : index
    %c0_5 = arith.constant 0 : index
    %168 = vector.load %arg2[%c0_3, %c0_4, %c0_5] : memref<3x2x256xf32, #tpu.memory_space<vmem>>, vector<1x2x256xf32>
    %169 = vector.shape_cast %168 : vector<1x2x256xf32> to vector<2x256xf32>
    %c1_6 = arith.constant 1 : index
    %c0_7 = arith.constant 0 : index
    %c0_8 = arith.constant 0 : index
    %170 = vector.load %arg2[%c1_6, %c0_7, %c0_8] : memref<3x2x256xf32, #tpu.memory_space<vmem>>, vector<1x2x256xf32>
    %171 = vector.shape_cast %170 : vector<1x2x256xf32> to vector<2x256xf32>
    %c2_9 = arith.constant 2 : index
    %c0_10 = arith.constant 0 : index
    %c0_11 = arith.constant 0 : index
    %172 = vector.load %arg2[%c2_9, %c0_10, %c0_11] : memref<3x2x256xf32, #tpu.memory_space<vmem>>, vector<1x2x256xf32>
    %173 = vector.shape_cast %172 : vector<1x2x256xf32> to vector<2x256xf32>
    %c255_i32 = arith.constant 255 : i32
    %174 = tpu.dynamic_rotate %169 by %c255_i32 dim 1 : vector<2x256xf32>, i32 -> vector<2x256xf32>
    %c254_i32 = arith.constant 254 : i32
    %175 = tpu.dynamic_rotate %169 by %c254_i32 dim 1 : vector<2x256xf32>, i32 -> vector<2x256xf32>
    %c240_i32 = arith.constant 240 : i32
    %176 = tpu.dynamic_rotate %169 by %c240_i32 dim 1 : vector<2x256xf32>, i32 -> vector<2x256xf32>
    %c239_i32 = arith.constant 239 : i32
    %177 = tpu.dynamic_rotate %169 by %c239_i32 dim 1 : vector<2x256xf32>, i32 -> vector<2x256xf32>
    %c238_i32 = arith.constant 238 : i32
    %178 = tpu.dynamic_rotate %169 by %c238_i32 dim 1 : vector<2x256xf32>, i32 -> vector<2x256xf32>
    %c224_i32 = arith.constant 224 : i32
    %179 = tpu.dynamic_rotate %169 by %c224_i32 dim 1 : vector<2x256xf32>, i32 -> vector<2x256xf32>
    %c223_i32 = arith.constant 223 : i32
    %180 = tpu.dynamic_rotate %169 by %c223_i32 dim 1 : vector<2x256xf32>, i32 -> vector<2x256xf32>
    %c222_i32 = arith.constant 222 : i32
    %181 = tpu.dynamic_rotate %169 by %c222_i32 dim 1 : vector<2x256xf32>, i32 -> vector<2x256xf32>
    %c255_i32_12 = arith.constant 255 : i32
    %182 = tpu.dynamic_rotate %171 by %c255_i32_12 dim 1 : vector<2x256xf32>, i32 -> vector<2x256xf32>
    %c254_i32_13 = arith.constant 254 : i32
    %183 = tpu.dynamic_rotate %171 by %c254_i32_13 dim 1 : vector<2x256xf32>, i32 -> vector<2x256xf32>
    %c240_i32_14 = arith.constant 240 : i32
    %184 = tpu.dynamic_rotate %171 by %c240_i32_14 dim 1 : vector<2x256xf32>, i32 -> vector<2x256xf32>
    %c239_i32_15 = arith.constant 239 : i32
    %185 = tpu.dynamic_rotate %171 by %c239_i32_15 dim 1 : vector<2x256xf32>, i32 -> vector<2x256xf32>
    %c238_i32_16 = arith.constant 238 : i32
    %186 = tpu.dynamic_rotate %171 by %c238_i32_16 dim 1 : vector<2x256xf32>, i32 -> vector<2x256xf32>
    %c224_i32_17 = arith.constant 224 : i32
    %187 = tpu.dynamic_rotate %171 by %c224_i32_17 dim 1 : vector<2x256xf32>, i32 -> vector<2x256xf32>
    %c223_i32_18 = arith.constant 223 : i32
    %188 = tpu.dynamic_rotate %171 by %c223_i32_18 dim 1 : vector<2x256xf32>, i32 -> vector<2x256xf32>
    %c222_i32_19 = arith.constant 222 : i32
    %189 = tpu.dynamic_rotate %171 by %c222_i32_19 dim 1 : vector<2x256xf32>, i32 -> vector<2x256xf32>
    %c255_i32_20 = arith.constant 255 : i32
    %190 = tpu.dynamic_rotate %173 by %c255_i32_20 dim 1 : vector<2x256xf32>, i32 -> vector<2x256xf32>
    %c254_i32_21 = arith.constant 254 : i32
    %191 = tpu.dynamic_rotate %173 by %c254_i32_21 dim 1 : vector<2x256xf32>, i32 -> vector<2x256xf32>
    %c240_i32_22 = arith.constant 240 : i32
    %192 = tpu.dynamic_rotate %173 by %c240_i32_22 dim 1 : vector<2x256xf32>, i32 -> vector<2x256xf32>
    %c239_i32_23 = arith.constant 239 : i32
    %193 = tpu.dynamic_rotate %173 by %c239_i32_23 dim 1 : vector<2x256xf32>, i32 -> vector<2x256xf32>
    %c238_i32_24 = arith.constant 238 : i32
    %194 = tpu.dynamic_rotate %173 by %c238_i32_24 dim 1 : vector<2x256xf32>, i32 -> vector<2x256xf32>
    %c224_i32_25 = arith.constant 224 : i32
    %195 = tpu.dynamic_rotate %173 by %c224_i32_25 dim 1 : vector<2x256xf32>, i32 -> vector<2x256xf32>
    %c223_i32_26 = arith.constant 223 : i32
    %196 = tpu.dynamic_rotate %173 by %c223_i32_26 dim 1 : vector<2x256xf32>, i32 -> vector<2x256xf32>
    %c222_i32_27 = arith.constant 222 : i32
    %197 = tpu.dynamic_rotate %173 by %c222_i32_27 dim 1 : vector<2x256xf32>, i32 -> vector<2x256xf32>
    %198 = arith.mulf %1, %169 : vector<2x256xf32>
    %199 = arith.mulf %3, %174 : vector<2x256xf32>
    %200 = arith.addf %198, %199 : vector<2x256xf32>
    %201 = arith.mulf %5, %175 : vector<2x256xf32>
    %202 = arith.addf %200, %201 : vector<2x256xf32>
    %203 = arith.mulf %7, %176 : vector<2x256xf32>
    %204 = arith.addf %202, %203 : vector<2x256xf32>
    %205 = arith.mulf %9, %177 : vector<2x256xf32>
    %206 = arith.addf %204, %205 : vector<2x256xf32>
    %207 = arith.mulf %11, %178 : vector<2x256xf32>
    %208 = arith.addf %206, %207 : vector<2x256xf32>
    %209 = arith.mulf %13, %179 : vector<2x256xf32>
    %210 = arith.addf %208, %209 : vector<2x256xf32>
    %211 = arith.mulf %15, %180 : vector<2x256xf32>
    %212 = arith.addf %210, %211 : vector<2x256xf32>
    %213 = arith.mulf %17, %181 : vector<2x256xf32>
    %214 = arith.addf %212, %213 : vector<2x256xf32>
    %215 = arith.mulf %19, %171 : vector<2x256xf32>
    %216 = arith.mulf %21, %182 : vector<2x256xf32>
    %217 = arith.addf %215, %216 : vector<2x256xf32>
    %218 = arith.mulf %23, %183 : vector<2x256xf32>
    %219 = arith.addf %217, %218 : vector<2x256xf32>
    %220 = arith.mulf %25, %184 : vector<2x256xf32>
    %221 = arith.addf %219, %220 : vector<2x256xf32>
    %222 = arith.mulf %27, %185 : vector<2x256xf32>
    %223 = arith.addf %221, %222 : vector<2x256xf32>
    %224 = arith.mulf %29, %186 : vector<2x256xf32>
    %225 = arith.addf %223, %224 : vector<2x256xf32>
    %226 = arith.mulf %31, %187 : vector<2x256xf32>
    %227 = arith.addf %225, %226 : vector<2x256xf32>
    %228 = arith.mulf %33, %188 : vector<2x256xf32>
    %229 = arith.addf %227, %228 : vector<2x256xf32>
    %230 = arith.mulf %35, %189 : vector<2x256xf32>
    %231 = arith.addf %229, %230 : vector<2x256xf32>
    %232 = arith.mulf %37, %173 : vector<2x256xf32>
    %233 = arith.mulf %39, %190 : vector<2x256xf32>
    %234 = arith.addf %232, %233 : vector<2x256xf32>
    %235 = arith.mulf %41, %191 : vector<2x256xf32>
    %236 = arith.addf %234, %235 : vector<2x256xf32>
    %237 = arith.mulf %43, %192 : vector<2x256xf32>
    %238 = arith.addf %236, %237 : vector<2x256xf32>
    %239 = arith.mulf %45, %193 : vector<2x256xf32>
    %240 = arith.addf %238, %239 : vector<2x256xf32>
    %241 = arith.mulf %47, %194 : vector<2x256xf32>
    %242 = arith.addf %240, %241 : vector<2x256xf32>
    %243 = arith.mulf %49, %195 : vector<2x256xf32>
    %244 = arith.addf %242, %243 : vector<2x256xf32>
    %245 = arith.mulf %51, %196 : vector<2x256xf32>
    %246 = arith.addf %244, %245 : vector<2x256xf32>
    %247 = arith.mulf %53, %197 : vector<2x256xf32>
    %248 = arith.addf %246, %247 : vector<2x256xf32>
    %249 = arith.addf %214, %231 : vector<2x256xf32>
    %250 = arith.addf %248, %163 : vector<2x256xf32>
    %251 = arith.addf %249, %250 : vector<2x256xf32>
    %252 = arith.mulf %55, %169 : vector<2x256xf32>
    %253 = arith.mulf %57, %174 : vector<2x256xf32>
    %254 = arith.addf %252, %253 : vector<2x256xf32>
    %255 = arith.mulf %59, %175 : vector<2x256xf32>
    %256 = arith.addf %254, %255 : vector<2x256xf32>
    %257 = arith.mulf %61, %176 : vector<2x256xf32>
    %258 = arith.addf %256, %257 : vector<2x256xf32>
    %259 = arith.mulf %63, %177 : vector<2x256xf32>
    %260 = arith.addf %258, %259 : vector<2x256xf32>
    %261 = arith.mulf %65, %178 : vector<2x256xf32>
    %262 = arith.addf %260, %261 : vector<2x256xf32>
    %263 = arith.mulf %67, %179 : vector<2x256xf32>
    %264 = arith.addf %262, %263 : vector<2x256xf32>
    %265 = arith.mulf %69, %180 : vector<2x256xf32>
    %266 = arith.addf %264, %265 : vector<2x256xf32>
    %267 = arith.mulf %71, %181 : vector<2x256xf32>
    %268 = arith.addf %266, %267 : vector<2x256xf32>
    %269 = arith.mulf %73, %171 : vector<2x256xf32>
    %270 = arith.mulf %75, %182 : vector<2x256xf32>
    %271 = arith.addf %269, %270 : vector<2x256xf32>
    %272 = arith.mulf %77, %183 : vector<2x256xf32>
    %273 = arith.addf %271, %272 : vector<2x256xf32>
    %274 = arith.mulf %79, %184 : vector<2x256xf32>
    %275 = arith.addf %273, %274 : vector<2x256xf32>
    %276 = arith.mulf %81, %185 : vector<2x256xf32>
    %277 = arith.addf %275, %276 : vector<2x256xf32>
    %278 = arith.mulf %83, %186 : vector<2x256xf32>
    %279 = arith.addf %277, %278 : vector<2x256xf32>
    %280 = arith.mulf %85, %187 : vector<2x256xf32>
    %281 = arith.addf %279, %280 : vector<2x256xf32>
    %282 = arith.mulf %87, %188 : vector<2x256xf32>
    %283 = arith.addf %281, %282 : vector<2x256xf32>
    %284 = arith.mulf %89, %189 : vector<2x256xf32>
    %285 = arith.addf %283, %284 : vector<2x256xf32>
    %286 = arith.mulf %91, %173 : vector<2x256xf32>
    %287 = arith.mulf %93, %190 : vector<2x256xf32>
    %288 = arith.addf %286, %287 : vector<2x256xf32>
    %289 = arith.mulf %95, %191 : vector<2x256xf32>
    %290 = arith.addf %288, %289 : vector<2x256xf32>
    %291 = arith.mulf %97, %192 : vector<2x256xf32>
    %292 = arith.addf %290, %291 : vector<2x256xf32>
    %293 = arith.mulf %99, %193 : vector<2x256xf32>
    %294 = arith.addf %292, %293 : vector<2x256xf32>
    %295 = arith.mulf %101, %194 : vector<2x256xf32>
    %296 = arith.addf %294, %295 : vector<2x256xf32>
    %297 = arith.mulf %103, %195 : vector<2x256xf32>
    %298 = arith.addf %296, %297 : vector<2x256xf32>
    %299 = arith.mulf %105, %196 : vector<2x256xf32>
    %300 = arith.addf %298, %299 : vector<2x256xf32>
    %301 = arith.mulf %107, %197 : vector<2x256xf32>
    %302 = arith.addf %300, %301 : vector<2x256xf32>
    %303 = arith.addf %268, %285 : vector<2x256xf32>
    %304 = arith.addf %302, %165 : vector<2x256xf32>
    %305 = arith.addf %303, %304 : vector<2x256xf32>
    %306 = arith.mulf %109, %169 : vector<2x256xf32>
    %307 = arith.mulf %111, %174 : vector<2x256xf32>
    %308 = arith.addf %306, %307 : vector<2x256xf32>
    %309 = arith.mulf %113, %175 : vector<2x256xf32>
    %310 = arith.addf %308, %309 : vector<2x256xf32>
    %311 = arith.mulf %115, %176 : vector<2x256xf32>
    %312 = arith.addf %310, %311 : vector<2x256xf32>
    %313 = arith.mulf %117, %177 : vector<2x256xf32>
    %314 = arith.addf %312, %313 : vector<2x256xf32>
    %315 = arith.mulf %119, %178 : vector<2x256xf32>
    %316 = arith.addf %314, %315 : vector<2x256xf32>
    %317 = arith.mulf %121, %179 : vector<2x256xf32>
    %318 = arith.addf %316, %317 : vector<2x256xf32>
    %319 = arith.mulf %123, %180 : vector<2x256xf32>
    %320 = arith.addf %318, %319 : vector<2x256xf32>
    %321 = arith.mulf %125, %181 : vector<2x256xf32>
    %322 = arith.addf %320, %321 : vector<2x256xf32>
    %323 = arith.mulf %127, %171 : vector<2x256xf32>
    %324 = arith.mulf %129, %182 : vector<2x256xf32>
    %325 = arith.addf %323, %324 : vector<2x256xf32>
    %326 = arith.mulf %131, %183 : vector<2x256xf32>
    %327 = arith.addf %325, %326 : vector<2x256xf32>
    %328 = arith.mulf %133, %184 : vector<2x256xf32>
    %329 = arith.addf %327, %328 : vector<2x256xf32>
    %330 = arith.mulf %135, %185 : vector<2x256xf32>
    %331 = arith.addf %329, %330 : vector<2x256xf32>
    %332 = arith.mulf %137, %186 : vector<2x256xf32>
    %333 = arith.addf %331, %332 : vector<2x256xf32>
    %334 = arith.mulf %139, %187 : vector<2x256xf32>
    %335 = arith.addf %333, %334 : vector<2x256xf32>
    %336 = arith.mulf %141, %188 : vector<2x256xf32>
    %337 = arith.addf %335, %336 : vector<2x256xf32>
    %338 = arith.mulf %143, %189 : vector<2x256xf32>
    %339 = arith.addf %337, %338 : vector<2x256xf32>
    %340 = arith.mulf %145, %173 : vector<2x256xf32>
    %341 = arith.mulf %147, %190 : vector<2x256xf32>
    %342 = arith.addf %340, %341 : vector<2x256xf32>
    %343 = arith.mulf %149, %191 : vector<2x256xf32>
    %344 = arith.addf %342, %343 : vector<2x256xf32>
    %345 = arith.mulf %151, %192 : vector<2x256xf32>
    %346 = arith.addf %344, %345 : vector<2x256xf32>
    %347 = arith.mulf %153, %193 : vector<2x256xf32>
    %348 = arith.addf %346, %347 : vector<2x256xf32>
    %349 = arith.mulf %155, %194 : vector<2x256xf32>
    %350 = arith.addf %348, %349 : vector<2x256xf32>
    %351 = arith.mulf %157, %195 : vector<2x256xf32>
    %352 = arith.addf %350, %351 : vector<2x256xf32>
    %353 = arith.mulf %159, %196 : vector<2x256xf32>
    %354 = arith.addf %352, %353 : vector<2x256xf32>
    %355 = arith.mulf %161, %197 : vector<2x256xf32>
    %356 = arith.addf %354, %355 : vector<2x256xf32>
    %357 = arith.addf %322, %339 : vector<2x256xf32>
    %358 = arith.addf %356, %167 : vector<2x256xf32>
    %359 = arith.addf %357, %358 : vector<2x256xf32>
    %c255_i32_28 = arith.constant 255 : i32
    %360 = tpu.dynamic_rotate %251 by %c255_i32_28 dim 1 : vector<2x256xf32>, i32 -> vector<2x256xf32>
    %c254_i32_29 = arith.constant 254 : i32
    %361 = tpu.dynamic_rotate %251 by %c254_i32_29 dim 1 : vector<2x256xf32>, i32 -> vector<2x256xf32>
    %c240_i32_30 = arith.constant 240 : i32
    %362 = tpu.dynamic_rotate %251 by %c240_i32_30 dim 1 : vector<2x256xf32>, i32 -> vector<2x256xf32>
    %c239_i32_31 = arith.constant 239 : i32
    %363 = tpu.dynamic_rotate %251 by %c239_i32_31 dim 1 : vector<2x256xf32>, i32 -> vector<2x256xf32>
    %c238_i32_32 = arith.constant 238 : i32
    %364 = tpu.dynamic_rotate %251 by %c238_i32_32 dim 1 : vector<2x256xf32>, i32 -> vector<2x256xf32>
    %c224_i32_33 = arith.constant 224 : i32
    %365 = tpu.dynamic_rotate %251 by %c224_i32_33 dim 1 : vector<2x256xf32>, i32 -> vector<2x256xf32>
    %c223_i32_34 = arith.constant 223 : i32
    %366 = tpu.dynamic_rotate %251 by %c223_i32_34 dim 1 : vector<2x256xf32>, i32 -> vector<2x256xf32>
    %c222_i32_35 = arith.constant 222 : i32
    %367 = tpu.dynamic_rotate %251 by %c222_i32_35 dim 1 : vector<2x256xf32>, i32 -> vector<2x256xf32>
    %c255_i32_36 = arith.constant 255 : i32
    %368 = tpu.dynamic_rotate %305 by %c255_i32_36 dim 1 : vector<2x256xf32>, i32 -> vector<2x256xf32>
    %c254_i32_37 = arith.constant 254 : i32
    %369 = tpu.dynamic_rotate %305 by %c254_i32_37 dim 1 : vector<2x256xf32>, i32 -> vector<2x256xf32>
    %c240_i32_38 = arith.constant 240 : i32
    %370 = tpu.dynamic_rotate %305 by %c240_i32_38 dim 1 : vector<2x256xf32>, i32 -> vector<2x256xf32>
    %c239_i32_39 = arith.constant 239 : i32
    %371 = tpu.dynamic_rotate %305 by %c239_i32_39 dim 1 : vector<2x256xf32>, i32 -> vector<2x256xf32>
    %c238_i32_40 = arith.constant 238 : i32
    %372 = tpu.dynamic_rotate %305 by %c238_i32_40 dim 1 : vector<2x256xf32>, i32 -> vector<2x256xf32>
    %c224_i32_41 = arith.constant 224 : i32
    %373 = tpu.dynamic_rotate %305 by %c224_i32_41 dim 1 : vector<2x256xf32>, i32 -> vector<2x256xf32>
    %c223_i32_42 = arith.constant 223 : i32
    %374 = tpu.dynamic_rotate %305 by %c223_i32_42 dim 1 : vector<2x256xf32>, i32 -> vector<2x256xf32>
    %c222_i32_43 = arith.constant 222 : i32
    %375 = tpu.dynamic_rotate %305 by %c222_i32_43 dim 1 : vector<2x256xf32>, i32 -> vector<2x256xf32>
    %c255_i32_44 = arith.constant 255 : i32
    %376 = tpu.dynamic_rotate %359 by %c255_i32_44 dim 1 : vector<2x256xf32>, i32 -> vector<2x256xf32>
    %c254_i32_45 = arith.constant 254 : i32
    %377 = tpu.dynamic_rotate %359 by %c254_i32_45 dim 1 : vector<2x256xf32>, i32 -> vector<2x256xf32>
    %c240_i32_46 = arith.constant 240 : i32
    %378 = tpu.dynamic_rotate %359 by %c240_i32_46 dim 1 : vector<2x256xf32>, i32 -> vector<2x256xf32>
    %c239_i32_47 = arith.constant 239 : i32
    %379 = tpu.dynamic_rotate %359 by %c239_i32_47 dim 1 : vector<2x256xf32>, i32 -> vector<2x256xf32>
    %c238_i32_48 = arith.constant 238 : i32
    %380 = tpu.dynamic_rotate %359 by %c238_i32_48 dim 1 : vector<2x256xf32>, i32 -> vector<2x256xf32>
    %c224_i32_49 = arith.constant 224 : i32
    %381 = tpu.dynamic_rotate %359 by %c224_i32_49 dim 1 : vector<2x256xf32>, i32 -> vector<2x256xf32>
    %c223_i32_50 = arith.constant 223 : i32
    %382 = tpu.dynamic_rotate %359 by %c223_i32_50 dim 1 : vector<2x256xf32>, i32 -> vector<2x256xf32>
    %c222_i32_51 = arith.constant 222 : i32
    %383 = tpu.dynamic_rotate %359 by %c222_i32_51 dim 1 : vector<2x256xf32>, i32 -> vector<2x256xf32>
    %384 = arith.mulf %1, %251 : vector<2x256xf32>
    %385 = arith.mulf %3, %360 : vector<2x256xf32>
    %386 = arith.addf %384, %385 : vector<2x256xf32>
    %387 = arith.mulf %5, %361 : vector<2x256xf32>
    %388 = arith.addf %386, %387 : vector<2x256xf32>
    %389 = arith.mulf %7, %362 : vector<2x256xf32>
    %390 = arith.addf %388, %389 : vector<2x256xf32>
    %391 = arith.mulf %9, %363 : vector<2x256xf32>
    %392 = arith.addf %390, %391 : vector<2x256xf32>
    %393 = arith.mulf %11, %364 : vector<2x256xf32>
    %394 = arith.addf %392, %393 : vector<2x256xf32>
    %395 = arith.mulf %13, %365 : vector<2x256xf32>
    %396 = arith.addf %394, %395 : vector<2x256xf32>
    %397 = arith.mulf %15, %366 : vector<2x256xf32>
    %398 = arith.addf %396, %397 : vector<2x256xf32>
    %399 = arith.mulf %17, %367 : vector<2x256xf32>
    %400 = arith.addf %398, %399 : vector<2x256xf32>
    %401 = arith.mulf %19, %305 : vector<2x256xf32>
    %402 = arith.mulf %21, %368 : vector<2x256xf32>
    %403 = arith.addf %401, %402 : vector<2x256xf32>
    %404 = arith.mulf %23, %369 : vector<2x256xf32>
    %405 = arith.addf %403, %404 : vector<2x256xf32>
    %406 = arith.mulf %25, %370 : vector<2x256xf32>
    %407 = arith.addf %405, %406 : vector<2x256xf32>
    %408 = arith.mulf %27, %371 : vector<2x256xf32>
    %409 = arith.addf %407, %408 : vector<2x256xf32>
    %410 = arith.mulf %29, %372 : vector<2x256xf32>
    %411 = arith.addf %409, %410 : vector<2x256xf32>
    %412 = arith.mulf %31, %373 : vector<2x256xf32>
    %413 = arith.addf %411, %412 : vector<2x256xf32>
    %414 = arith.mulf %33, %374 : vector<2x256xf32>
    %415 = arith.addf %413, %414 : vector<2x256xf32>
    %416 = arith.mulf %35, %375 : vector<2x256xf32>
    %417 = arith.addf %415, %416 : vector<2x256xf32>
    %418 = arith.mulf %37, %359 : vector<2x256xf32>
    %419 = arith.mulf %39, %376 : vector<2x256xf32>
    %420 = arith.addf %418, %419 : vector<2x256xf32>
    %421 = arith.mulf %41, %377 : vector<2x256xf32>
    %422 = arith.addf %420, %421 : vector<2x256xf32>
    %423 = arith.mulf %43, %378 : vector<2x256xf32>
    %424 = arith.addf %422, %423 : vector<2x256xf32>
    %425 = arith.mulf %45, %379 : vector<2x256xf32>
    %426 = arith.addf %424, %425 : vector<2x256xf32>
    %427 = arith.mulf %47, %380 : vector<2x256xf32>
    %428 = arith.addf %426, %427 : vector<2x256xf32>
    %429 = arith.mulf %49, %381 : vector<2x256xf32>
    %430 = arith.addf %428, %429 : vector<2x256xf32>
    %431 = arith.mulf %51, %382 : vector<2x256xf32>
    %432 = arith.addf %430, %431 : vector<2x256xf32>
    %433 = arith.mulf %53, %383 : vector<2x256xf32>
    %434 = arith.addf %432, %433 : vector<2x256xf32>
    %435 = arith.addf %400, %417 : vector<2x256xf32>
    %436 = arith.addf %434, %163 : vector<2x256xf32>
    %437 = arith.addf %435, %436 : vector<2x256xf32>
    %438 = arith.mulf %55, %251 : vector<2x256xf32>
    %439 = arith.mulf %57, %360 : vector<2x256xf32>
    %440 = arith.addf %438, %439 : vector<2x256xf32>
    %441 = arith.mulf %59, %361 : vector<2x256xf32>
    %442 = arith.addf %440, %441 : vector<2x256xf32>
    %443 = arith.mulf %61, %362 : vector<2x256xf32>
    %444 = arith.addf %442, %443 : vector<2x256xf32>
    %445 = arith.mulf %63, %363 : vector<2x256xf32>
    %446 = arith.addf %444, %445 : vector<2x256xf32>
    %447 = arith.mulf %65, %364 : vector<2x256xf32>
    %448 = arith.addf %446, %447 : vector<2x256xf32>
    %449 = arith.mulf %67, %365 : vector<2x256xf32>
    %450 = arith.addf %448, %449 : vector<2x256xf32>
    %451 = arith.mulf %69, %366 : vector<2x256xf32>
    %452 = arith.addf %450, %451 : vector<2x256xf32>
    %453 = arith.mulf %71, %367 : vector<2x256xf32>
    %454 = arith.addf %452, %453 : vector<2x256xf32>
    %455 = arith.mulf %73, %305 : vector<2x256xf32>
    %456 = arith.mulf %75, %368 : vector<2x256xf32>
    %457 = arith.addf %455, %456 : vector<2x256xf32>
    %458 = arith.mulf %77, %369 : vector<2x256xf32>
    %459 = arith.addf %457, %458 : vector<2x256xf32>
    %460 = arith.mulf %79, %370 : vector<2x256xf32>
    %461 = arith.addf %459, %460 : vector<2x256xf32>
    %462 = arith.mulf %81, %371 : vector<2x256xf32>
    %463 = arith.addf %461, %462 : vector<2x256xf32>
    %464 = arith.mulf %83, %372 : vector<2x256xf32>
    %465 = arith.addf %463, %464 : vector<2x256xf32>
    %466 = arith.mulf %85, %373 : vector<2x256xf32>
    %467 = arith.addf %465, %466 : vector<2x256xf32>
    %468 = arith.mulf %87, %374 : vector<2x256xf32>
    %469 = arith.addf %467, %468 : vector<2x256xf32>
    %470 = arith.mulf %89, %375 : vector<2x256xf32>
    %471 = arith.addf %469, %470 : vector<2x256xf32>
    %472 = arith.mulf %91, %359 : vector<2x256xf32>
    %473 = arith.mulf %93, %376 : vector<2x256xf32>
    %474 = arith.addf %472, %473 : vector<2x256xf32>
    %475 = arith.mulf %95, %377 : vector<2x256xf32>
    %476 = arith.addf %474, %475 : vector<2x256xf32>
    %477 = arith.mulf %97, %378 : vector<2x256xf32>
    %478 = arith.addf %476, %477 : vector<2x256xf32>
    %479 = arith.mulf %99, %379 : vector<2x256xf32>
    %480 = arith.addf %478, %479 : vector<2x256xf32>
    %481 = arith.mulf %101, %380 : vector<2x256xf32>
    %482 = arith.addf %480, %481 : vector<2x256xf32>
    %483 = arith.mulf %103, %381 : vector<2x256xf32>
    %484 = arith.addf %482, %483 : vector<2x256xf32>
    %485 = arith.mulf %105, %382 : vector<2x256xf32>
    %486 = arith.addf %484, %485 : vector<2x256xf32>
    %487 = arith.mulf %107, %383 : vector<2x256xf32>
    %488 = arith.addf %486, %487 : vector<2x256xf32>
    %489 = arith.addf %454, %471 : vector<2x256xf32>
    %490 = arith.addf %488, %165 : vector<2x256xf32>
    %491 = arith.addf %489, %490 : vector<2x256xf32>
    %492 = arith.mulf %109, %251 : vector<2x256xf32>
    %493 = arith.mulf %111, %360 : vector<2x256xf32>
    %494 = arith.addf %492, %493 : vector<2x256xf32>
    %495 = arith.mulf %113, %361 : vector<2x256xf32>
    %496 = arith.addf %494, %495 : vector<2x256xf32>
    %497 = arith.mulf %115, %362 : vector<2x256xf32>
    %498 = arith.addf %496, %497 : vector<2x256xf32>
    %499 = arith.mulf %117, %363 : vector<2x256xf32>
    %500 = arith.addf %498, %499 : vector<2x256xf32>
    %501 = arith.mulf %119, %364 : vector<2x256xf32>
    %502 = arith.addf %500, %501 : vector<2x256xf32>
    %503 = arith.mulf %121, %365 : vector<2x256xf32>
    %504 = arith.addf %502, %503 : vector<2x256xf32>
    %505 = arith.mulf %123, %366 : vector<2x256xf32>
    %506 = arith.addf %504, %505 : vector<2x256xf32>
    %507 = arith.mulf %125, %367 : vector<2x256xf32>
    %508 = arith.addf %506, %507 : vector<2x256xf32>
    %509 = arith.mulf %127, %305 : vector<2x256xf32>
    %510 = arith.mulf %129, %368 : vector<2x256xf32>
    %511 = arith.addf %509, %510 : vector<2x256xf32>
    %512 = arith.mulf %131, %369 : vector<2x256xf32>
    %513 = arith.addf %511, %512 : vector<2x256xf32>
    %514 = arith.mulf %133, %370 : vector<2x256xf32>
    %515 = arith.addf %513, %514 : vector<2x256xf32>
    %516 = arith.mulf %135, %371 : vector<2x256xf32>
    %517 = arith.addf %515, %516 : vector<2x256xf32>
    %518 = arith.mulf %137, %372 : vector<2x256xf32>
    %519 = arith.addf %517, %518 : vector<2x256xf32>
    %520 = arith.mulf %139, %373 : vector<2x256xf32>
    %521 = arith.addf %519, %520 : vector<2x256xf32>
    %522 = arith.mulf %141, %374 : vector<2x256xf32>
    %523 = arith.addf %521, %522 : vector<2x256xf32>
    %524 = arith.mulf %143, %375 : vector<2x256xf32>
    %525 = arith.addf %523, %524 : vector<2x256xf32>
    %526 = arith.mulf %145, %359 : vector<2x256xf32>
    %527 = arith.mulf %147, %376 : vector<2x256xf32>
    %528 = arith.addf %526, %527 : vector<2x256xf32>
    %529 = arith.mulf %149, %377 : vector<2x256xf32>
    %530 = arith.addf %528, %529 : vector<2x256xf32>
    %531 = arith.mulf %151, %378 : vector<2x256xf32>
    %532 = arith.addf %530, %531 : vector<2x256xf32>
    %533 = arith.mulf %153, %379 : vector<2x256xf32>
    %534 = arith.addf %532, %533 : vector<2x256xf32>
    %535 = arith.mulf %155, %380 : vector<2x256xf32>
    %536 = arith.addf %534, %535 : vector<2x256xf32>
    %537 = arith.mulf %157, %381 : vector<2x256xf32>
    %538 = arith.addf %536, %537 : vector<2x256xf32>
    %539 = arith.mulf %159, %382 : vector<2x256xf32>
    %540 = arith.addf %538, %539 : vector<2x256xf32>
    %541 = arith.mulf %161, %383 : vector<2x256xf32>
    %542 = arith.addf %540, %541 : vector<2x256xf32>
    %543 = arith.addf %508, %525 : vector<2x256xf32>
    %544 = arith.addf %542, %167 : vector<2x256xf32>
    %545 = arith.addf %543, %544 : vector<2x256xf32>
    %c255_i32_52 = arith.constant 255 : i32
    %546 = tpu.dynamic_rotate %437 by %c255_i32_52 dim 1 : vector<2x256xf32>, i32 -> vector<2x256xf32>
    %c254_i32_53 = arith.constant 254 : i32
    %547 = tpu.dynamic_rotate %437 by %c254_i32_53 dim 1 : vector<2x256xf32>, i32 -> vector<2x256xf32>
    %c240_i32_54 = arith.constant 240 : i32
    %548 = tpu.dynamic_rotate %437 by %c240_i32_54 dim 1 : vector<2x256xf32>, i32 -> vector<2x256xf32>
    %c239_i32_55 = arith.constant 239 : i32
    %549 = tpu.dynamic_rotate %437 by %c239_i32_55 dim 1 : vector<2x256xf32>, i32 -> vector<2x256xf32>
    %c238_i32_56 = arith.constant 238 : i32
    %550 = tpu.dynamic_rotate %437 by %c238_i32_56 dim 1 : vector<2x256xf32>, i32 -> vector<2x256xf32>
    %c224_i32_57 = arith.constant 224 : i32
    %551 = tpu.dynamic_rotate %437 by %c224_i32_57 dim 1 : vector<2x256xf32>, i32 -> vector<2x256xf32>
    %c223_i32_58 = arith.constant 223 : i32
    %552 = tpu.dynamic_rotate %437 by %c223_i32_58 dim 1 : vector<2x256xf32>, i32 -> vector<2x256xf32>
    %c222_i32_59 = arith.constant 222 : i32
    %553 = tpu.dynamic_rotate %437 by %c222_i32_59 dim 1 : vector<2x256xf32>, i32 -> vector<2x256xf32>
    %c255_i32_60 = arith.constant 255 : i32
    %554 = tpu.dynamic_rotate %491 by %c255_i32_60 dim 1 : vector<2x256xf32>, i32 -> vector<2x256xf32>
    %c254_i32_61 = arith.constant 254 : i32
    %555 = tpu.dynamic_rotate %491 by %c254_i32_61 dim 1 : vector<2x256xf32>, i32 -> vector<2x256xf32>
    %c240_i32_62 = arith.constant 240 : i32
    %556 = tpu.dynamic_rotate %491 by %c240_i32_62 dim 1 : vector<2x256xf32>, i32 -> vector<2x256xf32>
    %c239_i32_63 = arith.constant 239 : i32
    %557 = tpu.dynamic_rotate %491 by %c239_i32_63 dim 1 : vector<2x256xf32>, i32 -> vector<2x256xf32>
    %c238_i32_64 = arith.constant 238 : i32
    %558 = tpu.dynamic_rotate %491 by %c238_i32_64 dim 1 : vector<2x256xf32>, i32 -> vector<2x256xf32>
    %c224_i32_65 = arith.constant 224 : i32
    %559 = tpu.dynamic_rotate %491 by %c224_i32_65 dim 1 : vector<2x256xf32>, i32 -> vector<2x256xf32>
    %c223_i32_66 = arith.constant 223 : i32
    %560 = tpu.dynamic_rotate %491 by %c223_i32_66 dim 1 : vector<2x256xf32>, i32 -> vector<2x256xf32>
    %c222_i32_67 = arith.constant 222 : i32
    %561 = tpu.dynamic_rotate %491 by %c222_i32_67 dim 1 : vector<2x256xf32>, i32 -> vector<2x256xf32>
    %c255_i32_68 = arith.constant 255 : i32
    %562 = tpu.dynamic_rotate %545 by %c255_i32_68 dim 1 : vector<2x256xf32>, i32 -> vector<2x256xf32>
    %c254_i32_69 = arith.constant 254 : i32
    %563 = tpu.dynamic_rotate %545 by %c254_i32_69 dim 1 : vector<2x256xf32>, i32 -> vector<2x256xf32>
    %c240_i32_70 = arith.constant 240 : i32
    %564 = tpu.dynamic_rotate %545 by %c240_i32_70 dim 1 : vector<2x256xf32>, i32 -> vector<2x256xf32>
    %c239_i32_71 = arith.constant 239 : i32
    %565 = tpu.dynamic_rotate %545 by %c239_i32_71 dim 1 : vector<2x256xf32>, i32 -> vector<2x256xf32>
    %c238_i32_72 = arith.constant 238 : i32
    %566 = tpu.dynamic_rotate %545 by %c238_i32_72 dim 1 : vector<2x256xf32>, i32 -> vector<2x256xf32>
    %c224_i32_73 = arith.constant 224 : i32
    %567 = tpu.dynamic_rotate %545 by %c224_i32_73 dim 1 : vector<2x256xf32>, i32 -> vector<2x256xf32>
    %c223_i32_74 = arith.constant 223 : i32
    %568 = tpu.dynamic_rotate %545 by %c223_i32_74 dim 1 : vector<2x256xf32>, i32 -> vector<2x256xf32>
    %c222_i32_75 = arith.constant 222 : i32
    %569 = tpu.dynamic_rotate %545 by %c222_i32_75 dim 1 : vector<2x256xf32>, i32 -> vector<2x256xf32>
    %570 = arith.mulf %1, %437 : vector<2x256xf32>
    %571 = arith.mulf %3, %546 : vector<2x256xf32>
    %572 = arith.addf %570, %571 : vector<2x256xf32>
    %573 = arith.mulf %5, %547 : vector<2x256xf32>
    %574 = arith.addf %572, %573 : vector<2x256xf32>
    %575 = arith.mulf %7, %548 : vector<2x256xf32>
    %576 = arith.addf %574, %575 : vector<2x256xf32>
    %577 = arith.mulf %9, %549 : vector<2x256xf32>
    %578 = arith.addf %576, %577 : vector<2x256xf32>
    %579 = arith.mulf %11, %550 : vector<2x256xf32>
    %580 = arith.addf %578, %579 : vector<2x256xf32>
    %581 = arith.mulf %13, %551 : vector<2x256xf32>
    %582 = arith.addf %580, %581 : vector<2x256xf32>
    %583 = arith.mulf %15, %552 : vector<2x256xf32>
    %584 = arith.addf %582, %583 : vector<2x256xf32>
    %585 = arith.mulf %17, %553 : vector<2x256xf32>
    %586 = arith.addf %584, %585 : vector<2x256xf32>
    %587 = arith.mulf %19, %491 : vector<2x256xf32>
    %588 = arith.mulf %21, %554 : vector<2x256xf32>
    %589 = arith.addf %587, %588 : vector<2x256xf32>
    %590 = arith.mulf %23, %555 : vector<2x256xf32>
    %591 = arith.addf %589, %590 : vector<2x256xf32>
    %592 = arith.mulf %25, %556 : vector<2x256xf32>
    %593 = arith.addf %591, %592 : vector<2x256xf32>
    %594 = arith.mulf %27, %557 : vector<2x256xf32>
    %595 = arith.addf %593, %594 : vector<2x256xf32>
    %596 = arith.mulf %29, %558 : vector<2x256xf32>
    %597 = arith.addf %595, %596 : vector<2x256xf32>
    %598 = arith.mulf %31, %559 : vector<2x256xf32>
    %599 = arith.addf %597, %598 : vector<2x256xf32>
    %600 = arith.mulf %33, %560 : vector<2x256xf32>
    %601 = arith.addf %599, %600 : vector<2x256xf32>
    %602 = arith.mulf %35, %561 : vector<2x256xf32>
    %603 = arith.addf %601, %602 : vector<2x256xf32>
    %604 = arith.mulf %37, %545 : vector<2x256xf32>
    %605 = arith.mulf %39, %562 : vector<2x256xf32>
    %606 = arith.addf %604, %605 : vector<2x256xf32>
    %607 = arith.mulf %41, %563 : vector<2x256xf32>
    %608 = arith.addf %606, %607 : vector<2x256xf32>
    %609 = arith.mulf %43, %564 : vector<2x256xf32>
    %610 = arith.addf %608, %609 : vector<2x256xf32>
    %611 = arith.mulf %45, %565 : vector<2x256xf32>
    %612 = arith.addf %610, %611 : vector<2x256xf32>
    %613 = arith.mulf %47, %566 : vector<2x256xf32>
    %614 = arith.addf %612, %613 : vector<2x256xf32>
    %615 = arith.mulf %49, %567 : vector<2x256xf32>
    %616 = arith.addf %614, %615 : vector<2x256xf32>
    %617 = arith.mulf %51, %568 : vector<2x256xf32>
    %618 = arith.addf %616, %617 : vector<2x256xf32>
    %619 = arith.mulf %53, %569 : vector<2x256xf32>
    %620 = arith.addf %618, %619 : vector<2x256xf32>
    %621 = arith.addf %586, %603 : vector<2x256xf32>
    %622 = arith.addf %620, %163 : vector<2x256xf32>
    %623 = arith.addf %621, %622 : vector<2x256xf32>
    %624 = arith.mulf %55, %437 : vector<2x256xf32>
    %625 = arith.mulf %57, %546 : vector<2x256xf32>
    %626 = arith.addf %624, %625 : vector<2x256xf32>
    %627 = arith.mulf %59, %547 : vector<2x256xf32>
    %628 = arith.addf %626, %627 : vector<2x256xf32>
    %629 = arith.mulf %61, %548 : vector<2x256xf32>
    %630 = arith.addf %628, %629 : vector<2x256xf32>
    %631 = arith.mulf %63, %549 : vector<2x256xf32>
    %632 = arith.addf %630, %631 : vector<2x256xf32>
    %633 = arith.mulf %65, %550 : vector<2x256xf32>
    %634 = arith.addf %632, %633 : vector<2x256xf32>
    %635 = arith.mulf %67, %551 : vector<2x256xf32>
    %636 = arith.addf %634, %635 : vector<2x256xf32>
    %637 = arith.mulf %69, %552 : vector<2x256xf32>
    %638 = arith.addf %636, %637 : vector<2x256xf32>
    %639 = arith.mulf %71, %553 : vector<2x256xf32>
    %640 = arith.addf %638, %639 : vector<2x256xf32>
    %641 = arith.mulf %73, %491 : vector<2x256xf32>
    %642 = arith.mulf %75, %554 : vector<2x256xf32>
    %643 = arith.addf %641, %642 : vector<2x256xf32>
    %644 = arith.mulf %77, %555 : vector<2x256xf32>
    %645 = arith.addf %643, %644 : vector<2x256xf32>
    %646 = arith.mulf %79, %556 : vector<2x256xf32>
    %647 = arith.addf %645, %646 : vector<2x256xf32>
    %648 = arith.mulf %81, %557 : vector<2x256xf32>
    %649 = arith.addf %647, %648 : vector<2x256xf32>
    %650 = arith.mulf %83, %558 : vector<2x256xf32>
    %651 = arith.addf %649, %650 : vector<2x256xf32>
    %652 = arith.mulf %85, %559 : vector<2x256xf32>
    %653 = arith.addf %651, %652 : vector<2x256xf32>
    %654 = arith.mulf %87, %560 : vector<2x256xf32>
    %655 = arith.addf %653, %654 : vector<2x256xf32>
    %656 = arith.mulf %89, %561 : vector<2x256xf32>
    %657 = arith.addf %655, %656 : vector<2x256xf32>
    %658 = arith.mulf %91, %545 : vector<2x256xf32>
    %659 = arith.mulf %93, %562 : vector<2x256xf32>
    %660 = arith.addf %658, %659 : vector<2x256xf32>
    %661 = arith.mulf %95, %563 : vector<2x256xf32>
    %662 = arith.addf %660, %661 : vector<2x256xf32>
    %663 = arith.mulf %97, %564 : vector<2x256xf32>
    %664 = arith.addf %662, %663 : vector<2x256xf32>
    %665 = arith.mulf %99, %565 : vector<2x256xf32>
    %666 = arith.addf %664, %665 : vector<2x256xf32>
    %667 = arith.mulf %101, %566 : vector<2x256xf32>
    %668 = arith.addf %666, %667 : vector<2x256xf32>
    %669 = arith.mulf %103, %567 : vector<2x256xf32>
    %670 = arith.addf %668, %669 : vector<2x256xf32>
    %671 = arith.mulf %105, %568 : vector<2x256xf32>
    %672 = arith.addf %670, %671 : vector<2x256xf32>
    %673 = arith.mulf %107, %569 : vector<2x256xf32>
    %674 = arith.addf %672, %673 : vector<2x256xf32>
    %675 = arith.addf %640, %657 : vector<2x256xf32>
    %676 = arith.addf %674, %165 : vector<2x256xf32>
    %677 = arith.addf %675, %676 : vector<2x256xf32>
    %678 = arith.mulf %109, %437 : vector<2x256xf32>
    %679 = arith.mulf %111, %546 : vector<2x256xf32>
    %680 = arith.addf %678, %679 : vector<2x256xf32>
    %681 = arith.mulf %113, %547 : vector<2x256xf32>
    %682 = arith.addf %680, %681 : vector<2x256xf32>
    %683 = arith.mulf %115, %548 : vector<2x256xf32>
    %684 = arith.addf %682, %683 : vector<2x256xf32>
    %685 = arith.mulf %117, %549 : vector<2x256xf32>
    %686 = arith.addf %684, %685 : vector<2x256xf32>
    %687 = arith.mulf %119, %550 : vector<2x256xf32>
    %688 = arith.addf %686, %687 : vector<2x256xf32>
    %689 = arith.mulf %121, %551 : vector<2x256xf32>
    %690 = arith.addf %688, %689 : vector<2x256xf32>
    %691 = arith.mulf %123, %552 : vector<2x256xf32>
    %692 = arith.addf %690, %691 : vector<2x256xf32>
    %693 = arith.mulf %125, %553 : vector<2x256xf32>
    %694 = arith.addf %692, %693 : vector<2x256xf32>
    %695 = arith.mulf %127, %491 : vector<2x256xf32>
    %696 = arith.mulf %129, %554 : vector<2x256xf32>
    %697 = arith.addf %695, %696 : vector<2x256xf32>
    %698 = arith.mulf %131, %555 : vector<2x256xf32>
    %699 = arith.addf %697, %698 : vector<2x256xf32>
    %700 = arith.mulf %133, %556 : vector<2x256xf32>
    %701 = arith.addf %699, %700 : vector<2x256xf32>
    %702 = arith.mulf %135, %557 : vector<2x256xf32>
    %703 = arith.addf %701, %702 : vector<2x256xf32>
    %704 = arith.mulf %137, %558 : vector<2x256xf32>
    %705 = arith.addf %703, %704 : vector<2x256xf32>
    %706 = arith.mulf %139, %559 : vector<2x256xf32>
    %707 = arith.addf %705, %706 : vector<2x256xf32>
    %708 = arith.mulf %141, %560 : vector<2x256xf32>
    %709 = arith.addf %707, %708 : vector<2x256xf32>
    %710 = arith.mulf %143, %561 : vector<2x256xf32>
    %711 = arith.addf %709, %710 : vector<2x256xf32>
    %712 = arith.mulf %145, %545 : vector<2x256xf32>
    %713 = arith.mulf %147, %562 : vector<2x256xf32>
    %714 = arith.addf %712, %713 : vector<2x256xf32>
    %715 = arith.mulf %149, %563 : vector<2x256xf32>
    %716 = arith.addf %714, %715 : vector<2x256xf32>
    %717 = arith.mulf %151, %564 : vector<2x256xf32>
    %718 = arith.addf %716, %717 : vector<2x256xf32>
    %719 = arith.mulf %153, %565 : vector<2x256xf32>
    %720 = arith.addf %718, %719 : vector<2x256xf32>
    %721 = arith.mulf %155, %566 : vector<2x256xf32>
    %722 = arith.addf %720, %721 : vector<2x256xf32>
    %723 = arith.mulf %157, %567 : vector<2x256xf32>
    %724 = arith.addf %722, %723 : vector<2x256xf32>
    %725 = arith.mulf %159, %568 : vector<2x256xf32>
    %726 = arith.addf %724, %725 : vector<2x256xf32>
    %727 = arith.mulf %161, %569 : vector<2x256xf32>
    %728 = arith.addf %726, %727 : vector<2x256xf32>
    %729 = arith.addf %694, %711 : vector<2x256xf32>
    %730 = arith.addf %728, %167 : vector<2x256xf32>
    %731 = arith.addf %729, %730 : vector<2x256xf32>
    %c0_76 = arith.constant 0 : index
    %c0_77 = arith.constant 0 : index
    %c0_78 = arith.constant 0 : index
    %732 = vector.load %arg3[%c0_76, %c0_77, %c0_78] : memref<3x2x256xf32, #tpu.memory_space<vmem>>, vector<1x2x256xf32>
    %733 = vector.shape_cast %732 : vector<1x2x256xf32> to vector<2x256xf32>
    %734 = vector.shape_cast %623 : vector<2x256xf32> to vector<1x2x256xf32>
    tpu.vector_store %arg3[%c0_76, %c0_77, %c0_78], %734 {strides = array<i32>} : memref<3x2x256xf32, #tpu.memory_space<vmem>>, vector<1x2x256xf32>,
    %c1_79 = arith.constant 1 : index
    %c0_80 = arith.constant 0 : index
    %c0_81 = arith.constant 0 : index
    %735 = vector.load %arg3[%c1_79, %c0_80, %c0_81] : memref<3x2x256xf32, #tpu.memory_space<vmem>>, vector<1x2x256xf32>
    %736 = vector.shape_cast %735 : vector<1x2x256xf32> to vector<2x256xf32>
    %737 = vector.shape_cast %677 : vector<2x256xf32> to vector<1x2x256xf32>
    tpu.vector_store %arg3[%c1_79, %c0_80, %c0_81], %737 {strides = array<i32>} : memref<3x2x256xf32, #tpu.memory_space<vmem>>, vector<1x2x256xf32>,
    %c2_82 = arith.constant 2 : index
    %c0_83 = arith.constant 0 : index
    %c0_84 = arith.constant 0 : index
    %738 = vector.load %arg3[%c2_82, %c0_83, %c0_84] : memref<3x2x256xf32, #tpu.memory_space<vmem>>, vector<1x2x256xf32>
    %739 = vector.shape_cast %738 : vector<1x2x256xf32> to vector<2x256xf32>
    %740 = vector.shape_cast %731 : vector<2x256xf32> to vector<1x2x256xf32>
    tpu.vector_store %arg3[%c2_82, %c0_83, %c0_84], %740 {strides = array<i32>} : memref<3x2x256xf32, #tpu.memory_space<vmem>>, vector<1x2x256xf32>,
    return
  }
}

</mosaic_0001>

<bundles_post_ra>
// kernel: tpu_custom_call.1
= control target key start
LH: loop header
LB: loop body
LE: loop exit
PB: predicated region body
PF: predicated region fallthrough
CT: control target
= control target key end

     0   :  { %s6160_s0 = inlined_call_operand.hbm [shape: f32[81], index: 0, kind: input, shape index: {}]   ;;  %s6161_s1 = inlined_call_operand.vmem [shape: f32[3], index: 1, kind: input, shape index: {}]   ;;  %s6162_s2 = inlined_call_operand.hbm [shape: f32[3,2,256], index: 2, kind: input, shape index: {}]   ;;  %s6163_s3 = inlined_call_operand.hbm [shape: f32[3,2,256], index: 3, kind: output, shape index: {}]  }
   0x1   :  { %6374 = sst [smem:[#allocation128_spill]] %s6163_s3 }
   0x2   :  { %8 = vsyncpa [#allocation5], 0 }
   0x3   :  { %9 = vsyncpa [#allocation6], 0 }
   0x4   :  { %10 = vsyncpa [#allocation3], 0 }
   0x5   :  { %11 = vsyncpa [#allocation4], 0  ;;  %s26_s14 = sshll.u32 %s6161_s1, 4  ;;  %s4033_s15 = smov [#allocation2]   ;;  %s27_s14 = int_to_ptr.vmem [resolvable:$true] %s26_s14 }
   0x6   :  { %19 = dma.hbm_to_smem %s6160_s0, 16, %s4033_s15, [#allocation5]  }
   0x7   :  { %s3973_s18 = scalar_lea.vmem %s27_s14, 16  ;;  %p3978_p1 = scmp.lt.s32.totalorder %s27_s14, %s27_s14 }
   0x8   :  { %p3974_p0 = scmp.ne.s32.totalorder %s27_s14, %s3973_s18  ;;  %p3979_p2 = scmp.lt.s32.totalorder %s3973_s18, %s3973_s18 }
   0xa   :  { %p3980_p3 = por %p3979_p2, %p3978_p1 }
   0xc   :  { %p3981_p4 = pnand %p3980_p3, %p3974_p0 }
   0xe   :  { %3984 = shalt.err (!%p3981_p4)
}
   0xf   :  { %s4034_s19 = smov [#allocation7]   ;;  %s4035_s20 = smov [#allocation8]  }
  0x10   :  { %29 = dma.vmem_to_smem %s27_s14, 16, %s4034_s19, [#allocation6]  }
  0x11   :  { %s35_s21 = sshll.u32 %s4035_s20, 4  ;;  %s36_s21 = int_to_ptr.vmem [resolvable:$true] %s35_s21 }
  0x12   :  { %s3993_s22 = scalar_lea.vmem %s36_s21, 192  ;;  %p3998_p6 = scmp.lt.s32.totalorder %s36_s21, %s36_s21 }
  0x13   :  { %p3994_p5 = scmp.ne.s32.totalorder %s36_s21, %s3993_s22  ;;  %p3999_p7 = scmp.lt.s32.totalorder %s3993_s22, %s3993_s22 }
  0x15   :  { %p4000_p8 = por %p3999_p7, %p3998_p6 }
  0x17   :  { %p4001_p9 = pnand %p4000_p8, %p3994_p5 }
  0x19   :  { %4004 = shalt.err (!%p4001_p9)
}
  0x1a   :  { %s6164_s0 = smov 64   ;;  %s6165_s1 = smov 4  }
  0x1b   :  { %41 = dma.hbm_to_vmem [thread:$0]  %s6162_s2, 192, %s36_s21, [#allocation3], %s6164_s0, %s6164_s0, %s6165_s1  }
  0x1c   :  { %4025 = dma.done.wait [#allocation5], 16  }
  0x1d   :  { %4026 = vsyncadd [#allocation5], 4294967280 }
  0x1e   :  { %4027 = dma.done.wait [#allocation6], 16  }
  0x1f   :  { %4028 = vsyncadd [#allocation6], 4294967280 }
  0x20   :  { %4029 = dma.done.wait [#allocation3], 192  }
  0x21   :  { %4030 = vsyncadd [#allocation3], 4294967104 }
  0x22   :  { %51 = sfence }
  0x23   :  { %v229_v0 = vlaneseq  ;;  %v4038_v1 = vmov 1983009808   ;;  %v4081_v5 = vld [vmem:[#allocation8] sm:$0xf]  ;;  %s6170_s2 = smov 126   ;;  %s6172_s25 = smov 127  }
  0x24   :  { %v227_v2 = vunpack.c.l.s4 %v4038_v1  ;;  %s6168_s26 = smov 112   ;;  %s6166_s27 = smov 111   ;;  %v4109_v9 = vld [vmem:[#allocation8 + $0x4] sm:$0xf]  ;;  %v4119_v11 = vld [vmem:[#allocation8 + $0x8] sm:$0xf] }
  0x25   :  { %v230_v3 = vshrl.u32 %v229_v0, 7  ;;  %s6174_s28 = smov 110   ;;  %s6176_s29 = smov 96   ;;  %v4342_v17 = vand.u32 127, %v229_v0 }
  0x26   :  { %v228_v4 = vunpack.c.0.s8 %v227_v2  ;;  %s4153_s30 = sld [smem:[#allocation2 + $0x2]] }
  0x27   :  { %s4155_s4 = sld [smem:[#allocation2 + $0x1d]]  ;;  %vm249_vm0 = vcmp.lt.s32.totalorder %v4342_v17, 126  ;;  %vm256_vm1 = vcmp.lt.s32.totalorder %v4342_v17, 112  ;;  %vm242_vm2 = vcmp.lt.s32.totalorder %v4342_v17, 127  ;;  %vm263_vm3 = vcmp.lt.s32.totalorder %v4342_v17, 111 }
  0x28   :  { %v4083_v6 = vsub.s32 %v228_v4, %v230_v3  ;;  %s4157_s5 = sld [smem:[#allocation2 + $0x38]]  ;;  %vm270_vm4 = vcmp.lt.s32.totalorder %v4342_v17, 110  ;;  %vm277_vm5 = vcmp.lt.s32.totalorder %v4342_v17, 96  ;;  %vm284_vm6 = vcmp.lt.s32.totalorder %v4342_v17, 95 }
  0x29   :  { %s4159_s6 = sld [smem:[#allocation2 + $0x3]]  ;;  %vm291_vm7 = vcmp.lt.s32.totalorder %v4342_v17, 94 }
  0x2a   :  { %v4087_v7 = vrot.slane %v4081_v5, %v4083_v6  ;;  %v4117_v10 = vrot.slane %v4109_v9, %v4083_v6  ;;  %v4131_v13 = vrot.slane %v4119_v11, %v4083_v6  ;;  %s4165_s7 = sld [smem:[#allocation2 + $0x1e]] }
  0x2b   :  { %s4167_s8 = sld [smem:[#allocation2 + $0x39]] }
  0x2c   :  { %245 = vrot.lane.b32.xlu1 %v4087_v7, %s6170_s2  ;;  %236 = vrot.lane.b32.xlu0 %v4087_v7, %s6172_s25  ;;  %v4095_v8 = vcombine.high %v4087_v7, %v4087_v7  ;;  %v4127_v12 = vcombine.high %v4117_v10, %v4117_v10  ;;  %v4139_v14 = vcombine.high %v4131_v13, %v4131_v13  ;;  %s4169_s9 = sld [smem:[#allocation2]]  ;;  %v4345_v18 = vstv %s4153_s30 }
  0x2d   :  { %s4171_s10 = sld [smem:[#allocation2 + $0x1]]  ;;  %6410 = vst [vmem:[#allocation49_spill] sm:$0xff] %v4345_v18  ;;  %v4348_v19 = vstv %s4155_s4 }
  0x2e   :  { %s4177_s11 = sld [smem:[#allocation2 + $0x1b]]  ;;  %6411 = vst [vmem:[#allocation50_spill] sm:$0xff] %v4348_v19  ;;  %v4356_v21 = vstv %s4157_s5 }
  0x2f   :  { %s4179_s12 = sld [smem:[#allocation2 + $0x1c]]  ;;  %6413 = vst [vmem:[#allocation52_spill] sm:$0xff] %v4356_v21  ;;  %v4359_v22 = vstv %s4159_s6 }
  0x30   :  { %252 = vrot.lane.b32.xlu0 %v4087_v7, %s6168_s26  ;;  %247 = vrot.lane.b32.xlu1 %v4095_v8, %s6170_s2  ;;  %s4181_s13 = sld [smem:[#allocation2 + $0x36]]  ;;  %6414 = vst [vmem:[#allocation53_spill] sm:$0xff] %v4359_v22  ;;  %v4362_v23 = vstv %s4165_s7 }
  0x31   :  { %s4183_s14 = sld [smem:[#allocation2 + $0x37]]  ;;  %6415 = vst [vmem:[#allocation54_spill] sm:$0xff] %v4362_v23  ;;  %v4365_v24 = vstv %s4167_s8 }
  0x32   :  { %s4189_s15 = sld [smem:[#allocation2 + $0x4]]  ;;  %v4334_v15 = vstv %s4169_s9  ;;  %6416 = vst [vmem:[#allocation55_spill] sm:$0xff] %v4365_v24 }
  0x33   :  { %s4191_s16 = sld [smem:[#allocation2 + $0x1f]]  ;;  %6408 = vst [vmem:[#allocation47_spill] sm:$0xff] %v4334_v15  ;;  %v4370_v25 = vstv %s4171_s10  ;;  %v4377_v27 = vmul.f32 %v4081_v5, %v4334_v15 }
  0x34   :  { %254 = vrot.lane.b32.xlu1 %v4095_v8, %s6168_s26  ;;  %238 = vrot.lane.b32.xlu0 %v4095_v8, %s6172_s25  ;;  %s4193_s17 = sld [smem:[#allocation2 + $0x3a]]  ;;  %v4337_v16 = vstv %s4177_s11  ;;  %6417 = vst [vmem:[#allocation56_spill] sm:$0xff] %v4370_v25 }
  0x35   :  { %s4195_s18 = sld [smem:[#allocation2 + $0x5]]  ;;  %6409 = vst [vmem:[#allocation48_spill] sm:$0xff] %v4337_v16  ;;  %v4373_v26 = vstv %s4179_s12  ;;  %v4381_v28 = vmul.f32 %v4081_v5, %v4337_v16 }
  0x36   :  { %s4201_s19 = sld [smem:[#allocation2 + $0x20]]  ;;  %v4351_v20 = vstv %s4181_s13  ;;  %6418 = vst [vmem:[#allocation57_spill] sm:$0xff] %v4373_v26 }
  0x37   :  { %s4203_s20 = sld [smem:[#allocation2 + $0x3b]]  ;;  %6412 = vst [vmem:[#allocation51_spill] sm:$0xff] %v4351_v20  ;;  %v4386_v29 = vstv %s4183_s14  ;;  %v4390_v30 = vmul.f32 %v4081_v5, %v4351_v20 }
  0x38   :  { %261 = vrot.lane.b32.xlu1 %v4095_v8, %s6166_s27  ;;  %259 = vrot.lane.b32.xlu0 %v4087_v7, %s6166_s27  ;;  %s4205_s21 = sld [smem:[#allocation2 + $0x6]]  ;;  %v4393_v31 = vstv %s4189_s15 }
  0x39   :  { %s4207_s22 = sld [smem:[#allocation2 + $0x21]]  ;;  %v4396_v32 = vstv %s4191_s16 }
  0x3a   :  { %s4213_s23 = sld [smem:[#allocation2 + $0x3c]]  ;;  %v4401_v33 = vstv %s4193_s17 }
  0x3b   :  { %s4215_s24 = sld [smem:[#allocation2 + $0x9]]  ;;  %6424 = vst [vmem:[#allocation58_spill] sm:$0xff] %v4401_v33  ;;  %v4404_v34 = vstv %s4195_s18 }
  0x3c   :  { %268 = vrot.lane.b32.xlu1 %v4095_v8, %s6174_s28  ;;  %266 = vrot.lane.b32.xlu0 %v4087_v7, %s6174_s28  ;;  %s4217_s0 = sld [smem:[#allocation2 + $0xa]]  ;;  %6426 = vst [vmem:[#allocation59_spill] sm:$0xff] %v4404_v34  ;;  %v4407_v35 = vstv %s4201_s19 }
  0x3d   :  { %s4219_s1 = sld [smem:[#allocation2 + $0x24]]  ;;  %6427 = vst [vmem:[#allocation60_spill] sm:$0xff] %v4407_v35  ;;  %v4415_v37 = vstv %s4203_s20 }
  0x3e   :  { %s4237_s3 = sld [smem:[#allocation2 + $0x13]]  ;;  %6431 = vst [vmem:[#allocation62_spill] sm:$0xff] %v4415_v37  ;;  %v4418_v38 = vstv %s4205_s21 }
  0x3f   :  { %6375 = sst [smem:[#allocation14_spill]] %s4207_s22  ;;  %6432 = vst [vmem:[#allocation63_spill] sm:$0xff] %v4418_v38 }
  0x40   :  { %275 = vrot.lane.b32.xlu1 %v4095_v8, %s6176_s29  ;;  %273 = vrot.lane.b32.xlu0 %v4087_v7, %s6176_s29  ;;  %6376 = sst [smem:[#allocation15_spill]] %s4213_s23 }
  0x41   :  { %s4241_s23 = sld [smem:[#allocation2 + $0x2e]]  ;;  %v4410_v36 = vstv %s4215_s24 }
  0x42   :  { %6377 = sst [smem:[#allocation16_spill]] %s4217_s0  ;;  %6429 = vst [vmem:[#allocation61_spill] sm:$0xff] %v4410_v36  ;;  %v4450_v47 = vmul.f32 %v4109_v9, %v4410_v36 }
  0x43   :  { %s4239_s0 = sld [smem:[#allocation2 + $0x2d]]  ;;  %v4421_v39 = vstv %s4219_s1 }
  0x44   :  { %307 = vrot.lane.b32.xlu1 %v4127_v12, %s6172_s25  ;;  %305 = vrot.lane.b32.xlu0 %v4117_v10, %s6172_s25  ;;  %6381 = sst [smem:[#allocation20_spill]] %s4237_s3  ;;  %s6178_s3 = smov 95   ;;  %6433 = vst [vmem:[#allocation64_spill] sm:$0xff] %v4421_v39  ;;  %v4462_v50 = vmul.f32 %v4109_v9, %v4421_v39 }
  0x45   :  { %s4255_s22 = sld [smem:[#allocation2 + $0x41]] }
  0x46   :  { %s4367_s30 = sld [smem:[#allocation2 + $0x22]] }
  0x47   :  { %6383 = sst [smem:[#allocation22_spill]] %s4241_s23 }
  0x48   :  { %366 = vrot.lane.b32.xlu1 %v4139_v14, %s6172_s25  ;;  %364 = vrot.lane.b32.xlu0 %v4131_v13, %s6172_s25  ;;  %s4231_s25 = sld [smem:[#allocation2 + $0x12]] }
  0x49   :  { %6382 = sst [smem:[#allocation21_spill]] %s4239_s0 }
  0x4a   :  { %s4261_s23 = sld [smem:[#allocation2 + $0x14]] }
  0x4b   :  { %6388 = sst [smem:[#allocation27_spill]] %s4255_s22 }
  0x4c   :  { %313 = vrot.lane.b32.xlu1 %v4127_v12, %s6170_s2  ;;  %311 = vrot.lane.b32.xlu0 %v4117_v10, %s6170_s2  ;;  %s4273_s22 = sld [smem:[#allocation2 + $0x27]] }
  0x4d   :  { %s4279_s0 = sld [smem:[#allocation2 + $0x30]] }
  0x4e   :  { %6380 = sst [smem:[#allocation19_spill]] %s4231_s25 }
  0x4f   :  { %s4253_s25 = sld [smem:[#allocation2 + $0x26]] }
  0x50   :  { %372 = vrot.lane.b32.xlu1 %v4139_v14, %s6170_s2  ;;  %370 = vrot.lane.b32.xlu0 %v4131_v13, %s6170_s2  ;;  %s4229_s2 = sld [smem:[#allocation2 + $0x40]] }
  0x51   :  { %6389 = sst [smem:[#allocation28_spill]] %s4261_s23 }
  0x52   :  { %6393 = sst [smem:[#allocation32_spill]] %s4273_s22  ;;  %s6180_s22 = smov 94  }
  0x53   :  { %6395 = sst [smem:[#allocation34_spill]] %s4279_s0 }
  0x54   :  { %319 = vrot.lane.b32.xlu1 %v4127_v12, %s6168_s26  ;;  %317 = vrot.lane.b32.xlu0 %v4117_v10, %s6168_s26  ;;  %s4291_s23 = sld [smem:[#allocation2 + $0x43]] }
  0x55   :  { %6387 = sst [smem:[#allocation26_spill]] %s4253_s25 }
  0x56   :  { %6379 = sst [smem:[#allocation18_spill]] %s4229_s2 }
  0x57   :  { %s4249_s2 = sld [smem:[#allocation2 + $0x49]] }
  0x58   :  { %378 = vrot.lane.b32.xlu1 %v4139_v14, %s6168_s26  ;;  %376 = vrot.lane.b32.xlu0 %v4131_v13, %s6168_s26  ;;  %s4227_s26 = sld [smem:[#allocation2 + $0x3f]] }
  0x59   :  { %s4275_s25 = sld [smem:[#allocation2 + $0x42]] }
  0x5a   :  { %6398 = sst [smem:[#allocation37_spill]] %s4291_s23 }
  0x5b   :  { %s4297_s0 = sld [smem:[#allocation2 + $0x16]] }
  0x5c   :  { %325 = vrot.lane.b32.xlu1 %v4127_v12, %s6166_s27  ;;  %323 = vrot.lane.b32.xlu0 %v4117_v10, %s6166_s27  ;;  %s4309_s23 = sld [smem:[#allocation2 + $0x29]] }
  0x5d   :  { %6385 = sst [smem:[#allocation24_spill]] %s4249_s2 }
  0x5e   :  { %s4267_s2 = sld [smem:[#allocation2 + $0xc]]  ;;  %v4424_v40 = vstv %s4227_s26 }
  0x5f   :  { %s4383_s4 = sld [smem:[#allocation2 + $0x3d]]  ;;  %6435 = vst [vmem:[#allocation65_spill] sm:$0xff] %v4424_v40  ;;  %v4466_v51 = vmul.f32 %v4109_v9, %v4424_v40  ;;  %v4523_v2 = vstv %s4275_s25 }
  0x60   :  { %384 = vrot.lane.b32.xlu1 %v4139_v14, %s6166_s27  ;;  %382 = vrot.lane.b32.xlu0 %v4131_v13, %s6166_s27  ;;  %s4225_s27 = sld [smem:[#allocation2 + $0x25]] }
  0x61   :  { %6399 = sst [smem:[#allocation38_spill]] %s4297_s0 }
  0x62   :  { %6403 = sst [smem:[#allocation42_spill]] %s4309_s23 }
  0x63   :  { %s4313_s0 = sld [smem:[#allocation2 + $0x17]] }
  0x64   :  { %331 = vrot.lane.b32.xlu1 %v4127_v12, %s6174_s28  ;;  %329 = vrot.lane.b32.xlu0 %v4117_v10, %s6174_s28  ;;  %6392 = sst [smem:[#allocation31_spill]] %s4267_s2 }
  0x65   :  { %s4285_s2 = sld [smem:[#allocation2 + $0x4b]] }
  0x66   :  { %6378 = sst [smem:[#allocation17_spill]] %s4225_s27 }
  0x67   :  { %s4251_s27 = sld [smem:[#allocation2 + $0xb]] }
  0x68   :  { %390 = vrot.lane.b32.xlu1 %v4139_v14, %s6174_s28  ;;  %388 = vrot.lane.b32.xlu0 %v4131_v13, %s6174_s28  ;;  %s4243_s28 = sld [smem:[#allocation2 + $0x48]] }
  0x69   :  { %6405 = sst [smem:[#allocation44_spill]] %s4313_s0 }
  0x6a   :  { %s4323_s23 = sld [smem:[#allocation2 + $0xf]] }
  0x6b   :  { %6396 = sst [smem:[#allocation35_spill]] %s4285_s2 }
  0x6c   :  { %337 = vrot.lane.b32.xlu1 %v4127_v12, %s6176_s29  ;;  %335 = vrot.lane.b32.xlu0 %v4117_v10, %s6176_s29  ;;  %s4303_s2 = sld [smem:[#allocation2 + $0xe]] }
  0x6d   :  { %6386 = sst [smem:[#allocation25_spill]] %s4251_s27 }
  0x6e   :  { %6384 = sst [smem:[#allocation23_spill]] %s4243_s28 }
  0x6f   :  { %s4263_s28 = sld [smem:[#allocation2 + $0x2f]] }
  0x70   :  { %396 = vrot.lane.b32.xlu1 %v4139_v14, %s6176_s29  ;;  %394 = vrot.lane.b32.xlu0 %v4131_v13, %s6176_s29  ;;  %s4265_s29 = sld [smem:[#allocation2 + $0x4a]]  ;;  %v4581_v16 = vstv %s4323_s23  ;;  %s6567_s23 = smov 126  }
  0x71   :  { %s4277_s27 = sld [smem:[#allocation2 + $0x15]]  ;;  %6496 = vst [vmem:[#allocation98_spill] sm:$0xff] %v4581_v16  ;;  %v4604_v16 = vstv %s4367_s30  ;;  %s6568_s30 = smov 112  }
  0x72   :  { %6402 = sst [smem:[#allocation41_spill]] %s4303_s2  ;;  %6507 = vst [vmem:[#allocation105_spill] sm:$0xff] %v4604_v16 }
  0x73   :  { %s4321_s2 = sld [smem:[#allocation2 + $0x4d]] }
  0x74   :  { %282 = vrot.lane.b32.xlu1 %v4095_v8, %s6178_s3  ;;  %280 = vrot.lane.b32.xlu0 %v4087_v7, %s6178_s3  ;;  %s4327_s0 = sld [smem:[#allocation2 + $0x45]] }
  0x75   :  { %6390 = sst [smem:[#allocation29_spill]] %s4263_s28 }
  0x76   :  { %6391 = sst [smem:[#allocation30_spill]] %s4265_s29 }
  0x77   :  { %6394 = sst [smem:[#allocation33_spill]] %s4277_s27 }
  0x78   :  { %343 = vrot.lane.b32.xlu1 %v4127_v12, %s6178_s3  ;;  %341 = vrot.lane.b32.xlu0 %v4117_v10, %s6178_s3  ;;  %s4287_s29 = sld [smem:[#allocation2 + $0xd]] }
  0x79   :  { %s4289_s28 = sld [smem:[#allocation2 + $0x28]]  ;;  %v4578_v39 = vstv %s4321_s2 }
  0x7a   :  { %s4299_s27 = sld [smem:[#allocation2 + $0x31]]  ;;  %6495 = vst [vmem:[#allocation97_spill] sm:$0xff] %v4578_v39  ;;  %v4587_v36 = vstv %s4327_s0 }
  0x7b   :  { %s6419_s5 = sld [smem:[#allocation14_spill]]  ;;  %6499 = vst [vmem:[#allocation100_spill] sm:$0xff] %v4587_v36 }
  0x7c   :  { %402 = vrot.lane.b32.xlu1 %v4139_v14, %s6178_s3  ;;  %400 = vrot.lane.b32.xlu0 %v4131_v13, %s6178_s3  ;;  %s4301_s3 = sld [smem:[#allocation2 + $0x4c]] }
  0x7d   :  { %s6420_s6 = sld [smem:[#allocation15_spill]] }
  0x7e   :  { %s6421_s7 = sld [smem:[#allocation19_spill]] }
  0x7f   :  { %6397 = sst [smem:[#allocation36_spill]] %s4289_s28 }
  0x80   :  { %289 = vrot.lane.b32.xlu1 %v4095_v8, %s6180_s22  ;;  %287 = vrot.lane.b32.xlu0 %v4087_v7, %s6180_s22  ;;  %6400 = sst [smem:[#allocation39_spill]] %s4299_s27  ;;  %v4539_v7 = vstv %s4287_s29 }
  0x81   :  { %s4311_s28 = sld [smem:[#allocation2 + $0x44]]  ;;  %v4429_v41 = vstv %s6419_s5  ;;  %6483 = vst [vmem:[#allocation86_spill] sm:$0xff] %v4539_v7 }
  0x82   :  { %6401 = sst [smem:[#allocation40_spill]] %s4301_s3  ;;  %6436 = vst [vmem:[#allocation66_spill] sm:$0xff] %v4429_v41 }
  0x83   :  { %s4315_s3 = sld [smem:[#allocation2 + $0x32]]  ;;  %v4432_v42 = vstv %s6420_s6 }
  0x84   :  { %349 = vrot.lane.b32.xlu1 %v4127_v12, %s6180_s22  ;;  %347 = vrot.lane.b32.xlu0 %v4117_v10, %s6180_s22  ;;  %s4331_s27 = sld [smem:[#allocation2 + $0x33]]  ;;  %6438 = vst [vmem:[#allocation67_spill] sm:$0xff] %v4432_v42  ;;  %v4435_v43 = vstv %s6421_s7 }
  0x85   :  { %s6422_s8 = sld [smem:[#allocation21_spill]]  ;;  %6440 = vst [vmem:[#allocation68_spill] sm:$0xff] %v4435_v43  ;;  %v4482_v55 = vmul.f32 %v4119_v11, %v4435_v43 }
  0x86   :  { %s4398_s9 = sld [smem:[#allocation2 + $0x10]] }
  0x87   :  { %6404 = sst [smem:[#allocation43_spill]] %s4311_s28 }
  0x88   :  { %408 = vrot.lane.b32.xlu1 %v4139_v14, %s6180_s22  ;;  %406 = vrot.lane.b32.xlu0 %v4131_v13, %s6180_s22  ;;  %s4325_s28 = sld [smem:[#allocation2 + $0x2a]] }
  0x89   :  { %6406 = sst [smem:[#allocation45_spill]] %s4315_s3 }
  0x8a   :  { %s4329_s3 = sld [smem:[#allocation2 + $0x18]] }
  0x8b   :  { %s4339_s22 = sld [smem:[#allocation2 + $0x4e]]  ;;  %v4438_v44 = vstv %s6422_s8 }
  0x8c   :  { %s6423_s10 = sld [smem:[#allocation16_spill]]  ;;  %6441 = vst [vmem:[#allocation69_spill] sm:$0xff] %v4438_v44  ;;  %v4486_v56 = vmul.f32 %v4119_v11, %v4438_v44  ;;  %v4610_v39 = vstv %s4398_s9  ;;  %s6570_s9 = smov 110  }
  0x8d   :  { %s6425_s11 = sld [smem:[#allocation17_spill]]  ;;  %6509 = vst [vmem:[#allocation107_spill] sm:$0xff] %v4610_v39 }
  0x8e   :  { %s6428_s12 = sld [smem:[#allocation23_spill]]  ;;  %v4584_v15 = vstv %s4325_s28 }
  0x8f   :  { %s4412_s13 = sld [smem:[#allocation2 + $0x2b]]  ;;  %6497 = vst [vmem:[#allocation99_spill] sm:$0xff] %v4584_v15  ;;  %v4607_v15 = vstv %s4383_s4  ;;  %s6569_s4 = smov 111  }
  0x90   :  { %6407 = sst [smem:[#allocation46_spill]] %s4329_s3  ;;  %6508 = vst [vmem:[#allocation106_spill] sm:$0xff] %v4607_v15 }
  0x91   :  { %s4353_s3 = sld [smem:[#allocation2 + $0x7]] }
  0x92   :  { %s6430_s14 = sld [smem:[#allocation18_spill]]  ;;  %v4443_v45 = vstv %s6423_s10 }
  0x93   :  { %s6434_s15 = sld [smem:[#allocation20_spill]]  ;;  %6443 = vst [vmem:[#allocation70_spill] sm:$0xff] %v4443_v45  ;;  %v4446_v46 = vstv %s6425_s11 }
  0x94   :  { %s4426_s16 = sld [smem:[#allocation2 + $0x46]]  ;;  %6444 = vst [vmem:[#allocation71_spill] sm:$0xff] %v4446_v46  ;;  %v4453_v48 = vstv %s6428_s12 }
  0x95   :  { %s6437_s17 = sld [smem:[#allocation22_spill]]  ;;  %6447 = vst [vmem:[#allocation72_spill] sm:$0xff] %v4453_v48  ;;  %v4492_v57 = vmul.f32 %v4119_v11, %v4453_v48  ;;  %v4613_v36 = vstv %s4412_s13  ;;  %s6571_s13 = smov 96  }
  0x96   :  { %s6439_s18 = sld [smem:[#allocation24_spill]]  ;;  %6510 = vst [vmem:[#allocation108_spill] sm:$0xff] %v4613_v36 }
  0x97   :  { %s4440_s19 = sld [smem:[#allocation2 + $0x19]] }
  0x98   :  { %s6445_s1 = sld [smem:[#allocation25_spill]]  ;;  %v4458_v49 = vstv %s6430_s14 }
  0x99   :  { %s6446_s26 = sld [smem:[#allocation26_spill]]  ;;  %6450 = vst [vmem:[#allocation73_spill] sm:$0xff] %v4458_v49  ;;  %v4469_v52 = vstv %s6434_s15 }
  0x9a   :  { %s6448_s20 = sld [smem:[#allocation27_spill]]  ;;  %6454 = vst [vmem:[#allocation74_spill] sm:$0xff] %v4469_v52 }
  0x9b   :  { %s4455_s21 = sld [smem:[#allocation2 + $0x34]]  ;;  %v4475_v53 = vstv %s6437_s17 }
  0x9c   :  { %s6451_s24 = sld [smem:[#allocation28_spill]]  ;;  %6458 = vst [vmem:[#allocation75_spill] sm:$0xff] %v4475_v53  ;;  %v4478_v54 = vstv %s6439_s18 }
  0x9d   :  { %6442 = sst [smem:[#allocation14_spill]] %s4440_s19  ;;  %6459 = vst [vmem:[#allocation76_spill] sm:$0xff] %v4478_v54 }
  0x9e   :  { %s6452_s5 = sld [smem:[#allocation29_spill]]  ;;  %v4495_v58 = vstv %s6445_s1  ;;  %v246_v14 = vpop.permute.xlu1 %245  ;;  %v237_v48 = vpop.permute.xlu0 %236 }
  0x9f   :  { %s6453_s6 = sld [smem:[#allocation30_spill]]  ;;  %6463 = vst [vmem:[#allocation77_spill] sm:$0xff] %v4495_v58  ;;  %v4498_v59 = vstv %s6446_s26 }
  0xa0   :  { %s6455_s7 = sld [smem:[#allocation31_spill]]  ;;  %6465 = vst [vmem:[#allocation78_spill] sm:$0xff] %v4498_v59  ;;  %v4501_v60 = vstv %s6448_s20 }
  0xa1   :  { %6449 = sst [smem:[#allocation15_spill]] %s4455_s21  ;;  %6466 = vst [vmem:[#allocation79_spill] sm:$0xff] %v4501_v60 }
  0xa2   :  { %s4471_s8 = sld [smem:[#allocation2 + $0x4f]]  ;;  %v4506_v61 = vstv %s6451_s24 }
  0xa3   :  { %s6457_s10 = sld [smem:[#allocation32_spill]]  ;;  %6469 = vst [vmem:[#allocation80_spill] sm:$0xff] %v4506_v61 }
  0xa4   :  { %s6460_s11 = sld [smem:[#allocation33_spill]]  ;;  %v4509_v62 = vstv %s6452_s5 }
  0xa5   :  { %s6461_s12 = sld [smem:[#allocation34_spill]]  ;;  %6470 = vst [vmem:[#allocation81_spill] sm:$0xff] %v4509_v62  ;;  %v4512_v63 = vstv %s6453_s6 }
  0xa6   :  { %s4488_s14 = sld [smem:[#allocation2 + $0x8]]  ;;  %6472 = vst [vmem:[#allocation82_spill] sm:$0xff] %v4512_v63  ;;  %v4515_v0 = vstv %s6455_s7 }
  0xa7   :  { %s6464_s15 = sld [smem:[#allocation35_spill]] }
  0xa8   :  { %6456 = sst [smem:[#allocation19_spill]] %s4471_s8 }
  0xa9   :  { %s6467_s17 = sld [smem:[#allocation36_spill]]  ;;  %v4520_v1 = vstv %s6457_s10 }
  0xaa   :  { %s4503_s18 = sld [smem:[#allocation2 + $0x23]]  ;;  %v4526_v3 = vstv %s6460_s11 }
  0xab   :  { %s6468_s8 = sld [smem:[#allocation37_spill]]  ;;  %6476 = vst [vmem:[#allocation83_spill] sm:$0xff] %v4526_v3  ;;  %v4529_v4 = vstv %s6461_s12 }
  0xac   :  { %6462 = sst [smem:[#allocation21_spill]] %s4488_s14  ;;  %6477 = vst [vmem:[#allocation84_spill] sm:$0xff] %v4529_v4 }
  0xad   :  { %s6471_s14 = sld [smem:[#allocation38_spill]]  ;;  %v4536_v5 = vstv %s6464_s15  ;;  %s4047_s15 = smov [#allocation9]  }
  0xae   :  { %s6473_s21 = sld [smem:[#allocation39_spill]]  ;;  %6482 = vst [vmem:[#allocation85_spill] sm:$0xff] %v4536_v5 }
  0xaf   :  { %s6474_s1 = sld [smem:[#allocation40_spill]]  ;;  %v4542_v8 = vstv %s6467_s17  ;;  %s3854_s17 = sshll.u32 %s4047_s15, 4  ;;  %s3855_s17 = int_to_ptr.vmem [resolvable:$true] %s3854_s17 }
  0xb0   :  { %s4517_s26 = sld [smem:[#allocation2 + $0x3e]]  ;;  %6484 = vst [vmem:[#allocation87_spill] sm:$0xff] %v4542_v8  ;;  %p4010_p11 = scmp.lt.s32.totalorder %s3855_s17, %s3855_s17 }
  0xb1   :  { %s6475_s19 = sld [smem:[#allocation41_spill]]  ;;  %v4545_v9 = vstv %s6468_s8 }
  0xb2   :  { %s6478_s20 = sld [smem:[#allocation42_spill]]  ;;  %6485 = vst [vmem:[#allocation88_spill] sm:$0xff] %v4545_v9 }
  0xb3   :  { %s4531_s24 = sld [smem:[#allocation2 + $0x11]]  ;;  %v4550_v10 = vstv %s6471_s14  ;;  %s6573_s14 = smov 94  }
  0xb4   :  { %s6479_s5 = sld [smem:[#allocation43_spill]]  ;;  %6486 = vst [vmem:[#allocation89_spill] sm:$0xff] %v4550_v10  ;;  %v4553_v11 = vstv %s6473_s21 }
  0xb5   :  { %s6480_s6 = sld [smem:[#allocation44_spill]]  ;;  %6488 = vst [vmem:[#allocation90_spill] sm:$0xff] %v4553_v11  ;;  %v4556_v12 = vstv %s6474_s1 }
  0xb6   :  { %s6481_s7 = sld [smem:[#allocation45_spill]]  ;;  %6489 = vst [vmem:[#allocation91_spill] sm:$0xff] %v4556_v12  ;;  %v4638_v12 = vstv %s4503_s18  ;;  %v4647_v9 = vstv %s4517_s26  ;;  %s4005_s18 = scalar_lea.vmem %s3855_s17, 192 }
  0xb7   :  { %s4547_s25 = sld [smem:[#allocation2 + $0x2c]]  ;;  %v4559_v13 = vstv %s6475_s19  ;;  %6516 = vst [vmem:[#allocation114_spill] sm:$0xff] %v4638_v12  ;;  %6517 = vst [vmem:[#allocation115_spill] sm:$0xff] %v4647_v9  ;;  %p4006_p10 = scmp.ne.s32.totalorder %s3855_s17, %s4005_s18 }
  0xb8   :  { %s6487_s10 = sld [smem:[#allocation46_spill]]  ;;  %6490 = vst [vmem:[#allocation92_spill] sm:$0xff] %v4559_v13  ;;  %v4564_v44 = vstv %s6478_s20  ;;  %p4011_p12 = scmp.lt.s32.totalorder %s4005_s18, %s4005_s18 }
  0xb9   :  { %s4561_s29 = sld [smem:[#allocation2 + $0x47]]  ;;  %6491 = vst [vmem:[#allocation93_spill] sm:$0xff] %v4564_v44 }
  0xba   :  { %v4567_v43 = vstv %s6479_s5  ;;  %s4575_s21 = sld [smem:[#allocation2 + $0x1a]]  ;;  %p4012_p13 = por %p4011_p12, %p4010_p11 }
  0xbb   :  { %6492 = vst [vmem:[#allocation94_spill] sm:$0xff] %v4567_v43  ;;  %v4570_v20 = vstv %s6480_s6  ;;  %s6498_s19 = sld [smem:[#allocation14_spill]]  ;;  %v4593_v43 = vstv %s4331_s27 }
  0xbc   :  { %6493 = vst [vmem:[#allocation95_spill] sm:$0xff] %v4570_v20  ;;  %v4573_v40 = vstv %s6481_s7  ;;  %s6500_s8 = sld [smem:[#allocation15_spill]]  ;;  %6503 = vst [vmem:[#allocation102_spill] sm:$0xff] %v4593_v43  ;;  %v4596_v20 = vstv %s4339_s22  ;;  %v248_v43 = vpop.permute.xlu1 %247  ;;  %s6566_s22 = smov 127  }
  0xbd   :  { %6494 = vst [vmem:[#allocation96_spill] sm:$0xff] %v4573_v40  ;;  %s6502_s11 = sld [smem:[#allocation19_spill]]  ;;  %6504 = vst [vmem:[#allocation103_spill] sm:$0xff] %v4596_v20  ;;  %v4599_v40 = vstv %s4353_s3  ;;  %v250_v39 = vsel %vm249_vm0, %v246_v14, %v248_v43  ;;  %v251_v36 = vsel %vm249_vm0, %v248_v43, %v246_v14  ;;  %v4650_v43 = vstv %s4531_s24  ;;  %p4013_p0 = pnand %p4012_p13, %p4006_p10 }
  0xbe   :  { %v4590_v44 = vstv %s6487_s10  ;;  %6505 = vst [vmem:[#allocation104_spill] sm:$0xff] %v4599_v40  ;;  %s6506_s2 = sld [smem:[#allocation21_spill]]  ;;  %v4619_v40 = vstv %s4426_s16  ;;  %v1111_v11 = vmul.f32 %v250_v39, %v4356_v21  ;;  %v1112_v10 = vmul.f32 %v251_v36, %v4356_v21  ;;  %6518 = vst [vmem:[#allocation116_spill] sm:$0xff] %v4650_v43  ;;  %s6572_s16 = smov 95  }
  0xbf   :  { %6501 = vst [vmem:[#allocation101_spill] sm:$0xff] %v4590_v44  ;;  %s4601_s12 = sld [smem:[#allocation2 + $0x35]]  ;;  %v253_v44 = vpop.permute.xlu0 %252  ;;  %6511 = vst [vmem:[#allocation109_spill] sm:$0xff] %v4619_v40  ;;  %v427_v40 = vmul.f32 %v250_v39, %v4345_v18  ;;  %v4657_v8 = vstv %s4561_s29 }
  0xc0   :  { %s4615_s0 = sld [smem:[#allocation2 + $0x50]]  ;;  %6520 = vst [vmem:[#allocation118_spill] sm:$0xff] %v4657_v8 }
  0xc1   :  { %v4622_v20 = vstv %s6498_s19  ;;  %s4701_s3 = sld [smem:[#allocation7]] }
  0xc2   :  { %6512 = vst [vmem:[#allocation110_spill] sm:$0xff] %v4622_v20  ;;  %v4625_v13 = vstv %s6500_s8  ;;  %v428_v20 = vmul.f32 %v251_v36, %v4345_v18  ;;  %v4654_v18 = vstv %s4547_s25  ;;  %s4981_s27 = sld [smem:[#allocation7 + $0x1]] }
  0xc3   :  { %6513 = vst [vmem:[#allocation111_spill] sm:$0xff] %v4625_v13  ;;  %v4628_v16 = vstv %s6502_s11  ;;  %v769_v13 = vmul.f32 %v250_v39, %v4348_v19  ;;  %v239_v12 = vpop.permute.xlu0 %238  ;;  %6519 = vst [vmem:[#allocation117_spill] sm:$0xff] %v4654_v18  ;;  %s3949_s28 = sld [smem:[#allocation7 + $0x2]] }
  0xc4   :  { %6514 = vst [vmem:[#allocation112_spill] sm:$0xff] %v4628_v16  ;;  %v4635_v15 = vstv %s6506_s2  ;;  %v770_v16 = vmul.f32 %v251_v36, %v4348_v19  ;;  %v431_v14 = vcombine.low %v427_v40, %v428_v20  ;;  %v4660_v19 = vstv %s4575_s21 }
  0xc5   :  { %6515 = vst [vmem:[#allocation113_spill] sm:$0xff] %v4635_v15  ;;  %v255_v15 = vpop.permute.xlu1 %254  ;;  %6521 = vst [vmem:[#allocation119_spill] sm:$0xff] %v4660_v19  ;;  %v243_v20 = vsel %vm242_vm2, %v237_v48, %v239_v12  ;;  %v1115_v40 = vcombine.low %v1111_v11, %v1112_v10  ;;  %v4671_v18 = vstv %s4601_s12  ;;  %v244_v10 = vsel %vm242_vm2, %v239_v12, %v237_v48 }
  0xc6   :  { %v773_v39 = vcombine.low %v769_v13, %v770_v16  ;;  %v257_v36 = vsel %vm256_vm1, %v253_v44, %v255_v15  ;;  %v258_v21 = vsel %vm256_vm1, %v255_v15, %v253_v44  ;;  %6522 = vst [vmem:[#allocation120_spill] sm:$0xff] %v4671_v18  ;;  %v438_v8 = vrot.slane %v431_v14, %v4083_v6 }
  0xc7   :  { %v441_v43 = vmul.f32 %v257_v36, %v4359_v22  ;;  %v442_v9 = vmul.f32 %v258_v21, %v4359_v22  ;;  %v783_v16 = vmul.f32 %v257_v36, %v4362_v23  ;;  %v784_v13 = vmul.f32 %v258_v21, %v4362_v23  ;;  %v260_v7 = vpop.permute.xlu0 %259 }
  0xc8   :  { %v4677_v19 = vstv %s4615_s0  ;;  %v1125_v15 = vmul.f32 %v257_v36, %v4365_v24  ;;  %v1126_v44 = vmul.f32 %v258_v21, %v4365_v24  ;;  %v413_v11 = vmul.f32 %v243_v20, %v4370_v25 }
  0xc9   :  { %6523 = vst [vmem:[#allocation121_spill] sm:$0xff] %v4677_v19  ;;  %v262_v22 = vpop.permute.xlu1 %261  ;;  %v780_v18 = vrot.slane %v773_v39, %v4083_v6  ;;  %v414_v14 = vmul.f32 %v244_v10, %v4370_v25  ;;  %v755_v5 = vmul.f32 %v243_v20, %v4373_v26  ;;  %v756_v23 = vmul.f32 %v244_v10, %v4373_v26 }
  0xca   :  { %v1122_v19 = vrot.slane %v1115_v40, %v4083_v6  ;;  %v445_v36 = vcombine.low %v441_v43, %v442_v9  ;;  %v1097_v21 = vmul.f32 %v243_v20, %v4386_v29  ;;  %v1098_v24 = vmul.f32 %v244_v10, %v4386_v29 }
  0xcb   :  { %v787_v48 = vcombine.low %v783_v16, %v784_v13  ;;  %v417_v12 = vcombine.low %v413_v11, %v414_v14  ;;  %v759_v4 = vcombine.low %v755_v5, %v756_v23  ;;  %v264_v39 = vsel %vm263_vm3, %v260_v7, %v262_v22  ;;  %v267_v43 = vpop.permute.xlu0 %266 }
  0xcc   :  { %v1129_v25 = vcombine.low %v1125_v15, %v1126_v44  ;;  %v1101_v3 = vcombine.low %v1097_v21, %v1098_v24  ;;  %v265_v26 = vsel %vm263_vm3, %v262_v22, %v260_v7  ;;  %v455_v40 = vmul.f32 %v264_v39, %v4393_v31 }
  0xcd   :  { %v269_v9 = vpop.permute.xlu1 %268  ;;  %v424_v20 = vrot.slane %v417_v12, %v4083_v6  ;;  %v766_v10 = vrot.slane %v759_v4, %v4083_v6  ;;  %v456_v16 = vmul.f32 %v265_v26, %v4393_v31  ;;  %v797_v23 = vmul.f32 %v264_v39, %v4396_v32 }
  0xce   :  { %v1108_v5 = vrot.slane %v1101_v3, %v4083_v6  ;;  %v798_v24 = vmul.f32 %v265_v26, %v4396_v32  ;;  %v1139_v22 = vmul.f32 %v264_v39, %v4401_v33  ;;  %v1140_v7 = vmul.f32 %v265_v26, %v4401_v33 }
  0xcf   :  { %v426_v13 = vadd.f32 %v424_v20, %v4377_v27  ;;  %v768_v15 = vadd.f32 %v766_v10, %v4381_v28  ;;  %v459_v44 = vcombine.low %v455_v40, %v456_v16  ;;  %v271_v4 = vsel %vm270_vm4, %v267_v43, %v269_v9  ;;  %v274_v39 = vpop.permute.xlu0 %273 }
  0xd0   :  { %v452_v11 = vrot.slane %v445_v36, %v4083_v6  ;;  %v794_v14 = vrot.slane %v787_v48, %v4083_v6  ;;  %v1110_v3 = vadd.f32 %v1108_v5, %v4390_v30  ;;  %v272_v21 = vsel %vm270_vm4, %v269_v9, %v267_v43 }
  0xd1   :  { %v276_v12 = vpop.permute.xlu1 %275  ;;  %v440_v26 = vadd.f32 %v438_v8, %v426_v13  ;;  %v782_v33 = vadd.f32 %v780_v18, %v768_v15  ;;  %v801_v27 = vcombine.low %v797_v23, %v798_v24  ;;  %v469_v28 = vmul.f32 %v271_v4, %v4404_v34 }
  0xd2   :  { %v1136_v40 = vrot.slane %v1129_v25, %v4083_v6  ;;  %v1124_v20 = vadd.f32 %v1122_v19, %v1110_v3  ;;  %v1143_v10 = vcombine.low %v1139_v22, %v1140_v7  ;;  %v470_v36 = vmul.f32 %v272_v21, %v4404_v34 }
  0xd3   :  { %v454_v48 = vadd.f32 %v452_v11, %v440_v26  ;;  %v466_v30 = vrot.slane %v459_v44, %v4083_v6  ;;  %v811_v16 = vmul.f32 %v271_v4, %v4407_v35  ;;  %v812_v9 = vmul.f32 %v272_v21, %v4407_v35  ;;  %v306_v25 = vpop.permute.xlu0 %305 }
  0xd4   :  { %v796_v43 = vadd.f32 %v794_v14, %v782_v33  ;;  %v473_v8 = vcombine.low %v469_v28, %v470_v36  ;;  %v1153_v18 = vmul.f32 %v271_v4, %v4415_v37  ;;  %v1154_v23 = vmul.f32 %v272_v21, %v4415_v37 }
  0xd5   :  { %v308_v5 = vpop.permute.xlu1 %307  ;;  %v808_v19 = vrot.slane %v801_v27, %v4083_v6  ;;  %v815_v24 = vcombine.low %v811_v16, %v812_v9  ;;  %v278_v22 = vsel %vm277_vm5, %v274_v39, %v276_v12  ;;  %v4728_v7 = vstv %s4701_s3 }
  0xd6   :  { %6524 = vst [vmem:[#allocation122_spill] sm:$0xff] %v4728_v7  ;;  %v468_v13 = vadd.f32 %v466_v30, %v454_v48  ;;  %v1138_v15 = vadd.f32 %v1136_v40, %v1124_v20  ;;  %v1150_v44 = vrot.slane %v1143_v10, %v4083_v6  ;;  %v279_v33 = vsel %vm277_vm5, %v276_v12, %v274_v39 }
  0xd7   :  { %v1157_v4 = vcombine.low %v1153_v18, %v1154_v23  ;;  %v483_v11 = vmul.f32 %v278_v22, %v4418_v38  ;;  %v484_v14 = vmul.f32 %v279_v33, %v4418_v38  ;;  %v825_v3 = vmul.f32 %v278_v22, %v4429_v41  ;;  %v365_v20 = vpop.permute.xlu0 %364 }
  0xd8   :  { %v810_v21 = vadd.f32 %v808_v19, %v796_v43  ;;  %v480_v26 = vrot.slane %v473_v8, %v4083_v6  ;;  %v826_v27 = vmul.f32 %v279_v33, %v4429_v41  ;;  %v1167_v28 = vmul.f32 %v278_v22, %v4432_v42 }
  0xd9   :  { %v367_v40 = vpop.permute.xlu1 %366  ;;  %v822_v10 = vrot.slane %v815_v24, %v4083_v6  ;;  %v487_v36 = vcombine.low %v483_v11, %v484_v14  ;;  %v1168_v12 = vmul.f32 %v279_v33, %v4432_v42  ;;  %v309_v39 = vsel %vm242_vm2, %v306_v25, %v308_v5 }
  0xda   :  { %v1152_v48 = vadd.f32 %v1150_v44, %v1138_v15  ;;  %v829_v30 = vcombine.low %v825_v3, %v826_v27  ;;  %v310_v16 = vsel %vm242_vm2, %v308_v5, %v306_v25  ;;  %v526_v9 = vmul.f32 %v309_v39, %v4443_v45 }
  0xdb   :  { %v1164_v43 = vrot.slane %v1157_v4, %v4083_v6  ;;  %v1171_v8 = vcombine.low %v1167_v28, %v1168_v12  ;;  %v527_v18 = vmul.f32 %v310_v16, %v4443_v45  ;;  %v868_v23 = vmul.f32 %v309_v39, %v4446_v46  ;;  %v312_v33 = vpop.permute.xlu0 %311 }
  0xdc   :  { %v494_v19 = vrot.slane %v487_v36, %v4083_v6  ;;  %v869_v24 = vmul.f32 %v310_v16, %v4446_v46  ;;  %v1210_v22 = vmul.f32 %v309_v39, %v4458_v49  ;;  %v1211_v15 = vmul.f32 %v310_v16, %v4458_v49 }
  0xdd   :  { %v314_v44 = vpop.permute.xlu1 %313  ;;  %v482_v5 = vadd.f32 %v480_v26, %v468_v13  ;;  %v824_v25 = vadd.f32 %v822_v10, %v810_v21  ;;  %v530_v11 = vcombine.low %v526_v9, %v527_v18  ;;  %v368_v4 = vsel %vm242_vm2, %v365_v20, %v367_v40 }
  0xde   :  { %v836_v14 = vrot.slane %v829_v30, %v4083_v6  ;;  %v1178_v3 = vrot.slane %v1171_v8, %v4083_v6  ;;  %v872_v27 = vcombine.low %v868_v23, %v869_v24  ;;  %v369_v28 = vsel %vm242_vm2, %v367_v40, %v365_v20 }
  0xdf   :  { %v1166_v36 = vadd.f32 %v1164_v43, %v1152_v48  ;;  %v1214_v12 = vcombine.low %v1210_v22, %v1211_v15  ;;  %v639_v39 = vmul.f32 %v368_v4, %v4469_v52  ;;  %v640_v16 = vmul.f32 %v369_v28, %v4469_v52  ;;  %v371_v9 = vpop.permute.xlu0 %370 }
  0xe0   :  { %v4761_v13 = vadd.f32 %v494_v19, %v482_v5  ;;  %v537_v21 = vrot.slane %v530_v11, %v4083_v6  ;;  %v981_v26 = vmul.f32 %v368_v4, %v4475_v53  ;;  %v982_v10 = vmul.f32 %v369_v28, %v4475_v53 }
  0xe1   :  { %v373_v30 = vpop.permute.xlu1 %372  ;;  %v879_v8 = vrot.slane %v872_v27, %v4083_v6  ;;  %v643_v18 = vcombine.low %v639_v39, %v640_v16  ;;  %v1323_v40 = vmul.f32 %v368_v4, %v4478_v54  ;;  %v1324_v20 = vmul.f32 %v369_v28, %v4478_v54 }
  0xe2   :  { %v4769_v48 = vadd.f32 %v836_v14, %v824_v25  ;;  %v4771_v43 = vadd.f32 %v1178_v3, %v1166_v36  ;;  %v985_v23 = vcombine.low %v981_v26, %v982_v10  ;;  %v315_v19 = vsel %vm249_vm0, %v312_v33, %v314_v44 }
  0xe3   :  { %v1221_v24 = vrot.slane %v1214_v12, %v4083_v6  ;;  %v1327_v22 = vcombine.low %v1323_v40, %v1324_v20  ;;  %v316_v15 = vsel %vm249_vm0, %v314_v44, %v312_v33  ;;  %v540_v5 = vmul.f32 %v315_v19, %v4495_v58  ;;  %v318_v27 = vpop.permute.xlu0 %317 }
  0xe4   :  { %v650_v11 = vrot.slane %v643_v18, %v4083_v6  ;;  %v541_v4 = vmul.f32 %v316_v15, %v4495_v58  ;;  %v882_v25 = vmul.f32 %v315_v19, %v4498_v59  ;;  %v883_v14 = vmul.f32 %v316_v15, %v4498_v59 }
  0xe5   :  { %v320_v3 = vpop.permute.xlu1 %319  ;;  %v539_v28 = vadd.f32 %v537_v21, %v4450_v47  ;;  %v881_v36 = vadd.f32 %v879_v8, %v4462_v50  ;;  %v1224_v12 = vmul.f32 %v315_v19, %v4501_v60  ;;  %v1225_v44 = vmul.f32 %v316_v15, %v4501_v60 }
  0xe6   :  { %v992_v33 = vrot.slane %v985_v23, %v4083_v6  ;;  %v544_v39 = vcombine.low %v540_v5, %v541_v4  ;;  %v886_v16 = vcombine.low %v882_v25, %v883_v14  ;;  %v374_v26 = vsel %vm249_vm0, %v371_v9, %v373_v30 }
  0xe7   :  { %v1334_v10 = vrot.slane %v1327_v22, %v4083_v6  ;;  %v1228_v18 = vcombine.low %v1224_v12, %v1225_v44  ;;  %v375_v40 = vsel %vm249_vm0, %v373_v30, %v371_v9  ;;  %v653_v47 = vmul.f32 %v374_v26, %v4506_v61  ;;  %v377_v19 = vpop.permute.xlu0 %376 }
  0xe8   :  { %v1223_v50 = vadd.f32 %v1221_v24, %v4466_v51  ;;  %v652_v21 = vadd.f32 %v650_v11, %v4482_v55  ;;  %v654_v8 = vmul.f32 %v375_v40, %v4506_v61  ;;  %v995_v20 = vmul.f32 %v374_v26, %v4509_v62 }
  0xe9   :  { %v379_v23 = vpop.permute.xlu1 %378  ;;  %v551_v15 = vrot.slane %v544_v39, %v4083_v6  ;;  %v996_v22 = vmul.f32 %v375_v40, %v4509_v62  ;;  %v1337_v5 = vmul.f32 %v374_v26, %v4512_v63  ;;  %v1338_v30 = vmul.f32 %v375_v40, %v4512_v63 }
  0xea   :  { %v994_v9 = vadd.f32 %v992_v33, %v4486_v56  ;;  %v893_v51 = vrot.slane %v886_v16, %v4083_v6  ;;  %v657_v24 = vcombine.low %v653_v47, %v654_v8  ;;  %v321_v55 = vsel %vm256_vm1, %v318_v27, %v320_v3 }
  0xeb   :  { %v1336_v11 = vadd.f32 %v1334_v10, %v4492_v57  ;;  %v1235_v4 = vrot.slane %v1228_v18, %v4083_v6  ;;  %v999_v25 = vcombine.low %v995_v20, %v996_v22  ;;  %v322_v14 = vsel %vm256_vm1, %v320_v3, %v318_v27  ;;  %v324_v16 = vpop.permute.xlu0 %323 }
  0xec   :  { %v1341_v12 = vcombine.low %v1337_v5, %v1338_v30  ;;  %v554_v44 = vmul.f32 %v321_v55, %v4515_v0  ;;  %v555_v39 = vmul.f32 %v322_v14, %v4515_v0  ;;  %v896_v56 = vmul.f32 %v321_v55, %v4520_v1  ;;  %v6525_v30 = vld [vmem:[#allocation83_spill] sm:$0xff] }
  0xed   :  { %v326_v33 = vpop.permute.xlu1 %325  ;;  %v553_v26 = vadd.f32 %v551_v15, %v539_v28  ;;  %v664_v40 = vrot.slane %v657_v24, %v4083_v6  ;;  %v897_v57 = vmul.f32 %v322_v14, %v4520_v1  ;;  %v1238_v10 = vmul.f32 %v321_v55, %v4523_v2 }
  0xee   :  { %v895_v18 = vadd.f32 %v893_v51, %v881_v36  ;;  %v558_v47 = vcombine.low %v554_v44, %v555_v39  ;;  %v1239_v3 = vmul.f32 %v322_v14, %v4523_v2  ;;  %v380_v27 = vsel %vm256_vm1, %v377_v19, %v379_v23  ;;  %v6526_v44 = vld [vmem:[#allocation84_spill] sm:$0xff] }
  0xef   :  { %v1237_v8 = vadd.f32 %v1235_v4, %v1223_v50  ;;  %v1006_v20 = vrot.slane %v999_v25, %v4083_v6  ;;  %v900_v22 = vcombine.low %v896_v56, %v897_v57  ;;  %v381_v28 = vsel %vm256_vm1, %v379_v23, %v377_v19  ;;  %v383_v55 = vpop.permute.xlu0 %382  ;;  %v6527_v4 = vld [vmem:[#allocation85_spill] sm:$0xff] }
  0xf0   :  { %v1348_v15 = vrot.slane %v1341_v12, %v4083_v6  ;;  %v1242_v5 = vcombine.low %v1238_v10, %v1239_v3  ;;  %v667_v24 = vmul.f32 %v380_v27, %v6525_v30  ;;  %v668_v36 = vmul.f32 %v381_v28, %v6525_v30 }
  0xf1   :  { %v385_v51 = vpop.permute.xlu1 %384  ;;  %v666_v14 = vadd.f32 %v664_v40, %v652_v21  ;;  %v1009_v39 = vmul.f32 %v380_v27, %v6526_v44  ;;  %v1010_v50 = vmul.f32 %v381_v28, %v6526_v44  ;;  %v1351_v25 = vmul.f32 %v380_v27, %v6527_v4  ;;  %v6528_v27 = vld [vmem:[#allocation86_spill] sm:$0xff] }
  0xf2   :  { %v565_v56 = vrot.slane %v558_v47, %v4083_v6  ;;  %v907_v23 = vrot.slane %v900_v22, %v4083_v6  ;;  %v671_v19 = vcombine.low %v667_v24, %v668_v36  ;;  %v1352_v12 = vmul.f32 %v381_v28, %v6527_v4 }
  0xf3   :  { %v1008_v57 = vadd.f32 %v1006_v20, %v994_v9  ;;  %v1013_v10 = vcombine.low %v1009_v39, %v1010_v50  ;;  %v327_v3 = vsel %vm263_vm3, %v324_v16, %v326_v33  ;;  %v328_v21 = vsel %vm263_vm3, %v326_v33, %v324_v16  ;;  %v330_v44 = vpop.permute.xlu0 %329  ;;  %v6529_v9 = vld [vmem:[#allocation87_spill] sm:$0xff]  ;;  %v6530_v50 = vld [vmem:[#allocation88_spill] sm:$0xff] }
  0xf4   :  { %v1350_v40 = vadd.f32 %v1348_v15, %v1336_v11  ;;  %v1249_v42 = vrot.slane %v1242_v5, %v4083_v6  ;;  %v1355_v41 = vcombine.low %v1351_v25, %v1352_v12  ;;  %v568_v38 = vmul.f32 %v327_v3, %v6528_v27 }
  0xf5   :  { %v332_v47 = vpop.permute.xlu1 %331  ;;  %v678_v22 = vrot.slane %v671_v19, %v4083_v6  ;;  %v569_v28 = vmul.f32 %v328_v21, %v6528_v27  ;;  %v910_v20 = vmul.f32 %v327_v3, %v6529_v9  ;;  %v911_v24 = vmul.f32 %v328_v21, %v6529_v9  ;;  %v6531_v9 = vld [vmem:[#allocation89_spill] sm:$0xff] }
  0xf6   :  { %v567_v36 = vadd.f32 %v565_v56, %v553_v26  ;;  %v909_v39 = vadd.f32 %v907_v23, %v895_v18  ;;  %v1252_v33 = vmul.f32 %v327_v3, %v6530_v50  ;;  %v1253_v11 = vmul.f32 %v328_v21, %v6530_v50 }
  0xf7   :  { %v1020_v16 = vrot.slane %v1013_v10, %v4083_v6  ;;  %v572_v15 = vcombine.low %v568_v38, %v569_v28  ;;  %v914_v5 = vcombine.low %v910_v20, %v911_v24  ;;  %v386_v25 = vsel %vm263_vm3, %v383_v55, %v385_v51  ;;  %v389_v56 = vpop.permute.xlu0 %388  ;;  %v6532_v10 = vld [vmem:[#allocation90_spill] sm:$0xff]  ;;  %v6533_v24 = vld [vmem:[#allocation91_spill] sm:$0xff] }
  0xf8   :  { %v1362_v19 = vrot.slane %v1355_v41, %v4083_v6  ;;  %v1256_v12 = vcombine.low %v1252_v33, %v1253_v11  ;;  %v387_v27 = vsel %vm263_vm3, %v385_v51, %v383_v55  ;;  %v681_v26 = vmul.f32 %v386_v25, %v6531_v9 }
  0xf9   :  { %v391_v18 = vpop.permute.xlu1 %390  ;;  %v1251_v23 = vadd.f32 %v1249_v42, %v1237_v8  ;;  %v680_v3 = vadd.f32 %v678_v22, %v666_v14  ;;  %v682_v21 = vmul.f32 %v387_v27, %v6531_v9  ;;  %v1023_v38 = vmul.f32 %v386_v25, %v6532_v10 }
  0xfa   :  { %v579_v28 = vrot.slane %v572_v15, %v4083_v6  ;;  %v1024_v20 = vmul.f32 %v387_v27, %v6532_v10  ;;  %v1365_v41 = vmul.f32 %v386_v25, %v6533_v24  ;;  %v1366_v33 = vmul.f32 %v387_v27, %v6533_v24  ;;  %v6534_v25 = vld [vmem:[#allocation92_spill] sm:$0xff]  ;;  %v6535_v27 = vld [vmem:[#allocation93_spill] sm:$0xff] }
  0xfb   :  { %v1022_v11 = vadd.f32 %v1020_v16, %v1008_v57  ;;  %v921_v51 = vrot.slane %v914_v5, %v4083_v6  ;;  %v685_v55 = vcombine.low %v681_v26, %v682_v21  ;;  %v333_v42 = vsel %vm270_vm4, %v330_v44, %v332_v47  ;;  %v336_v10 = vpop.permute.xlu0 %335 }
  0xfc   :  { %v1364_v8 = vadd.f32 %v1362_v19, %v1350_v40  ;;  %v1263_v14 = vrot.slane %v1256_v12, %v4083_v6  ;;  %v1027_v22 = vcombine.low %v1023_v38, %v1024_v20  ;;  %v334_v15 = vsel %vm270_vm4, %v332_v47, %v330_v44  ;;  %v6536_v19 = vld [vmem:[#allocation94_spill] sm:$0xff] }
  0xfd   :  { %v338_v9 = vpop.permute.xlu1 %337  ;;  %v1369_v50 = vcombine.low %v1365_v41, %v1366_v33  ;;  %v582_v4 = vmul.f32 %v333_v42, %v6534_v25  ;;  %v583_v57 = vmul.f32 %v334_v15, %v6534_v25  ;;  %v924_v16 = vmul.f32 %v333_v42, %v6535_v27 }
  0xfe   :  { %v581_v5 = vadd.f32 %v579_v28, %v567_v36  ;;  %v692_v26 = vrot.slane %v685_v55, %v4083_v6  ;;  %v925_v40 = vmul.f32 %v334_v15, %v6535_v27  ;;  %v1266_v12 = vmul.f32 %v333_v42, %v6536_v19  ;;  %v6537_v42 = vld [vmem:[#allocation95_spill] sm:$0xff] }
  0xff   :  { %v923_v21 = vadd.f32 %v921_v51, %v909_v39  ;;  %v586_v38 = vcombine.low %v582_v4, %v583_v57  ;;  %v1267_v44 = vmul.f32 %v334_v15, %v6536_v19  ;;  %v392_v47 = vsel %vm270_vm4, %v389_v56, %v391_v18  ;;  %v395_v55 = vpop.permute.xlu0 %394  ;;  %v6538_v15 = vld [vmem:[#allocation96_spill] sm:$0xff] }
 0x100   :  { %v1265_v20 = vadd.f32 %v1263_v14, %v1251_v23  ;;  %v1034_v41 = vrot.slane %v1027_v22, %v4083_v6  ;;  %v928_v33 = vcombine.low %v924_v16, %v925_v40  ;;  %v393_v36 = vsel %vm270_vm4, %v391_v18, %v389_v56  ;;  %v6539_v22 = vld [vmem:[#allocation97_spill] sm:$0xff] }
 0x101   :  { %v397_v28 = vpop.permute.xlu1 %396  ;;  %v1376_v24 = vrot.slane %v1369_v50, %v4083_v6  ;;  %v1270_v27 = vcombine.low %v1266_v12, %v1267_v44  ;;  %v695_v39 = vmul.f32 %v392_v47, %v6537_v42  ;;  %v696_v4 = vmul.f32 %v393_v36, %v6537_v42 }
 0x102   :  { %v694_v51 = vadd.f32 %v692_v26, %v680_v3  ;;  %v1037_v23 = vmul.f32 %v392_v47, %v6538_v15  ;;  %v1038_v14 = vmul.f32 %v393_v36, %v6538_v15  ;;  %v1379_v57 = vmul.f32 %v392_v47, %v6539_v22 }
 0x103   :  { %v593_v18 = vrot.slane %v586_v38, %v4083_v6  ;;  %v935_v56 = vrot.slane %v928_v33, %v4083_v6  ;;  %v699_v16 = vcombine.low %v695_v39, %v696_v4  ;;  %v1380_v50 = vmul.f32 %v393_v36, %v6539_v22  ;;  %v281_v42 = vpop.permute.xlu0 %280  ;;  %v6540_v38 = vld [vmem:[#allocation98_spill] sm:$0xff] }
 0x104   :  { %v1036_v40 = vadd.f32 %v1034_v41, %v1022_v11  ;;  %v1041_v12 = vcombine.low %v1037_v23, %v1038_v14  ;;  %v339_v44 = vsel %vm277_vm5, %v336_v10, %v338_v9  ;;  %v340_v3 = vsel %vm277_vm5, %v338_v9, %v336_v10  ;;  %v6541_v11 = vld [vmem:[#allocation99_spill] sm:$0xff]  ;;  %v6542_v14 = vld [vmem:[#allocation100_spill] sm:$0xff] }
 0x105   :  { %v283_v26 = vpop.permute.xlu1 %282  ;;  %v1378_v15 = vadd.f32 %v1376_v24, %v1364_v8  ;;  %v1277_v47 = vrot.slane %v1270_v27, %v4083_v6  ;;  %v1383_v19 = vcombine.low %v1379_v57, %v1380_v50  ;;  %v596_v25 = vmul.f32 %v339_v44, %v6540_v38 }
 0x106   :  { %v706_v33 = vrot.slane %v699_v16, %v4083_v6  ;;  %v597_v36 = vmul.f32 %v340_v3, %v6540_v38  ;;  %v938_v41 = vmul.f32 %v339_v44, %v6541_v11  ;;  %v939_v39 = vmul.f32 %v340_v3, %v6541_v11 }
 0x107   :  { %v595_v4 = vadd.f32 %v593_v18, %v581_v5  ;;  %v937_v23 = vadd.f32 %v935_v56, %v923_v21  ;;  %v1280_v9 = vmul.f32 %v339_v44, %v6542_v14  ;;  %v1281_v10 = vmul.f32 %v340_v3, %v6542_v14  ;;  %v342_v50 = vpop.permute.xlu0 %341  ;;  %v6543_v21 = vld [vmem:[#allocation101_spill] sm:$0xff] }
 0x108   :  { %v1048_v24 = vrot.slane %v1041_v12, %v4083_v6  ;;  %v600_v8 = vcombine.low %v596_v25, %v597_v36  ;;  %v942_v27 = vcombine.low %v938_v41, %v939_v39  ;;  %v398_v57 = vsel %vm277_vm5, %v395_v55, %v397_v28  ;;  %v6544_v12 = vld [vmem:[#allocation102_spill] sm:$0xff]  ;;  %v6545_v39 = vld [vmem:[#allocation103_spill] sm:$0xff] }
 0x109   :  { %v344_v16 = vpop.permute.xlu1 %343  ;;  %v1390_v38 = vrot.slane %v1383_v19, %v4083_v6  ;;  %v1284_v22 = vcombine.low %v1280_v9, %v1281_v10  ;;  %v399_v5 = vsel %vm277_vm5, %v397_v28, %v395_v55  ;;  %v709_v18 = vmul.f32 %v398_v57, %v6543_v21 }
 0x10a   :  { %v1279_v56 = vadd.f32 %v1277_v47, %v1265_v20  ;;  %v708_v44 = vadd.f32 %v706_v33, %v694_v51  ;;  %v710_v3 = vmul.f32 %v399_v5, %v6543_v21  ;;  %v1051_v25 = vmul.f32 %v398_v57, %v6544_v12 }
 0x10b   :  { %v607_v36 = vrot.slane %v600_v8, %v4083_v6  ;;  %v1052_v41 = vmul.f32 %v399_v5, %v6544_v12  ;;  %v1393_v14 = vmul.f32 %v398_v57, %v6545_v39  ;;  %v1394_v19 = vmul.f32 %v399_v5, %v6545_v39  ;;  %v401_v51 = vpop.permute.xlu0 %400  ;;  %v6546_v57 = vld [vmem:[#allocation104_spill] sm:$0xff] }
 0x10c   :  { %v1050_v9 = vadd.f32 %v1048_v24, %v1036_v40  ;;  %v949_v10 = vrot.slane %v942_v27, %v4083_v6  ;;  %v713_v28 = vcombine.low %v709_v18, %v710_v3  ;;  %v285_v20 = vsel %vm284_vm6, %v281_v42, %v283_v26  ;;  %v6547_v24 = vld [vmem:[#allocation105_spill] sm:$0xff] }
 0x10d   :  { %v403_v55 = vpop.permute.xlu1 %402  ;;  %v1392_v47 = vadd.f32 %v1390_v38, %v1378_v15  ;;  %v1291_v33 = vrot.slane %v1284_v22, %v4083_v6  ;;  %v1055_v21 = vcombine.low %v1051_v25, %v1052_v41  ;;  %v286_v8 = vsel %vm284_vm6, %v283_v26, %v281_v42  ;;  %v6548_v38 = vld [vmem:[#allocation106_spill] sm:$0xff] }
 0x10e   :  { %v1397_v12 = vcombine.low %v1393_v14, %v1394_v19  ;;  %v497_v11 = vmul.f32 %v285_v20, %v6546_v57  ;;  %v498_v40 = vmul.f32 %v286_v8, %v6546_v57  ;;  %v839_v27 = vmul.f32 %v285_v20, %v6547_v24 }
 0x10f   :  { %v609_v5 = vadd.f32 %v607_v36, %v595_v4  ;;  %v720_v18 = vrot.slane %v713_v28, %v4083_v6  ;;  %v840_v15 = vmul.f32 %v286_v8, %v6547_v24  ;;  %v1181_v22 = vmul.f32 %v285_v20, %v6548_v38  ;;  %v6549_v24 = vld [vmem:[#allocation107_spill] sm:$0xff] }
 0x110   :  { %v951_v3 = vadd.f32 %v949_v10, %v937_v23  ;;  %v501_v25 = vcombine.low %v497_v11, %v498_v40  ;;  %v1182_v42 = vmul.f32 %v286_v8, %v6548_v38  ;;  %v345_v26 = vsel %vm284_vm6, %v342_v50, %v344_v16  ;;  %v288_v10 = vpop.permute.xlu0 %287  ;;  %v6550_v8 = vld [vmem:[#allocation108_spill] sm:$0xff] }
 0x111   :  { %v1293_v14 = vadd.f32 %v1291_v33, %v1279_v56  ;;  %v1062_v41 = vrot.slane %v1055_v21, %v4083_v6  ;;  %v843_v19 = vcombine.low %v839_v27, %v840_v15  ;;  %v346_v4 = vsel %vm284_vm6, %v344_v16, %v342_v50  ;;  %v290_v11 = vpop.permute.xlu1 %289  ;;  %v6551_v33 = vld [vmem:[#allocation109_spill] sm:$0xff] }
 0x112   :  { %v1404_v36 = vrot.slane %v1397_v12, %v4083_v6  ;;  %v1185_v28 = vcombine.low %v1181_v22, %v1182_v42  ;;  %v610_v57 = vmul.f32 %v345_v26, %v6549_v24  ;;  %v611_v23 = vmul.f32 %v346_v4, %v6549_v24 }
 0x113   :  { %v722_v20 = vadd.f32 %v720_v18, %v708_v44  ;;  %v952_v40 = vmul.f32 %v345_v26, %v6550_v8  ;;  %v953_v56 = vmul.f32 %v346_v4, %v6550_v8  ;;  %v1294_v21 = vmul.f32 %v345_v26, %v6551_v33 }
 0x114   :  { %v508_v27 = vrot.slane %v501_v25, %v4083_v6  ;;  %v850_v16 = vrot.slane %v843_v19, %v4083_v6  ;;  %v614_v50 = vcombine.low %v610_v57, %v611_v23  ;;  %v1295_v12 = vmul.f32 %v346_v4, %v6551_v33  ;;  %v6552_v25 = vld [vmem:[#allocation110_spill] sm:$0xff] }
 0x115   :  { %v4937_v15 = vadd.f32 %v1062_v41, %v1050_v9  ;;  %v956_v22 = vcombine.low %v952_v40, %v953_v56  ;;  %v404_v42 = vsel %vm284_vm6, %v401_v51, %v403_v55  ;;  %v405_v44 = vsel %vm284_vm6, %v403_v55, %v401_v51  ;;  %v6553_v9 = vld [vmem:[#allocation111_spill] sm:$0xff]  ;;  %v6554_v55 = vld [vmem:[#allocation112_spill] sm:$0xff] }
 0x116   :  { %v4943_v18 = vadd.f32 %v1404_v36, %v1392_v47  ;;  %v1192_v26 = vrot.slane %v1185_v28, %v4083_v6  ;;  %v1298_v8 = vcombine.low %v1294_v21, %v1295_v12  ;;  %v723_v24 = vmul.f32 %v404_v42, %v6552_v25  ;;  %v350_v36 = vpop.permute.xlu1 %349  ;;  %v348_v28 = vpop.permute.xlu0 %347 }
 0x117   :  { %v621_v57 = vrot.slane %v614_v50, %v4083_v6  ;;  %v724_v19 = vmul.f32 %v405_v44, %v6552_v25  ;;  %v1065_v41 = vmul.f32 %v404_v42, %v6553_v9  ;;  %v1066_v4 = vmul.f32 %v405_v44, %v6553_v9 }
 0x118   :  { %v510_v23 = vadd.f32 %v508_v27, %v4761_v13  ;;  %v852_v40 = vadd.f32 %v850_v16, %v4769_v48  ;;  %v1407_v51 = vmul.f32 %v404_v42, %v6554_v55  ;;  %v1408_v47 = vmul.f32 %v405_v44, %v6554_v55  ;;  %v6555_v48 = vld [vmem:[#allocation113_spill] sm:$0xff]  ;;  %v6556_v55 = vld [vmem:[#allocation114_spill] sm:$0xff] }
 0x119   :  { %v963_v56 = vrot.slane %v956_v22, %v4083_v6  ;;  %v1305_v21 = vrot.slane %v1298_v8, %v4083_v6  ;;  %v727_v50 = vcombine.low %v723_v24, %v724_v19  ;;  %v292_v12 = vsel %vm291_vm7, %v288_v10, %v290_v11  ;;  %v6557_v19 = vld [vmem:[#allocation115_spill] sm:$0xff] }
 0x11a   :  { %v1194_v9 = vadd.f32 %v1192_v26, %v4771_v43  ;;  %v1069_v25 = vcombine.low %v1065_v41, %v1066_v4  ;;  %v293_v13 = vsel %vm291_vm7, %v290_v11, %v288_v10  ;;  %v511_v27 = vmul.f32 %v292_v12, %v6555_v48 }
 0x11b   :  { %v623_v16 = vadd.f32 %v621_v57, %v609_v5  ;;  %v1411_v42 = vcombine.low %v1407_v51, %v1408_v47  ;;  %v512_v44 = vmul.f32 %v293_v13, %v6555_v48  ;;  %v853_v22 = vmul.f32 %v292_v12, %v6556_v55  ;;  %v409_v47 = vpop.permute.xlu1 %408 }
 0x11c   :  { %v734_v8 = vrot.slane %v727_v50, %v4083_v6  ;;  %v854_v24 = vmul.f32 %v293_v13, %v6556_v55  ;;  %v1195_v33 = vmul.f32 %v292_v12, %v6557_v19  ;;  %v1196_v43 = vmul.f32 %v293_v13, %v6557_v19  ;;  %v407_v50 = vpop.permute.xlu0 %406  ;;  %v6558_v12 = vld [vmem:[#allocation116_spill] sm:$0xff] }
 0x11d   :  { %v965_v26 = vadd.f32 %v963_v56, %v951_v3  ;;  %v1307_v41 = vadd.f32 %v1305_v21, %v1293_v14  ;;  %v515_v4 = vcombine.low %v511_v27, %v512_v44  ;;  %v351_v11 = vsel %vm291_vm7, %v348_v28, %v350_v36  ;;  %v6559_v14 = vld [vmem:[#allocation117_spill] sm:$0xff]  ;;  %v6560_v27 = vld [vmem:[#allocation118_spill] sm:$0xff] }
 0x11e   :  { %v1076_v5 = vrot.slane %v1069_v25, %v4083_v6  ;;  %v857_v10 = vcombine.low %v853_v22, %v854_v24  ;;  %v1199_v57 = vcombine.low %v1195_v33, %v1196_v43  ;;  %v352_v51 = vsel %vm291_vm7, %v350_v36, %v348_v28 }
 0x11f   :  { %v522_v55 = vrot.slane %v515_v4, %v4083_v6  ;;  %v624_v48 = vmul.f32 %v351_v11, %v6558_v12  ;;  %v625_v3 = vmul.f32 %v352_v51, %v6558_v12  ;;  %v966_v56 = vmul.f32 %v351_v11, %v6559_v14 }
 0x120   :  { %v736_v21 = vadd.f32 %v734_v8, %v722_v20  ;;  %v1418_v13 = vrot.slane %v1411_v42, %v4083_v6  ;;  %v967_v25 = vmul.f32 %v352_v51, %v6559_v14  ;;  %v1308_v33 = vmul.f32 %v351_v11, %v6560_v27  ;;  %v6561_v11 = vld [vmem:[#allocation119_spill] sm:$0xff] }
 0x121   :  { %v864_v36 = vrot.slane %v857_v10, %v4083_v6  ;;  %v628_v28 = vcombine.low %v624_v48, %v625_v3  ;;  %v1309_v44 = vmul.f32 %v352_v51, %v6560_v27  ;;  %v410_v22 = vsel %vm291_vm7, %v407_v50, %v409_v47  ;;  %v6562_v51 = vld [vmem:[#allocation120_spill] sm:$0xff] }
 0x122   :  { %v524_v24 = vadd.f32 %v522_v55, %v510_v23  ;;  %v1206_v43 = vrot.slane %v1199_v57, %v4083_v6  ;;  %v970_v20 = vcombine.low %v966_v56, %v967_v25  ;;  %v411_v42 = vsel %vm291_vm7, %v409_v47, %v407_v50  ;;  %v6563_v55 = vld [vmem:[#allocation121_spill] sm:$0xff] }
 0x123   :  { %v635_v8 = vrot.slane %v628_v28, %v4083_v6  ;;  %v1312_v4 = vcombine.low %v1308_v33, %v1309_v44  ;;  %v737_v14 = vmul.f32 %v410_v22, %v6561_v11  ;;  %v738_v48 = vmul.f32 %v411_v42, %v6561_v11 }
 0x124   :  { %v977_v10 = vrot.slane %v970_v20, %v4083_v6  ;;  %v1079_v3 = vmul.f32 %v410_v22, %v6562_v51  ;;  %v1080_v23 = vmul.f32 %v411_v42, %v6562_v51  ;;  %v1421_v57 = vmul.f32 %v410_v22, %v6563_v55 }
 0x125   :  { %v637_v56 = vadd.f32 %v635_v8, %v623_v16  ;;  %v1319_v25 = vrot.slane %v1312_v4, %v4083_v6  ;;  %v741_v47 = vcombine.low %v737_v14, %v738_v48  ;;  %v1422_v50 = vmul.f32 %v411_v42, %v6563_v55 }
 0x126   :  { %v866_v33 = vadd.f32 %v864_v36, %v852_v40  ;;  %v1208_v28 = vadd.f32 %v1206_v43, %v1194_v9  ;;  %v979_v44 = vadd.f32 %v977_v10, %v965_v26  ;;  %v1083_v27 = vcombine.low %v1079_v3, %v1080_v23 }
 0x127   :  { %v751_v11 = vadd.f32 %v637_v56, %v524_v24  ;;  %v1321_v12 = vadd.f32 %v1319_v25, %v1307_v41  ;;  %v748_v20 = vrot.slane %v741_v47, %v4083_v6  ;;  %v1425_v19 = vcombine.low %v1421_v57, %v1422_v50 }
 0x128   :  { %v1078_v51 = vadd.f32 %v1076_v5, %v4937_v15  ;;  %v1093_v38 = vadd.f32 %v979_v44, %v866_v33  ;;  %v5002_v39 = vstv %s4981_s27  ;;  %v1090_v16 = vrot.slane %v1083_v27, %v4083_v6 }
 0x129   :  { %6564 = vst [vmem:[#allocation83_spill] sm:$0xff] %v5002_v39  ;;  %v1420_v14 = vadd.f32 %v1418_v13, %v4943_v18  ;;  %v1435_v22 = vadd.f32 %v1321_v12, %v1208_v28  ;;  %v750_v42 = vadd.f32 %v748_v20, %v736_v21  ;;  %v1432_v9 = vrot.slane %v1425_v19, %v4083_v6  ;;  %v6578_v20 = vld [vmem:[#allocation61_spill] sm:$0xff] }
 0x12a   :  { %v5007_v40 = vstv %s3949_s28  ;;  %v1092_v26 = vadd.f32 %v1090_v16, %v1078_v51 }
 0x12b   :  { %6565 = vst [vmem:[#allocation123_spill] sm:$0xff] %v5007_v40  ;;  %v752_v41 = vadd.f32 %v750_v42, %v4728_v7  ;;  %v1434_v36 = vadd.f32 %v1432_v9, %v1420_v14  ;;  %v6579_v14 = vld [vmem:[#allocation47_spill] sm:$0xff]  ;;  %v6580_v42 = vld [vmem:[#allocation48_spill] sm:$0xff] }
 0x12c   :  { %v1094_v24 = vadd.f32 %v1092_v26, %v5002_v39  ;;  %v6581_v26 = vld [vmem:[#allocation64_spill] sm:$0xff] }
 0x12d   :  { %v5011_v15 = vadd.f32 %v752_v41, %v751_v11  ;;  %v1436_v5 = vadd.f32 %v1434_v36, %v5007_v40  ;;  %v6582_v36 = vld [vmem:[#allocation65_spill] sm:$0xff]  ;;  %v6587_v39 = vld [vmem:[#allocation56_spill] sm:$0xff] }
 0x12e   :  { %v5014_v43 = vadd.f32 %v1094_v24, %v1093_v38 }
 0x12f   :  { %v5016_v27 = vadd.f32 %v1436_v5, %v1435_v22  ;;  %v1445_v18 = vrot.slane %v5011_v15, %v4083_v6  ;;  %v1615_v22 = vmul.f32 %v5011_v15, %v6579_v14  ;;  %v1957_v9 = vmul.f32 %v5011_v15, %v6580_v42  ;;  %v6585_v42 = vld [vmem:[#allocation69_spill] sm:$0xff]  ;;  %v6586_v14 = vld [vmem:[#allocation72_spill] sm:$0xff] }
 0x130   :  { %v1504_v19 = vrot.slane %v5014_v43, %v4083_v6  ;;  %v1728_v16 = vmul.f32 %v5014_v43, %v6578_v20  ;;  %v2070_v41 = vmul.f32 %v5014_v43, %v6581_v26  ;;  %v2412_v24 = vmul.f32 %v5014_v43, %v6582_v36 }
 0x131   :  { %1449 = vrot.lane.b32.xlu0 %v1445_v18, %s6566_s22  ;;  %v1563_v12 = vrot.slane %v5016_v27, %v4083_v6  ;;  %v1446_v21 = vcombine.high %v1445_v18, %v1445_v18  ;;  %v2183_v26 = vmul.f32 %v5016_v27, %v6585_v42  ;;  %v5120_v43 = vmul.f32 %v5016_v27, %v6586_v14 }
 0x132   :  { %1508 = vrot.lane.b32.xlu1 %v1504_v19, %s6566_s22  ;;  %v1505_v38 = vcombine.high %v1504_v19, %v1504_v19 }
 0x133   :  { %v1564_v13 = vcombine.high %v1563_v12, %v1563_v12 }
 0x135   :  { %1455 = vrot.lane.b32.xlu0 %v1445_v18, %s6567_s23 }
 0x136   :  { %1567 = vrot.lane.b32.xlu1 %v1563_v12, %s6566_s22 }
 0x139   :  { %1461 = vrot.lane.b32.xlu0 %v1445_v18, %s6568_s30 }
 0x13a   :  { %1514 = vrot.lane.b32.xlu1 %v1504_v19, %s6567_s23 }
 0x13d   :  { %1467 = vrot.lane.b32.xlu0 %v1445_v18, %s6569_s4 }
 0x13e   :  { %1573 = vrot.lane.b32.xlu1 %v1563_v12, %s6567_s23 }
 0x141   :  { %1473 = vrot.lane.b32.xlu0 %v1445_v18, %s6570_s9 }
 0x142   :  { %1520 = vrot.lane.b32.xlu1 %v1504_v19, %s6568_s30 }
 0x145   :  { %1532 = vrot.lane.b32.xlu0 %v1504_v19, %s6570_s9 }
 0x146   :  { %1579 = vrot.lane.b32.xlu1 %v1563_v12, %s6568_s30 }
 0x149   :  { %1591 = vrot.lane.b32.xlu0 %v1563_v12, %s6570_s9 }
 0x14a   :  { %1526 = vrot.lane.b32.xlu1 %v1504_v19, %s6569_s4 }
 0x14d   :  { %1479 = vrot.lane.b32.xlu0 %v1445_v18, %s6571_s13 }
 0x14e   :  { %1585 = vrot.lane.b32.xlu1 %v1563_v12, %s6569_s4 }
 0x151   :  { %1510 = vrot.lane.b32.xlu0 %v1505_v38, %s6566_s22 }
 0x152   :  { %1451 = vrot.lane.b32.xlu1 %v1446_v21, %s6566_s22 }
 0x155   :  { %1569 = vrot.lane.b32.xlu0 %v1564_v13, %s6566_s22 }
 0x156   :  { %1457 = vrot.lane.b32.xlu1 %v1446_v21, %s6567_s23 }
 0x159   :  { %1516 = vrot.lane.b32.xlu0 %v1505_v38, %s6567_s23 }
 0x15a   :  { %1463 = vrot.lane.b32.xlu1 %v1446_v21, %s6568_s30 }
 0x15d   :  { %1575 = vrot.lane.b32.xlu0 %v1564_v13, %s6567_s23 }
 0x15e   :  { %1469 = vrot.lane.b32.xlu1 %v1446_v21, %s6569_s4 }
 0x161   :  { %1522 = vrot.lane.b32.xlu0 %v1505_v38, %s6568_s30 }
 0x162   :  { %1475 = vrot.lane.b32.xlu1 %v1446_v21, %s6570_s9 }
 0x165   :  { %1581 = vrot.lane.b32.xlu0 %v1564_v13, %s6568_s30 }
 0x166   :  { %1534 = vrot.lane.b32.xlu1 %v1505_v38, %s6570_s9 }
 0x169   :  { %1528 = vrot.lane.b32.xlu0 %v1505_v38, %s6569_s4 }
 0x16a   :  { %1593 = vrot.lane.b32.xlu1 %v1564_v13, %s6570_s9 }
 0x16d   :  { %1587 = vrot.lane.b32.xlu0 %v1564_v13, %s6569_s4 }
 0x16e   :  { %1481 = vrot.lane.b32.xlu1 %v1446_v21, %s6571_s13 }
 0x171   :  { %1538 = vrot.lane.b32.xlu0 %v1504_v19, %s6571_s13 }
 0x172   :  { %1540 = vrot.lane.b32.xlu1 %v1505_v38, %s6571_s13 }
 0x175   :  { %1597 = vrot.lane.b32.xlu0 %v1563_v12, %s6571_s13 }
 0x176   :  { %1599 = vrot.lane.b32.xlu1 %v1564_v13, %s6571_s13 }
 0x179   :  { %1485 = vrot.lane.b32.xlu0 %v1445_v18, %s6572_s16 }
 0x17a   :  { %1487 = vrot.lane.b32.xlu1 %v1446_v21, %s6572_s16 }
 0x17d   :  { %1544 = vrot.lane.b32.xlu0 %v1504_v19, %s6572_s16 }
 0x17e   :  { %1546 = vrot.lane.b32.xlu1 %v1505_v38, %s6572_s16 }
 0x181   :  { %1603 = vrot.lane.b32.xlu0 %v1563_v12, %s6572_s16 }
 0x182   :  { %1605 = vrot.lane.b32.xlu1 %v1564_v13, %s6572_s16 }
 0x185   :  { %1491 = vrot.lane.b32.xlu0 %v1445_v18, %s6573_s14  ;;  %v6583_v18 = vld [vmem:[#allocation51_spill] sm:$0xff] }
 0x186   :  { %1493 = vrot.lane.b32.xlu1 %v1446_v21, %s6573_s14 }
 0x189   :  { %1550 = vrot.lane.b32.xlu0 %v1504_v19, %s6573_s14  ;;  %v2299_v19 = vmul.f32 %v5011_v15, %v6583_v18 }
 0x18a   :  { %1552 = vrot.lane.b32.xlu1 %v1505_v38, %s6573_s14 }
 0x18d   :  { %1609 = vrot.lane.b32.xlu0 %v1563_v12, %s6573_s14  ;;  %v6584_v12 = vld [vmem:[#allocation68_spill] sm:$0xff] }
 0x18e   :  { %1611 = vrot.lane.b32.xlu1 %v1564_v13, %s6573_s14  ;;  %v1841_v38 = vmul.f32 %v5016_v27, %v6584_v12 }
 0x1a3   :  { %v1450_v8 = vpop.permute.xlu0 %1449 }
 0x1a4   :  { %v1509_v4 = vpop.permute.xlu1 %1508 }
 0x1a7   :  { %v5072_v11 = vpop.permute.xlu0 %1455 }
 0x1a8   :  { %v1568_v48 = vpop.permute.xlu1 %1567 }
 0x1ab   :  { %v5074_v10 = vpop.permute.xlu0 %1461 }
 0x1ac   :  { %v5076_v51 = vpop.permute.xlu1 %1514 }
 0x1af   :  { %v5078_v3 = vpop.permute.xlu0 %1467 }
 0x1b0   :  { %v5080_v23 = vpop.permute.xlu1 %1573 }
 0x1b3   :  { %v5082_v57 = vpop.permute.xlu0 %1473 }
 0x1b4   :  { %v5084_v56 = vpop.permute.xlu1 %1520 }
 0x1b7   :  { %v5086_v25 = vpop.permute.xlu0 %1532 }
 0x1b8   :  { %v5088_v47 = vpop.permute.xlu1 %1579 }
 0x1bb   :  { %v5090_v50 = vpop.permute.xlu0 %1591 }
 0x1bc   :  { %6574 = vst [vmem:[#allocation124_spill] sm:$0xff] %v5090_v50  ;;  %v5092_v33 = vpop.permute.xlu1 %1526 }
 0x1bd   :  { %6575 = vst [vmem:[#allocation125_spill] sm:$0xff] %v5092_v33 }
 0x1bf   :  { %v5094_v28 = vpop.permute.xlu0 %1479 }
 0x1c0   :  { %6576 = vst [vmem:[#allocation126_spill] sm:$0xff] %v5094_v28  ;;  %v5096_v44 = vpop.permute.xlu1 %1585 }
 0x1c1   :  { %6577 = vst [vmem:[#allocation127_spill] sm:$0xff] %v5096_v44  ;;  %v6588_v44 = vld [vmem:[#allocation57_spill] sm:$0xff] }
 0x1c3   :  { %v1511_v5 = vpop.permute.xlu0 %1510 }
 0x1c4   :  { %v1512_v21 = vsel %vm242_vm2, %v1509_v4, %v1511_v5  ;;  %v1513_v13 = vsel %vm242_vm2, %v1511_v5, %v1509_v4  ;;  %v1452_v20 = vpop.permute.xlu1 %1451 }
 0x1c5   :  { %v1729_v36 = vmul.f32 %v1512_v21, %v4443_v45  ;;  %v1730_v15 = vmul.f32 %v1513_v13, %v4443_v45  ;;  %v2071_v12 = vmul.f32 %v1512_v21, %v4446_v46  ;;  %v2072_v18 = vmul.f32 %v1513_v13, %v4446_v46 }
 0x1c6   :  { %v2413_v40 = vmul.f32 %v1512_v21, %v4458_v49  ;;  %v2414_v4 = vmul.f32 %v1513_v13, %v4458_v49  ;;  %v1453_v5 = vsel %vm242_vm2, %v1450_v8, %v1452_v20  ;;  %v1454_v42 = vsel %vm242_vm2, %v1452_v20, %v1450_v8 }
 0x1c7   :  { %v1733_v27 = vcombine.low %v1729_v36, %v1730_v15  ;;  %v2075_v14 = vcombine.low %v2071_v12, %v2072_v18  ;;  %v1616_v7 = vmul.f32 %v1453_v5, %v6587_v39  ;;  %v1617_v45 = vmul.f32 %v1454_v42, %v6587_v39  ;;  %v1570_v55 = vpop.permute.xlu0 %1569 }
 0x1c8   :  { %v2417_v28 = vcombine.low %v2413_v40, %v2414_v4  ;;  %v1958_v46 = vmul.f32 %v1453_v5, %v6588_v44  ;;  %v1959_v21 = vmul.f32 %v1454_v42, %v6588_v44  ;;  %v2300_v13 = vmul.f32 %v1453_v5, %v4386_v29 }
 0x1c9   :  { %v1740_v49 = vrot.slane %v1733_v27, %v4083_v6  ;;  %v2082_v50 = vrot.slane %v2075_v14, %v4083_v6  ;;  %v1620_v33 = vcombine.low %v1616_v7, %v1617_v45  ;;  %v2301_v8 = vmul.f32 %v1454_v42, %v4386_v29 }
 0x1ca   :  { %v2424_v20 = vrot.slane %v2417_v28, %v4083_v6  ;;  %v1962_v36 = vcombine.low %v1958_v46, %v1959_v21  ;;  %v1571_v18 = vsel %vm242_vm2, %v1568_v48, %v1570_v55  ;;  %v1572_v40 = vsel %vm242_vm2, %v1570_v55, %v1568_v48  ;;  %v1458_v28 = vpop.permute.xlu1 %1457 }
 0x1cb   :  { %v5145_v12 = vadd.f32 %v1740_v49, %v1728_v16  ;;  %v5147_v15 = vadd.f32 %v2082_v50, %v2070_v41  ;;  %v1627_v4 = vrot.slane %v1620_v33, %v4083_v6  ;;  %v2304_v5 = vcombine.low %v2300_v13, %v2301_v8 }
 0x1cc   :  { %v5150_v14 = vadd.f32 %v2424_v20, %v2412_v24  ;;  %v1969_v45 = vrot.slane %v1962_v36, %v4083_v6  ;;  %v1842_v7 = vmul.f32 %v1571_v18, %v4469_v52  ;;  %v1843_v46 = vmul.f32 %v1572_v40, %v4469_v52  ;;  %v6589_v20 = vld [vmem:[#allocation49_spill] sm:$0xff] }
 0x1cd   :  { %v1629_v42 = vadd.f32 %v1627_v4, %v1615_v22  ;;  %v2311_v27 = vrot.slane %v2304_v5, %v4083_v6  ;;  %v2184_v49 = vmul.f32 %v1571_v18, %v4475_v53  ;;  %v2185_v55 = vmul.f32 %v1572_v40, %v4475_v53 }
 0x1ce   :  { %v1971_v48 = vadd.f32 %v1969_v45, %v1957_v9  ;;  %v1846_v50 = vcombine.low %v1842_v7, %v1843_v46  ;;  %v2526_v33 = vmul.f32 %v1571_v18, %v4478_v54  ;;  %v2527_v16 = vmul.f32 %v1572_v40, %v4478_v54  ;;  %v1517_v18 = vpop.permute.xlu0 %1516  ;;  %v6591_v45 = vld [vmem:[#allocation52_spill] sm:$0xff] }
 0x1cf   :  { %v2313_v41 = vadd.f32 %v2311_v27, %v2299_v19  ;;  %v2188_v24 = vcombine.low %v2184_v49, %v2185_v55  ;;  %v1459_v21 = vsel %vm249_vm0, %v5072_v11, %v1458_v28  ;;  %v1460_v22 = vsel %vm249_vm0, %v1458_v28, %v5072_v11  ;;  %v6590_v19 = vld [vmem:[#allocation50_spill] sm:$0xff]  ;;  %v1464_v49 = vpop.permute.xlu1 %1463 }
 0x1d0   :  { %v1853_v13 = vrot.slane %v1846_v50, %v4083_v6  ;;  %v2530_v8 = vcombine.low %v2526_v33, %v2527_v16  ;;  %v1630_v9 = vmul.f32 %v1459_v21, %v6589_v20  ;;  %v1631_v36 = vmul.f32 %v1460_v22, %v6589_v20 }
 0x1d1   :  { %v2195_v40 = vrot.slane %v2188_v24, %v4083_v6  ;;  %v1972_v4 = vmul.f32 %v1459_v21, %v6590_v19  ;;  %v1973_v5 = vmul.f32 %v1460_v22, %v6590_v19  ;;  %v2314_v7 = vmul.f32 %v1459_v21, %v6591_v45 }
 0x1d2   :  { %v5173_v46 = vadd.f32 %v1853_v13, %v1841_v38  ;;  %v2537_v11 = vrot.slane %v2530_v8, %v4083_v6  ;;  %v1634_v28 = vcombine.low %v1630_v9, %v1631_v36  ;;  %v2315_v27 = vmul.f32 %v1460_v22, %v6591_v45 }
 0x1d3   :  { %v5177_v55 = vadd.f32 %v2195_v40, %v2183_v26  ;;  %v1976_v50 = vcombine.low %v1972_v4, %v1973_v5  ;;  %v1518_v33 = vsel %vm249_vm0, %v5076_v51, %v1517_v18  ;;  %v1519_v16 = vsel %vm249_vm0, %v1517_v18, %v5076_v51 }
 0x1d4   :  { %v5186_v38 = vadd.f32 %v2537_v11, %v5120_v43  ;;  %v1641_v24 = vrot.slane %v1634_v28, %v4083_v6  ;;  %v2318_v21 = vcombine.low %v2314_v7, %v2315_v27  ;;  %v1743_v22 = vmul.f32 %v1518_v33, %v4495_v58 }
 0x1d5   :  { %v1983_v26 = vrot.slane %v1976_v50, %v4083_v6  ;;  %v1744_v13 = vmul.f32 %v1519_v16, %v4495_v58  ;;  %v2085_v8 = vmul.f32 %v1518_v33, %v4498_v59  ;;  %v2086_v9 = vmul.f32 %v1519_v16, %v4498_v59  ;;  %v6603_v59 = vld [vmem:[#allocation87_spill] sm:$0xff] }
 0x1d6   :  { %v1643_v36 = vadd.f32 %v1641_v24, %v1629_v42  ;;  %v2325_v40 = vrot.slane %v2318_v21, %v4083_v6  ;;  %v2427_v51 = vmul.f32 %v1518_v33, %v4501_v60  ;;  %v2428_v43 = vmul.f32 %v1519_v16, %v4501_v60  ;;  %v6592_v42 = vld [vmem:[#allocation53_spill] sm:$0xff]  ;;  %v1576_v24 = vpop.permute.xlu0 %1575  ;;  %v1470_v21 = vpop.permute.xlu1 %1469 }
 0x1d7   :  { %v1985_v18 = vadd.f32 %v1983_v26, %v1971_v48  ;;  %v1747_v4 = vcombine.low %v1743_v22, %v1744_v13  ;;  %v2089_v5 = vcombine.low %v2085_v8, %v2086_v9  ;;  %v1465_v7 = vsel %vm256_vm1, %v5074_v10, %v1464_v49  ;;  %v6593_v22 = vld [vmem:[#allocation54_spill] sm:$0xff]  ;;  %v6594_v8 = vld [vmem:[#allocation55_spill] sm:$0xff] }
 0x1d8   :  { %v2327_v11 = vadd.f32 %v2325_v40, %v2313_v41  ;;  %v2431_v28 = vcombine.low %v2427_v51, %v2428_v43  ;;  %v1466_v27 = vsel %vm256_vm1, %v1464_v49, %v5074_v10  ;;  %v1644_v50 = vmul.f32 %v1465_v7, %v6592_v42 }
 0x1d9   :  { %v1754_v33 = vrot.slane %v1747_v4, %v4083_v6  ;;  %v2096_v48 = vrot.slane %v2089_v5, %v4083_v6  ;;  %v1645_v16 = vmul.f32 %v1466_v27, %v6592_v42  ;;  %v1986_v26 = vmul.f32 %v1465_v7, %v6593_v22 }
 0x1da   :  { %v2438_v13 = vrot.slane %v2431_v28, %v4083_v6  ;;  %v1987_v41 = vmul.f32 %v1466_v27, %v6593_v22  ;;  %v2328_v9 = vmul.f32 %v1465_v7, %v6594_v8  ;;  %v2329_v10 = vmul.f32 %v1466_v27, %v6594_v8 }
 0x1db   :  { %v5213_v49 = vadd.f32 %v1754_v33, %v5145_v12  ;;  %v5216_v40 = vadd.f32 %v2096_v48, %v5147_v15  ;;  %v1648_v51 = vcombine.low %v1644_v50, %v1645_v16  ;;  %v1577_v43 = vsel %vm249_vm0, %v5080_v23, %v1576_v24 }
 0x1dc   :  { %v5222_v4 = vadd.f32 %v2438_v13, %v5150_v14  ;;  %v1990_v5 = vcombine.low %v1986_v26, %v1987_v41  ;;  %v2332_v28 = vcombine.low %v2328_v9, %v2329_v10  ;;  %v1578_v7 = vsel %vm249_vm0, %v1576_v24, %v5080_v23  ;;  %v1523_v26 = vpop.permute.xlu0 %1522  ;;  %v1476_v13 = vpop.permute.xlu1 %1475 }
 0x1dd   :  { %v1655_v12 = vrot.slane %v1648_v51, %v4083_v6  ;;  %v1856_v27 = vmul.f32 %v1577_v43, %v4506_v61  ;;  %v1857_v15 = vmul.f32 %v1578_v7, %v4506_v61  ;;  %v2198_v50 = vmul.f32 %v1577_v43, %v4509_v62 }
 0x1de   :  { %v1997_v33 = vrot.slane %v1990_v5, %v4083_v6  ;;  %v2339_v48 = vrot.slane %v2332_v28, %v4083_v6  ;;  %v2199_v14 = vmul.f32 %v1578_v7, %v4509_v62  ;;  %v2540_v16 = vmul.f32 %v1577_v43, %v4512_v63 }
 0x1df   :  { %v1657_v41 = vadd.f32 %v1655_v12, %v1643_v36  ;;  %v1860_v23 = vcombine.low %v1856_v27, %v1857_v15  ;;  %v2541_v24 = vmul.f32 %v1578_v7, %v4512_v63  ;;  %v1471_v9 = vsel %vm263_vm3, %v5078_v3, %v1470_v21 }
 0x1e0   :  { %v1999_v10 = vadd.f32 %v1997_v33, %v1985_v18  ;;  %v2341_v51 = vadd.f32 %v2339_v48, %v2327_v11  ;;  %v2202_v61 = vcombine.low %v2198_v50, %v2199_v14  ;;  %v1472_v5 = vsel %vm263_vm3, %v1470_v21, %v5078_v3  ;;  %v6595_v18 = vld [vmem:[#allocation58_spill] sm:$0xff] }
 0x1e1   :  { %v1867_v28 = vrot.slane %v1860_v23, %v4083_v6  ;;  %v2544_v43 = vcombine.low %v2540_v16, %v2541_v24  ;;  %v1658_v62 = vmul.f32 %v1471_v9, %v4393_v31  ;;  %v1659_v36 = vmul.f32 %v1472_v5, %v4393_v31  ;;  %v1582_v16 = vpop.permute.xlu0 %1581 }
 0x1e2   :  { %v2209_v7 = vrot.slane %v2202_v61, %v4083_v6  ;;  %v2000_v12 = vmul.f32 %v1471_v9, %v4396_v32  ;;  %v2001_v27 = vmul.f32 %v1472_v5, %v4396_v32  ;;  %v2342_v11 = vmul.f32 %v1471_v9, %v6595_v18 }
 0x1e3   :  { %v5250_v15 = vadd.f32 %v1867_v28, %v5173_v46  ;;  %v2551_v3 = vrot.slane %v2544_v43, %v4083_v6  ;;  %v1662_v21 = vcombine.low %v1658_v62, %v1659_v36  ;;  %v2343_v50 = vmul.f32 %v1472_v5, %v6595_v18  ;;  %v1535_v46 = vpop.permute.xlu1 %1534 }
 0x1e4   :  { %v5255_v33 = vadd.f32 %v2209_v7, %v5177_v55  ;;  %v2004_v48 = vcombine.low %v2000_v12, %v2001_v27  ;;  %v1524_v61 = vsel %vm256_vm1, %v5084_v56, %v1523_v26  ;;  %v1525_v14 = vsel %vm256_vm1, %v1523_v26, %v5084_v56 }
 0x1e5   :  { %v5264_v23 = vadd.f32 %v2551_v3, %v5186_v38  ;;  %v1669_v62 = vrot.slane %v1662_v21, %v4083_v6  ;;  %v2346_v24 = vcombine.low %v2342_v11, %v2343_v50  ;;  %v1757_v55 = vmul.f32 %v1524_v61, %v4515_v0 }
 0x1e6   :  { %v2011_v9 = vrot.slane %v2004_v48, %v4083_v6  ;;  %v1758_v5 = vmul.f32 %v1525_v14, %v4515_v0  ;;  %v2099_v28 = vmul.f32 %v1524_v61, %v4520_v1  ;;  %v2100_v43 = vmul.f32 %v1525_v14, %v4520_v1 }
 0x1e7   :  { %v1671_v36 = vadd.f32 %v1669_v62, %v1657_v41  ;;  %v2353_v56 = vrot.slane %v2346_v24, %v4083_v6  ;;  %v2441_v26 = vmul.f32 %v1524_v61, %v4523_v2  ;;  %v2442_v38 = vmul.f32 %v1525_v14, %v4523_v2  ;;  %v1529_v62 = vpop.permute.xlu0 %1528  ;;  %v1594_v24 = vpop.permute.xlu1 %1593 }
 0x1e8   :  { %v2013_v7 = vadd.f32 %v2011_v9, %v1999_v10  ;;  %v1761_v12 = vcombine.low %v1757_v55, %v1758_v5  ;;  %v2103_v27 = vcombine.low %v2099_v28, %v2100_v43  ;;  %v1477_v11 = vsel %vm270_vm4, %v5082_v57, %v1476_v13 }
 0x1e9   :  { %v2355_v3 = vadd.f32 %v2353_v56, %v2341_v51  ;;  %v2445_v21 = vcombine.low %v2441_v26, %v2442_v38  ;;  %v1478_v50 = vsel %vm270_vm4, %v1476_v13, %v5082_v57  ;;  %v1672_v41 = vmul.f32 %v1477_v11, %v4404_v34 }
 0x1ea   :  { %v1768_v48 = vrot.slane %v1761_v12, %v4083_v6  ;;  %v2110_v61 = vrot.slane %v2103_v27, %v4083_v6  ;;  %v1673_v10 = vmul.f32 %v1478_v50, %v4404_v34  ;;  %v2014_v14 = vmul.f32 %v1477_v11, %v4407_v35 }
 0x1eb   :  { %v2452_v55 = vrot.slane %v2445_v21, %v4083_v6  ;;  %v2015_v51 = vmul.f32 %v1478_v50, %v4407_v35  ;;  %v2356_v9 = vmul.f32 %v1477_v11, %v4415_v37  ;;  %v2357_v57 = vmul.f32 %v1478_v50, %v4415_v37  ;;  %v6596_v11 = vld [vmem:[#allocation84_spill] sm:$0xff] }
 0x1ec   :  { %v5291_v13 = vadd.f32 %v1768_v48, %v5213_v49  ;;  %v5294_v5 = vadd.f32 %v2110_v61, %v5216_v40  ;;  %v1676_v28 = vcombine.low %v1672_v41, %v1673_v10  ;;  %v1583_v43 = vsel %vm256_vm1, %v5088_v47, %v1582_v16  ;;  %v6597_v48 = vld [vmem:[#allocation85_spill] sm:$0xff] }
 0x1ed   :  { %v5300_v56 = vadd.f32 %v2452_v55, %v5222_v4  ;;  %v2018_v26 = vcombine.low %v2014_v14, %v2015_v51  ;;  %v2360_v38 = vcombine.low %v2356_v9, %v2357_v57  ;;  %v1584_v12 = vsel %vm256_vm1, %v1582_v16, %v5088_v47  ;;  %v1588_v55 = vpop.permute.xlu0 %1587  ;;  %v5319_v51 = vpop.permute.xlu1 %1481 }
 0x1ee   :  { %v1683_v49 = vrot.slane %v1676_v28, %v4083_v6  ;;  %v1870_v27 = vmul.f32 %v1583_v43, %v6525_v30  ;;  %v1871_v40 = vmul.f32 %v1584_v12, %v6525_v30  ;;  %v2212_v21 = vmul.f32 %v1583_v43, %v6596_v11 }
 0x1ef   :  { %v2025_v50 = vrot.slane %v2018_v26, %v4083_v6  ;;  %v2367_v41 = vrot.slane %v2360_v38, %v4083_v6  ;;  %v2213_v4 = vmul.f32 %v1584_v12, %v6596_v11  ;;  %v2554_v61 = vmul.f32 %v1583_v43, %v6597_v48  ;;  %v6598_v38 = vld [vmem:[#allocation92_spill] sm:$0xff] }
 0x1f0   :  { %v5313_v10 = vadd.f32 %v1683_v49, %v1671_v36  ;;  %v1874_v14 = vcombine.low %v1870_v27, %v1871_v40  ;;  %v2555_v47 = vmul.f32 %v1584_v12, %v6597_v48  ;;  %v1536_v16 = vsel %vm270_vm4, %v5086_v25, %v1535_v46  ;;  %v6599_v40 = vld [vmem:[#allocation93_spill] sm:$0xff] }
 0x1f1   :  { %v5321_v9 = vadd.f32 %v2025_v50, %v2013_v7  ;;  %v5323_v57 = vadd.f32 %v2367_v41, %v2355_v3  ;;  %v2216_v28 = vcombine.low %v2212_v21, %v2213_v4  ;;  %v1537_v36 = vsel %vm270_vm4, %v1535_v46, %v5086_v25  ;;  %v6600_v3 = vld [vmem:[#allocation94_spill] sm:$0xff]  ;;  %v6601_v25 = vld [vmem:[#allocation125_spill] sm:$0xff] }
 0x1f2   :  { %v1881_v43 = vrot.slane %v1874_v14, %v4083_v6  ;;  %v2558_v26 = vcombine.low %v2554_v61, %v2555_v47  ;;  %v1785_v12 = vmul.f32 %v1536_v16, %v6598_v38  ;;  %v1786_v49 = vmul.f32 %v1537_v36, %v6598_v38 }
 0x1f3   :  { %v2223_v27 = vrot.slane %v2216_v28, %v4083_v6  ;;  %v2127_v63 = vmul.f32 %v1536_v16, %v6599_v40  ;;  %v2128_v7 = vmul.f32 %v1537_v36, %v6599_v40  ;;  %v2469_v50 = vmul.f32 %v1536_v16, %v6600_v3  ;;  %v6602_v16 = vld [vmem:[#allocation86_spill] sm:$0xff] }
 0x1f4   :  { %v2470_v21 = vmul.f32 %v1537_v36, %v6600_v3  ;;  %v5337_v41 = vadd.f32 %v1881_v43, %v5250_v15  ;;  %v1530_v46 = vsel %vm263_vm3, %v6601_v25, %v1529_v62  ;;  %v1531_v4 = vsel %vm263_vm3, %v1529_v62, %v6601_v25  ;;  %v5350_v36 = vpop.permute.xlu0 %1538  ;;  %v5352_v15 = vpop.permute.xlu1 %1540  ;;  %v6604_v25 = vld [vmem:[#allocation88_spill] sm:$0xff] }
 0x1f5   :  { %v5346_v61 = vadd.f32 %v2223_v27, %v5255_v33  ;;  %v2565_v14 = vrot.slane %v2558_v26, %v4083_v6  ;;  %v1789_v47 = vcombine.low %v1785_v12, %v1786_v49  ;;  %v1771_v28 = vmul.f32 %v1530_v46, %v6602_v16  ;;  %v6605_v26 = vld [vmem:[#allocation124_spill] sm:$0xff] }
 0x1f6   :  { %v2131_v43 = vcombine.low %v2127_v63, %v2128_v7  ;;  %v1772_v60 = vmul.f32 %v1531_v4, %v6602_v16  ;;  %v2113_v58 = vmul.f32 %v1530_v46, %v6603_v59  ;;  %v2114_v54 = vmul.f32 %v1531_v4, %v6603_v59  ;;  %v6606_v7 = vld [vmem:[#allocation95_spill] sm:$0xff] }
 0x1f7   :  { %v2473_v62 = vcombine.low %v2469_v50, %v2470_v21  ;;  %v2455_v33 = vmul.f32 %v1530_v46, %v6604_v25  ;;  %v2456_v27 = vmul.f32 %v1531_v4, %v6604_v25  ;;  %v1595_v12 = vsel %vm270_vm4, %v6605_v26, %v1594_v24  ;;  %v6607_v50 = vld [vmem:[#allocation96_spill] sm:$0xff] }
 0x1f8   :  { %v1775_v49 = vcombine.low %v1771_v28, %v1772_v60  ;;  %v2117_v53 = vcombine.low %v2113_v58, %v2114_v54  ;;  %v1596_v63 = vsel %vm270_vm4, %v1594_v24, %v6605_v26  ;;  %v1898_v52 = vmul.f32 %v1595_v12, %v6606_v7  ;;  %v5381_v26 = vpop.permute.xlu0 %1597 }
 0x1f9   :  { %v2459_v3 = vcombine.low %v2455_v33, %v2456_v27  ;;  %v1899_v40 = vmul.f32 %v1596_v63, %v6606_v7  ;;  %v2240_v21 = vmul.f32 %v1595_v12, %v6607_v50  ;;  %v2241_v46 = vmul.f32 %v1596_v63, %v6607_v50  ;;  %v6608_v33 = vld [vmem:[#allocation127_spill] sm:$0xff]  ;;  %v6610_v7 = vld [vmem:[#allocation89_spill] sm:$0xff] }
 0x1fa   :  { %v5370_v4 = vadd.f32 %v2565_v14, %v5264_v23  ;;  %v1796_v38 = vrot.slane %v1789_v47, %v4083_v6  ;;  %v1782_v54 = vrot.slane %v1775_v49, %v4083_v6  ;;  %v2124_v58 = vrot.slane %v2117_v53, %v4083_v6  ;;  %v5383_v23 = vpop.permute.xlu1 %1599  ;;  %v6609_v47 = vld [vmem:[#allocation97_spill] sm:$0xff] }
 0x1fb   :  { %v2138_v60 = vrot.slane %v2131_v43, %v4083_v6  ;;  %v2480_v24 = vrot.slane %v2473_v62, %v4083_v6  ;;  %v2466_v28 = vrot.slane %v2459_v3, %v4083_v6  ;;  %v1589_v27 = vsel %vm263_vm3, %v6608_v33, %v1588_v55 }
 0x1fc   :  { %v1902_v14 = vcombine.low %v1898_v52, %v1899_v40  ;;  %v2582_v50 = vmul.f32 %v1595_v12, %v6609_v47  ;;  %v2583_v49 = vmul.f32 %v1596_v63, %v6609_v47  ;;  %v1590_v53 = vsel %vm263_vm3, %v1588_v55, %v6608_v33  ;;  %v6611_v52 = vld [vmem:[#allocation90_spill] sm:$0xff]  ;;  %v6612_v63 = vld [vmem:[#allocation91_spill] sm:$0xff] }
 0x1fd   :  { %v1784_v43 = vadd.f32 %v1782_v54, %v5291_v13  ;;  %v2126_v3 = vadd.f32 %v2124_v58, %v5294_v5  ;;  %v2244_v62 = vcombine.low %v2240_v21, %v2241_v46  ;;  %v1884_v37 = vmul.f32 %v1589_v27, %v6610_v7  ;;  %v6613_v55 = vld [vmem:[#allocation126_spill] sm:$0xff]  ;;  %v6614_v46 = vld [vmem:[#allocation63_spill] sm:$0xff] }
 0x1fe   :  { %v2468_v35 = vadd.f32 %v2466_v28, %v5300_v56  ;;  %v1885_v34 = vmul.f32 %v1590_v53, %v6610_v7  ;;  %v2226_v40 = vmul.f32 %v1589_v27, %v6611_v52  ;;  %v2227_v12 = vmul.f32 %v1590_v53, %v6611_v52  ;;  %v6615_v33 = vld [vmem:[#allocation66_spill] sm:$0xff]  ;;  %v1486_v7 = vpop.permute.xlu0 %1485  ;;  %v1488_v59 = vpop.permute.xlu1 %1487 }
 0x1ff   :  { %v2568_v47 = vmul.f32 %v1589_v27, %v6612_v63  ;;  %v2569_v25 = vmul.f32 %v1590_v53, %v6612_v63  ;;  %v1483_v13 = vsel %vm277_vm5, %v6613_v55, %v5319_v51  ;;  %v1484_v5 = vsel %vm277_vm5, %v5319_v51, %v6613_v55  ;;  %v6616_v63 = vld [vmem:[#allocation67_spill] sm:$0xff] }
 0x200   :  { %v1888_v56 = vcombine.low %v1884_v37, %v1885_v34  ;;  %v2230_v21 = vcombine.low %v2226_v40, %v2227_v12  ;;  %v1686_v54 = vmul.f32 %v1483_v13, %v6614_v46  ;;  %v1687_v58 = vmul.f32 %v1484_v5, %v6614_v46 }
 0x201   :  { %v2572_v28 = vcombine.low %v2568_v47, %v2569_v25  ;;  %v2028_v27 = vmul.f32 %v1483_v13, %v6615_v33  ;;  %v2029_v53 = vmul.f32 %v1484_v5, %v6615_v33  ;;  %v2370_v52 = vmul.f32 %v1483_v13, %v6616_v63 }
 0x202   :  { %v2586_v16 = vcombine.low %v2582_v50, %v2583_v49  ;;  %v1895_v48 = vrot.slane %v1888_v56, %v4083_v6  ;;  %v1690_v18 = vcombine.low %v1686_v54, %v1687_v58  ;;  %v2371_v34 = vmul.f32 %v1484_v5, %v6616_v63  ;;  %v1545_v56 = vpop.permute.xlu0 %1544  ;;  %v6619_v54 = vld [vmem:[#allocation100_spill] sm:$0xff] }
 0x203   :  { %v1909_v37 = vrot.slane %v1902_v14, %v4083_v6  ;;  %v2032_v51 = vcombine.low %v2028_v27, %v2029_v53  ;;  %v1798_v40 = vadd.f32 %v1796_v38, %v1784_v43  ;;  %v2140_v12 = vadd.f32 %v2138_v60, %v2126_v3  ;;  %v6617_v3 = vld [vmem:[#allocation98_spill] sm:$0xff] }
 0x204   :  { %v2251_v25 = vrot.slane %v2244_v62, %v4083_v6  ;;  %v2237_v47 = vrot.slane %v2230_v21, %v4083_v6  ;;  %v2579_v55 = vrot.slane %v2572_v28, %v4083_v6  ;;  %v2374_v13 = vcombine.low %v2370_v52, %v2371_v34  ;;  %v1547_v21 = vpop.permute.xlu1 %1546 }
 0x205   :  { %v1697_v33 = vrot.slane %v1690_v18, %v4083_v6  ;;  %v2039_v50 = vrot.slane %v2032_v51, %v4083_v6  ;;  %v2482_v49 = vadd.f32 %v2480_v24, %v2468_v35  ;;  %v1542_v14 = vsel %vm277_vm5, %v5350_v36, %v5352_v15  ;;  %v6618_v24 = vld [vmem:[#allocation99_spill] sm:$0xff] }
 0x206   :  { %v1897_v38 = vadd.f32 %v1895_v48, %v5337_v41  ;;  %v2381_v60 = vrot.slane %v2374_v13, %v4083_v6  ;;  %v1543_v43 = vsel %vm277_vm5, %v5352_v15, %v5350_v36  ;;  %v1799_v62 = vmul.f32 %v1542_v14, %v6617_v3 }
 0x207   :  { %v2593_v18 = vrot.slane %v2586_v16, %v4083_v6  ;;  %v1800_v35 = vmul.f32 %v1543_v43, %v6617_v3  ;;  %v2141_v52 = vmul.f32 %v1542_v14, %v6618_v24  ;;  %v2142_v5 = vmul.f32 %v1543_v43, %v6618_v24 }
 0x208   :  { %v2239_v48 = vadd.f32 %v2237_v47, %v5346_v61  ;;  %v2581_v41 = vadd.f32 %v2579_v55, %v5370_v4  ;;  %v2483_v58 = vmul.f32 %v1542_v14, %v6619_v54  ;;  %v2484_v36 = vmul.f32 %v1543_v43, %v6619_v54  ;;  %v1604_v43 = vpop.permute.xlu0 %1603 }
 0x209   :  { %v5440_v15 = vadd.f32 %v1697_v33, %v5313_v10  ;;  %v5443_v16 = vadd.f32 %v2039_v50, %v5321_v9  ;;  %v1803_v28 = vcombine.low %v1799_v62, %v1800_v35  ;;  %v2145_v27 = vcombine.low %v2141_v52, %v2142_v5  ;;  %v6620_v33 = vld [vmem:[#allocation101_spill] sm:$0xff]  ;;  %v6622_v50 = vld [vmem:[#allocation103_spill] sm:$0xff]  ;;  %v1606_v62 = vpop.permute.xlu1 %1605  ;;  %v6623_v5 = vld [vmem:[#allocation104_spill] sm:$0xff] }
 0x20a   :  { %v5446_v53 = vadd.f32 %v2381_v60, %v5323_v57  ;;  %v1911_v34 = vadd.f32 %v1909_v37, %v1897_v38  ;;  %v1601_v61 = vsel %vm277_vm5, %v5381_v26, %v5383_v23  ;;  %v1602_v10 = vsel %vm277_vm5, %v5383_v23, %v5381_v26  ;;  %v6621_v37 = vld [vmem:[#allocation102_spill] sm:$0xff] }
 0x20b   :  { %v2487_v4 = vcombine.low %v2483_v58, %v2484_v36  ;;  %v1912_v9 = vmul.f32 %v1601_v61, %v6620_v33  ;;  %v1913_v51 = vmul.f32 %v1602_v10, %v6620_v33  ;;  %v1489_v57 = vsel %vm284_vm6, %v1486_v7, %v1488_v59 }
 0x20c   :  { %v2253_v47 = vadd.f32 %v2251_v25, %v2239_v48  ;;  %v2254_v55 = vmul.f32 %v1601_v61, %v6621_v37  ;;  %v2255_v13 = vmul.f32 %v1602_v10, %v6621_v37  ;;  %v2596_v14 = vmul.f32 %v1601_v61, %v6622_v50 }
 0x20d   :  { %v1810_v38 = vrot.slane %v1803_v28, %v4083_v6  ;;  %v2152_v60 = vrot.slane %v2145_v27, %v4083_v6  ;;  %v1916_v26 = vcombine.low %v1912_v9, %v1913_v51  ;;  %v2597_v23 = vmul.f32 %v1602_v10, %v6622_v50  ;;  %v6624_v28 = vld [vmem:[#allocation105_spill] sm:$0xff]  ;;  %v6625_v9 = vld [vmem:[#allocation106_spill] sm:$0xff] }
 0x20e   :  { %v2595_v35 = vadd.f32 %v2593_v18, %v2581_v41  ;;  %v2258_v52 = vcombine.low %v2254_v55, %v2255_v13  ;;  %v1490_v25 = vsel %vm284_vm6, %v1488_v59, %v1486_v7  ;;  %v1700_v48 = vmul.f32 %v1489_v57, %v6623_v5 }
 0x20f   :  { %v2494_v58 = vrot.slane %v2487_v4, %v4083_v6  ;;  %v2600_v36 = vcombine.low %v2596_v14, %v2597_v23  ;;  %v1701_v61 = vmul.f32 %v1490_v25, %v6623_v5  ;;  %v2042_v37 = vmul.f32 %v1489_v57, %v6624_v28  ;;  %v6626_v5 = vld [vmem:[#allocation107_spill] sm:$0xff] }
 0x210   :  { %v1923_v27 = vrot.slane %v1916_v26, %v4083_v6  ;;  %v2043_v10 = vmul.f32 %v1490_v25, %v6624_v28  ;;  %v2384_v51 = vmul.f32 %v1489_v57, %v6625_v9  ;;  %v2385_v18 = vmul.f32 %v1490_v25, %v6625_v9 }
 0x211   :  { %v1812_v41 = vadd.f32 %v1810_v38, %v1798_v40  ;;  %v2154_v55 = vadd.f32 %v2152_v60, %v2140_v12  ;;  %v1704_v59 = vcombine.low %v1700_v48, %v1701_v61  ;;  %v1548_v7 = vsel %vm284_vm6, %v1545_v56, %v1547_v21  ;;  %v1492_v40 = vpop.permute.xlu0 %1491  ;;  %v1494_v12 = vpop.permute.xlu1 %1493  ;;  %v6627_v48 = vld [vmem:[#allocation108_spill] sm:$0xff] }
 0x212   :  { %v2265_v4 = vrot.slane %v2258_v52, %v4083_v6  ;;  %v2607_v13 = vrot.slane %v2600_v36, %v4083_v6  ;;  %v2046_v14 = vcombine.low %v2042_v37, %v2043_v10  ;;  %v1549_v26 = vsel %vm284_vm6, %v1547_v21, %v1545_v56  ;;  %v6628_v10 = vld [vmem:[#allocation109_spill] sm:$0xff] }
 0x213   :  { %v2496_v23 = vadd.f32 %v2494_v58, %v2482_v49  ;;  %v2388_v28 = vcombine.low %v2384_v51, %v2385_v18  ;;  %v1813_v57 = vmul.f32 %v1548_v7, %v6626_v5  ;;  %v1814_v25 = vmul.f32 %v1549_v26, %v6626_v5 }
 0x214   :  { %v1925_v38 = vadd.f32 %v1923_v27, %v1911_v34  ;;  %v1711_v60 = vrot.slane %v1704_v59, %v4083_v6  ;;  %v2155_v61 = vmul.f32 %v1548_v7, %v6627_v48  ;;  %v2156_v52 = vmul.f32 %v1549_v26, %v6627_v48 }
 0x215   :  { %v2053_v37 = vrot.slane %v2046_v14, %v4083_v6  ;;  %v1817_v36 = vcombine.low %v1813_v57, %v1814_v25  ;;  %v2497_v56 = vmul.f32 %v1548_v7, %v6628_v10  ;;  %v2498_v49 = vmul.f32 %v1549_v26, %v6628_v10  ;;  %v6629_v14 = vld [vmem:[#allocation110_spill] sm:$0xff] }
 0x216   :  { %v5490_v21 = vadd.f32 %v2265_v4, %v2253_v47  ;;  %v5492_v58 = vadd.f32 %v2607_v13, %v2595_v35  ;;  %v2159_v51 = vcombine.low %v2155_v61, %v2156_v52  ;;  %v1607_v34 = vsel %vm284_vm6, %v1604_v43, %v1606_v62  ;;  %v6630_v47 = vld [vmem:[#allocation111_spill] sm:$0xff]  ;;  %v6631_v61 = vld [vmem:[#allocation112_spill] sm:$0xff] }
 0x217   :  { %v2395_v27 = vrot.slane %v2388_v28, %v4083_v6  ;;  %v2501_v18 = vcombine.low %v2497_v56, %v2498_v49  ;;  %v1608_v59 = vsel %vm284_vm6, %v1606_v62, %v1604_v43  ;;  %v1926_v57 = vmul.f32 %v1607_v34, %v6629_v14  ;;  %v1551_v56 = vpop.permute.xlu0 %1550  ;;  %v1553_v43 = vpop.permute.xlu1 %1552 }
 0x218   :  { %v1824_v7 = vrot.slane %v1817_v36, %v4083_v6  ;;  %v1927_v26 = vmul.f32 %v1608_v59, %v6629_v14  ;;  %v2268_v4 = vmul.f32 %v1607_v34, %v6630_v47  ;;  %v2269_v35 = vmul.f32 %v1608_v59, %v6630_v47 }
 0x219   :  { %v1713_v13 = vadd.f32 %v1711_v60, %v5440_v15  ;;  %v2055_v25 = vadd.f32 %v2053_v37, %v5443_v16  ;;  %v2610_v28 = vmul.f32 %v1607_v34, %v6631_v61  ;;  %v2611_v52 = vmul.f32 %v1608_v59, %v6631_v61  ;;  %v6632_v16 = vld [vmem:[#allocation113_spill] sm:$0xff]  ;;  %v6633_v61 = vld [vmem:[#allocation114_spill] sm:$0xff] }
 0x21a   :  { %v2166_v62 = vrot.slane %v2159_v51, %v4083_v6  ;;  %v2508_v36 = vrot.slane %v2501_v18, %v4083_v6  ;;  %v1930_v49 = vcombine.low %v1926_v57, %v1927_v26  ;;  %v1495_v14 = vsel %vm291_vm7, %v1492_v40, %v1494_v12  ;;  %v6634_v26 = vld [vmem:[#allocation115_spill] sm:$0xff] }
 0x21b   :  { %v2397_v47 = vadd.f32 %v2395_v27, %v5446_v53  ;;  %v2272_v10 = vcombine.low %v2268_v4, %v2269_v35  ;;  %v1496_v15 = vsel %vm291_vm7, %v1494_v12, %v1492_v40  ;;  %v1714_v60 = vmul.f32 %v1495_v14, %v6632_v16 }
 0x21c   :  { %v1826_v37 = vadd.f32 %v1824_v7, %v1812_v41  ;;  %v2614_v34 = vcombine.low %v2610_v28, %v2611_v52  ;;  %v1715_v59 = vmul.f32 %v1496_v15, %v6632_v16  ;;  %v2056_v51 = vmul.f32 %v1495_v14, %v6633_v61  ;;  %v1610_v52 = vpop.permute.xlu0 %1609 }
 0x21d   :  { %v1937_v18 = vrot.slane %v1930_v49, %v4083_v6  ;;  %v2057_v57 = vmul.f32 %v1496_v15, %v6633_v61  ;;  %v2398_v48 = vmul.f32 %v1495_v14, %v6634_v26  ;;  %v2399_v53 = vmul.f32 %v1496_v15, %v6634_v26  ;;  %v1612_v49 = vpop.permute.xlu1 %1611  ;;  %v6635_v14 = vld [vmem:[#allocation116_spill] sm:$0xff] }
 0x21e   :  { %v2168_v27 = vadd.f32 %v2166_v62, %v2154_v55  ;;  %v2510_v4 = vadd.f32 %v2508_v36, %v2496_v23  ;;  %v1718_v35 = vcombine.low %v1714_v60, %v1715_v59  ;;  %v1554_v40 = vsel %vm291_vm7, %v1551_v56, %v1553_v43  ;;  %v6636_v23 = vld [vmem:[#allocation117_spill] sm:$0xff]  ;;  %v6637_v60 = vld [vmem:[#allocation118_spill] sm:$0xff] }
 0x21f   :  { %v2279_v41 = vrot.slane %v2272_v10, %v4083_v6  ;;  %v2060_v12 = vcombine.low %v2056_v51, %v2057_v57  ;;  %v2402_v7 = vcombine.low %v2398_v48, %v2399_v53  ;;  %v1555_v28 = vsel %vm291_vm7, %v1553_v43, %v1551_v56 }
 0x220   :  { %v1725_v61 = vrot.slane %v1718_v35, %v4083_v6  ;;  %v1827_v16 = vmul.f32 %v1554_v40, %v6635_v14  ;;  %v1828_v55 = vmul.f32 %v1555_v28, %v6635_v14  ;;  %v2169_v62 = vmul.f32 %v1554_v40, %v6636_v23 }
 0x221   :  { %v1939_v36 = vadd.f32 %v1937_v18, %v1925_v38  ;;  %v2621_v15 = vrot.slane %v2614_v34, %v4083_v6  ;;  %v2170_v10 = vmul.f32 %v1555_v28, %v6636_v23  ;;  %v2511_v48 = vmul.f32 %v1554_v40, %v6637_v60  ;;  %v6638_v23 = vld [vmem:[#allocation119_spill] sm:$0xff] }
 0x222   :  { %v2067_v59 = vrot.slane %v2060_v12, %v4083_v6  ;;  %v1831_v56 = vcombine.low %v1827_v16, %v1828_v55  ;;  %v2512_v43 = vmul.f32 %v1555_v28, %v6637_v60  ;;  %v1613_v51 = vsel %vm291_vm7, %v1610_v52, %v1612_v49  ;;  %v6639_v28 = vld [vmem:[#allocation120_spill] sm:$0xff] }
 0x223   :  { %v1727_v57 = vadd.f32 %v1725_v61, %v1713_v13  ;;  %v2409_v53 = vrot.slane %v2402_v7, %v4083_v6  ;;  %v2173_v35 = vcombine.low %v2169_v62, %v2170_v10  ;;  %v1614_v38 = vsel %vm291_vm7, %v1612_v49, %v1610_v52  ;;  %v6640_v13 = vld [vmem:[#allocation121_spill] sm:$0xff] }
 0x224   :  { %v1838_v34 = vrot.slane %v1831_v56, %v4083_v6  ;;  %v2515_v18 = vcombine.low %v2511_v48, %v2512_v43  ;;  %v1940_v40 = vmul.f32 %v1613_v51, %v6638_v23  ;;  %v1941_v12 = vmul.f32 %v1614_v38, %v6638_v23 }
 0x225   :  { %v2180_v16 = vrot.slane %v2173_v35, %v4083_v6  ;;  %v2282_v55 = vmul.f32 %v1613_v51, %v6639_v28  ;;  %v2283_v60 = vmul.f32 %v1614_v38, %v6639_v28  ;;  %v2624_v61 = vmul.f32 %v1613_v51, %v6640_v13 }
 0x226   :  { %v1840_v7 = vadd.f32 %v1838_v34, %v1826_v37  ;;  %v2522_v62 = vrot.slane %v2515_v18, %v4083_v6  ;;  %v1944_v10 = vcombine.low %v1940_v40, %v1941_v12  ;;  %v2625_v52 = vmul.f32 %v1614_v38, %v6640_v13 }
 0x227   :  { %v2069_v49 = vadd.f32 %v2067_v59, %v2055_v25  ;;  %v2411_v48 = vadd.f32 %v2409_v53, %v2397_v47  ;;  %v2182_v56 = vadd.f32 %v2180_v16, %v2168_v27  ;;  %v2286_v43 = vcombine.low %v2282_v55, %v2283_v60  ;;  %v6641_v47 = vld [vmem:[#allocation122_spill] sm:$0xff]  ;;  %v6642_v59 = vld [vmem:[#allocation83_spill] sm:$0xff] }
 0x228   :  { %v1954_v14 = vadd.f32 %v1840_v7, %v1727_v57  ;;  %v2524_v23 = vadd.f32 %v2522_v62, %v2510_v4  ;;  %v1951_v35 = vrot.slane %v1944_v10, %v4083_v6  ;;  %v2628_v26 = vcombine.low %v2624_v61, %v2625_v52  ;;  %v6643_v53 = vld [vmem:[#allocation123_spill] sm:$0xff] }
 0x229   :  { %v2281_v5 = vadd.f32 %v2279_v41, %v5490_v21  ;;  %v2296_v28 = vadd.f32 %v2182_v56, %v2069_v49  ;;  %v2293_v51 = vrot.slane %v2286_v43, %v4083_v6  ;;  %v2623_v37 = vadd.f32 %v2621_v15, %v5492_v58 }
 0x22a   :  { %v2638_v34 = vadd.f32 %v2524_v23, %v2411_v48  ;;  %v1953_v18 = vadd.f32 %v1951_v35, %v1939_v36  ;;  %v2635_v38 = vrot.slane %v2628_v26, %v4083_v6 }
 0x22b   :  { %v2295_v25 = vadd.f32 %v2293_v51, %v2281_v5 }
 0x22c   :  { %v1955_v27 = vadd.f32 %v1953_v18, %v6641_v47  ;;  %v2637_v60 = vadd.f32 %v2635_v38, %v2623_v37  ;;  %v6644_v38 = vld [vmem:[#allocation47_spill] sm:$0xff] }
 0x22d   :  { %v2297_v4 = vadd.f32 %v2295_v25, %v6642_v59 }
 0x22e   :  { %v5557_v57 = vadd.f32 %v1955_v27, %v1954_v14  ;;  %v2639_v40 = vadd.f32 %v2637_v60, %v6643_v53  ;;  %v6645_v27 = vld [vmem:[#allocation48_spill] sm:$0xff] }
 0x22f   :  { %v5560_v21 = vadd.f32 %v2297_v4, %v2296_v28 }
 0x230   :  { %v5562_v41 = vadd.f32 %v2639_v40, %v2638_v34  ;;  %v2648_v58 = vrot.slane %v5557_v57, %v4083_v6  ;;  %v2818_v25 = vmul.f32 %v5557_v57, %v6644_v38  ;;  %v3160_v60 = vmul.f32 %v5557_v57, %v6645_v27 }
 0x231   :  { %v2707_v26 = vrot.slane %v5560_v21, %v4083_v6 }
 0x232   :  { %2652 = vrot.lane.b32.xlu0 %v2648_v58, %s6566_s22  ;;  %v2766_v5 = vrot.slane %v5562_v41, %v4083_v6  ;;  %v2649_v14 = vcombine.high %v2648_v58, %v2648_v58 }
 0x233   :  { %2711 = vrot.lane.b32.xlu1 %v2707_v26, %s6566_s22  ;;  %v2708_v23 = vcombine.high %v2707_v26, %v2707_v26 }
 0x234   :  { %v2767_v36 = vcombine.high %v2766_v5, %v2766_v5 }
 0x236   :  { %2658 = vrot.lane.b32.xlu0 %v2648_v58, %s6567_s23 }
 0x237   :  { %2770 = vrot.lane.b32.xlu1 %v2766_v5, %s6566_s22 }
 0x23a   :  { %2664 = vrot.lane.b32.xlu0 %v2648_v58, %s6568_s30 }
 0x23b   :  { %2717 = vrot.lane.b32.xlu1 %v2707_v26, %s6567_s23 }
 0x23e   :  { %2723 = vrot.lane.b32.xlu0 %v2707_v26, %s6568_s30 }
 0x23f   :  { %2776 = vrot.lane.b32.xlu1 %v2766_v5, %s6567_s23 }
 0x242   :  { %2782 = vrot.lane.b32.xlu0 %v2766_v5, %s6568_s30 }
 0x243   :  { %2654 = vrot.lane.b32.xlu1 %v2649_v14, %s6566_s22 }
 0x246   :  { %2670 = vrot.lane.b32.xlu0 %v2648_v58, %s6569_s4 }
 0x247   :  { %2660 = vrot.lane.b32.xlu1 %v2649_v14, %s6567_s23 }
 0x24a   :  { %2729 = vrot.lane.b32.xlu0 %v2707_v26, %s6569_s4 }
 0x24b   :  { %2666 = vrot.lane.b32.xlu1 %v2649_v14, %s6568_s30 }
 0x24e   :  { %2788 = vrot.lane.b32.xlu0 %v2766_v5, %s6569_s4 }
 0x24f   :  { %2725 = vrot.lane.b32.xlu1 %v2708_v23, %s6568_s30 }
 0x252   :  { %2676 = vrot.lane.b32.xlu0 %v2648_v58, %s6570_s9 }
 0x253   :  { %2784 = vrot.lane.b32.xlu1 %v2767_v36, %s6568_s30 }
 0x256   :  { %2735 = vrot.lane.b32.xlu0 %v2707_v26, %s6570_s9 }
 0x257   :  { %2672 = vrot.lane.b32.xlu1 %v2649_v14, %s6569_s4 }
 0x25a   :  { %2794 = vrot.lane.b32.xlu0 %v2766_v5, %s6570_s9 }
 0x25b   :  { %2731 = vrot.lane.b32.xlu1 %v2708_v23, %s6569_s4 }
 0x25e   :  { %2682 = vrot.lane.b32.xlu0 %v2648_v58, %s6571_s13 }
 0x25f   :  { %2790 = vrot.lane.b32.xlu1 %v2767_v36, %s6569_s4 }
 0x262   :  { %2741 = vrot.lane.b32.xlu0 %v2707_v26, %s6571_s13 }
 0x263   :  { %2678 = vrot.lane.b32.xlu1 %v2649_v14, %s6570_s9 }
 0x266   :  { %2800 = vrot.lane.b32.xlu0 %v2766_v5, %s6571_s13 }
 0x267   :  { %2737 = vrot.lane.b32.xlu1 %v2708_v23, %s6570_s9 }
 0x26a   :  { %2688 = vrot.lane.b32.xlu0 %v2648_v58, %s6572_s16 }
 0x26b   :  { %2796 = vrot.lane.b32.xlu1 %v2767_v36, %s6570_s9 }
 0x26e   :  { %2747 = vrot.lane.b32.xlu0 %v2707_v26, %s6572_s16 }
 0x26f   :  { %2684 = vrot.lane.b32.xlu1 %v2649_v14, %s6571_s13 }
 0x272   :  { %2806 = vrot.lane.b32.xlu0 %v2766_v5, %s6572_s16 }
 0x273   :  { %2743 = vrot.lane.b32.xlu1 %v2708_v23, %s6571_s13 }
 0x276   :  { %2713 = vrot.lane.b32.xlu0 %v2708_v23, %s6566_s22 }
 0x277   :  { %2802 = vrot.lane.b32.xlu1 %v2767_v36, %s6571_s13 }
 0x27a   :  { %2772 = vrot.lane.b32.xlu0 %v2767_v36, %s6566_s22 }
 0x27b   :  { %2690 = vrot.lane.b32.xlu1 %v2649_v14, %s6572_s16 }
 0x27e   :  { %2719 = vrot.lane.b32.xlu0 %v2708_v23, %s6567_s23 }
 0x27f   :  { %2749 = vrot.lane.b32.xlu1 %v2708_v23, %s6572_s16 }
 0x282   :  { %2778 = vrot.lane.b32.xlu0 %v2767_v36, %s6567_s23 }
 0x283   :  { %2808 = vrot.lane.b32.xlu1 %v2767_v36, %s6572_s16 }
 0x286   :  { %2694 = vrot.lane.b32.xlu0 %v2648_v58, %s6573_s14 }
 0x287   :  { %2696 = vrot.lane.b32.xlu1 %v2649_v14, %s6573_s14 }
 0x28a   :  { %2753 = vrot.lane.b32.xlu0 %v2707_v26, %s6573_s14 }
 0x28b   :  { %2755 = vrot.lane.b32.xlu1 %v2708_v23, %s6573_s14 }
 0x28e   :  { %2812 = vrot.lane.b32.xlu0 %v2766_v5, %s6573_s14 }
 0x28f   :  { %2814 = vrot.lane.b32.xlu1 %v2767_v36, %s6573_s14 }
 0x2a4   :  { %v2653_v15 = vpop.permute.xlu0 %2652 }
 0x2a5   :  { %v5618_v12 = vpop.permute.xlu1 %2711 }
 0x2a8   :  { %v2659_v16 = vpop.permute.xlu0 %2658 }
 0x2a9   :  { %v5620_v28 = vpop.permute.xlu1 %2770 }
 0x2ac   :  { %v2665_v55 = vpop.permute.xlu0 %2664 }
 0x2ad   :  { %v5622_v61 = vpop.permute.xlu1 %2717 }
 0x2b0   :  { %v2724_v7 = vpop.permute.xlu0 %2723 }
 0x2b1   :  { %v5624_v62 = vpop.permute.xlu1 %2776 }
 0x2b4   :  { %v5626_v10 = vpop.permute.xlu0 %2782 }
 0x2b5   :  { %v2655_v52 = vpop.permute.xlu1 %2654 }
 0x2b6   :  { %v2656_v49 = vsel %vm242_vm2, %v2653_v15, %v2655_v52  ;;  %v2657_v48 = vsel %vm242_vm2, %v2655_v52, %v2653_v15 }
 0x2b7   :  { %v2819_v56 = vmul.f32 %v2656_v49, %v6587_v39  ;;  %v2820_v43 = vmul.f32 %v2657_v48, %v6587_v39  ;;  %v3161_v35 = vmul.f32 %v2656_v49, %v6588_v44  ;;  %v3162_v51 = vmul.f32 %v2657_v48, %v6588_v44  ;;  %v6646_v39 = vld [vmem:[#allocation51_spill] sm:$0xff] }
 0x2b8   :  { %v3503_v37 = vmul.f32 %v2656_v49, %v4386_v29  ;;  %v3504_v34 = vmul.f32 %v2657_v48, %v4386_v29  ;;  %v5638_v18 = vpop.permute.xlu0 %2670  ;;  %v3502_v26 = vmul.f32 %v5557_v57, %v6646_v39 }
 0x2b9   :  { %v2823_v4 = vcombine.low %v2819_v56, %v2820_v43  ;;  %v3165_v40 = vcombine.low %v3161_v35, %v3162_v51  ;;  %v2661_v58 = vpop.permute.xlu1 %2660 }
 0x2ba   :  { %v3507_v5 = vcombine.low %v3503_v37, %v3504_v34  ;;  %v2662_v44 = vsel %vm249_vm0, %v2659_v16, %v2661_v58  ;;  %v2663_v29 = vsel %vm249_vm0, %v2661_v58, %v2659_v16 }
 0x2bb   :  { %v2830_v14 = vrot.slane %v2823_v4, %v4083_v6  ;;  %v3172_v23 = vrot.slane %v3165_v40, %v4083_v6  ;;  %v2833_v36 = vmul.f32 %v2662_v44, %v6589_v20  ;;  %v2834_v15 = vmul.f32 %v2663_v29, %v6589_v20 }
 0x2bc   :  { %v3514_v52 = vrot.slane %v3507_v5, %v4083_v6  ;;  %v3175_v49 = vmul.f32 %v2662_v44, %v6590_v19  ;;  %v3176_v57 = vmul.f32 %v2663_v29, %v6590_v19  ;;  %v3517_v48 = vmul.f32 %v2662_v44, %v6591_v45  ;;  %v5658_v56 = vpop.permute.xlu0 %2729 }
 0x2bd   :  { %v2832_v43 = vadd.f32 %v2830_v14, %v2818_v25  ;;  %v3174_v16 = vadd.f32 %v3172_v23, %v3160_v60  ;;  %v2837_v35 = vcombine.low %v2833_v36, %v2834_v15  ;;  %v3518_v51 = vmul.f32 %v2663_v29, %v6591_v45  ;;  %v2667_v37 = vpop.permute.xlu1 %2666 }
 0x2be   :  { %v3516_v34 = vadd.f32 %v3514_v52, %v3502_v26  ;;  %v3179_v38 = vcombine.low %v3175_v49, %v3176_v57  ;;  %v2668_v20 = vsel %vm256_vm1, %v2665_v55, %v2667_v37  ;;  %v2669_v27 = vsel %vm256_vm1, %v2667_v37, %v2665_v55 }
 0x2bf   :  { %v2844_v19 = vrot.slane %v2837_v35, %v4083_v6  ;;  %v3521_v4 = vcombine.low %v3517_v48, %v3518_v51  ;;  %v2847_v40 = vmul.f32 %v2668_v20, %v6592_v42  ;;  %v2848_v25 = vmul.f32 %v2669_v27, %v6592_v42 }
 0x2c0   :  { %v3186_v60 = vrot.slane %v3179_v38, %v4083_v6  ;;  %v3189_v45 = vmul.f32 %v2668_v20, %v6593_v22  ;;  %v3190_v58 = vmul.f32 %v2669_v27, %v6593_v22  ;;  %v3531_v39 = vmul.f32 %v2668_v20, %v6594_v8  ;;  %v5672_v26 = vpop.permute.xlu0 %2788 }
 0x2c1   :  { %v2846_v5 = vadd.f32 %v2844_v19, %v2832_v43  ;;  %v3528_v55 = vrot.slane %v3521_v4, %v4083_v6  ;;  %v2851_v44 = vcombine.low %v2847_v40, %v2848_v25  ;;  %v3532_v29 = vmul.f32 %v2669_v27, %v6594_v8  ;;  %v2726_v14 = vpop.permute.xlu1 %2725  ;;  %v6647_v40 = vld [vmem:[#allocation61_spill] sm:$0xff]  ;;  %v6648_v25 = vld [vmem:[#allocation64_spill] sm:$0xff] }
 0x2c2   :  { %v3188_v23 = vadd.f32 %v3186_v60, %v3174_v16  ;;  %v3193_v36 = vcombine.low %v3189_v45, %v3190_v58  ;;  %v2727_v42 = vsel %vm256_vm1, %v2724_v7, %v2726_v14  ;;  %v2728_v15 = vsel %vm256_vm1, %v2726_v14, %v2724_v7 }
 0x2c3   :  { %v3530_v22 = vadd.f32 %v3528_v55, %v3516_v34  ;;  %v2858_v52 = vrot.slane %v2851_v44, %v4083_v6  ;;  %v3535_v49 = vcombine.low %v3531_v39, %v3532_v29  ;;  %v2960_v48 = vmul.f32 %v2727_v42, %v4515_v0  ;;  %v6650_v55 = vld [vmem:[#allocation68_spill] sm:$0xff] }
 0x2c4   :  { %v3200_v57 = vrot.slane %v3193_v36, %v4083_v6  ;;  %v2961_v43 = vmul.f32 %v2728_v15, %v4515_v0  ;;  %v5684_v8 = vpop.permute.xlu0 %2676  ;;  %v3302_v51 = vmul.f32 %v2727_v42, %v4520_v1  ;;  %v3303_v37 = vmul.f32 %v2728_v15, %v4520_v1 }
 0x2c5   :  { %v2860_v16 = vadd.f32 %v2858_v52, %v2846_v5  ;;  %v3542_v35 = vrot.slane %v3535_v49, %v4083_v6  ;;  %v2785_v7 = vpop.permute.xlu1 %2784  ;;  %v3644_v27 = vmul.f32 %v2727_v42, %v4523_v2  ;;  %v3645_v19 = vmul.f32 %v2728_v15, %v4523_v2  ;;  %v6649_v5 = vld [vmem:[#allocation65_spill] sm:$0xff]  ;;  %v6651_v49 = vld [vmem:[#allocation58_spill] sm:$0xff] }
 0x2c6   :  { %v3202_v34 = vadd.f32 %v3200_v57, %v3188_v23  ;;  %v2786_v20 = vsel %vm256_vm1, %v5626_v10, %v2785_v7  ;;  %v2787_v0 = vsel %vm256_vm1, %v2785_v7, %v5626_v10  ;;  %v5701_v1 = vmul.f32 %v5560_v21, %v6647_v40 }
 0x2c7   :  { %v3544_v38 = vadd.f32 %v3542_v35, %v3530_v22  ;;  %v5705_v60 = vmul.f32 %v5560_v21, %v6648_v25  ;;  %v2964_v45 = vcombine.low %v2960_v48, %v2961_v43  ;;  %v3306_v58 = vcombine.low %v3302_v51, %v3303_v37  ;;  %v6652_v43 = vld [vmem:[#allocation85_spill] sm:$0xff] }
 0x2c8   :  { %v5697_v4 = vpop.permute.xlu0 %2735  ;;  %v5709_v10 = vmul.f32 %v5560_v21, %v6649_v5  ;;  %v5713_v2 = vmul.f32 %v5562_v41, %v6650_v55  ;;  %v3073_v44 = vmul.f32 %v2786_v20, %v6525_v30  ;;  %v3074_v29 = vmul.f32 %v2787_v0, %v6525_v30 }
 0x2c9   :  { %v2673_v39 = vpop.permute.xlu1 %2672  ;;  %v3415_v36 = vmul.f32 %v2786_v20, %v6596_v11  ;;  %v3416_v21 = vmul.f32 %v2787_v0, %v6596_v11  ;;  %v3648_v22 = vcombine.low %v3644_v27, %v3645_v19  ;;  %v5733_v35 = vmul.f32 %v2786_v20, %v6652_v43  ;;  %v6653_v27 = vld [vmem:[#allocation69_spill] sm:$0xff] }
 0x2ca   :  { %v2674_v14 = vsel %vm263_vm3, %v5638_v18, %v2673_v39  ;;  %v2675_v23 = vsel %vm263_vm3, %v2673_v39, %v5638_v18  ;;  %v5736_v18 = vmul.f32 %v2787_v0, %v6652_v43  ;;  %v5741_v19 = vmul.f32 %v5562_v41, %v6653_v27 }
 0x2cb   :  { %v2861_v42 = vmul.f32 %v2674_v14, %v4393_v31  ;;  %v2862_v15 = vmul.f32 %v2675_v23, %v4393_v31  ;;  %v3203_v52 = vmul.f32 %v2674_v14, %v4396_v32  ;;  %v3204_v30 = vmul.f32 %v2675_v23, %v4396_v32  ;;  %v6654_v32 = vld [vmem:[#allocation72_spill] sm:$0xff] }
 0x2cc   :  { %v3545_v57 = vmul.f32 %v2674_v14, %v6651_v49  ;;  %v5730_v48 = vpop.permute.xlu0 %2794  ;;  %v3546_v51 = vmul.f32 %v2675_v23, %v6651_v49  ;;  %v3077_v31 = vcombine.low %v3073_v44, %v3074_v29  ;;  %v5745_v40 = vmul.f32 %v5562_v41, %v6654_v32 }
 0x2cd   :  { %v2865_v11 = vcombine.low %v2861_v42, %v2862_v15  ;;  %v2732_v37 = vpop.permute.xlu1 %2731  ;;  %v3207_v7 = vcombine.low %v3203_v52, %v3204_v30  ;;  %v5748_v20 = vrot.slane %v2964_v45, %v4083_v6  ;;  %v3419_v25 = vcombine.low %v3415_v36, %v3416_v21 }
 0x2ce   :  { %v3549_v39 = vcombine.low %v3545_v57, %v3546_v51  ;;  %v5752_v5 = vrot.slane %v3306_v58, %v4083_v6  ;;  %v2733_v44 = vsel %vm263_vm3, %v5658_v56, %v2732_v37  ;;  %v2734_v41 = vsel %vm263_vm3, %v2732_v37, %v5658_v56  ;;  %v6656_v57 = vld [vmem:[#allocation87_spill] sm:$0xff]  ;;  %v6658_v37 = vld [vmem:[#allocation89_spill] sm:$0xff] }
 0x2cf   :  { %v2872_v0 = vrot.slane %v2865_v11, %v4083_v6  ;;  %v3214_v55 = vrot.slane %v3207_v7, %v4083_v6  ;;  %v5764_v45 = vrot.slane %v3648_v22, %v4083_v6  ;;  %v3761_v14 = vcombine.low %v5733_v35, %v5736_v18  ;;  %v6657_v35 = vld [vmem:[#allocation88_spill] sm:$0xff]  ;;  %v6659_v7 = vld [vmem:[#allocation90_spill] sm:$0xff] }
 0x2d0   :  { %v5761_v29 = vpop.permute.xlu0 %2682  ;;  %v3556_v23 = vrot.slane %v3549_v39, %v4083_v6  ;;  %v5770_v21 = vrot.slane %v3077_v31, %v4083_v6  ;;  %v5779_v22 = vrot.slane %v3419_v25, %v4083_v6  ;;  %v3316_v43 = vmul.f32 %v2733_v44, %v6656_v57  ;;  %v6660_v25 = vld [vmem:[#allocation91_spill] sm:$0xff] }
 0x2d1   :  { %v2874_v58 = vadd.f32 %v2872_v0, %v2860_v16  ;;  %v2791_v36 = vpop.permute.xlu1 %2790  ;;  %v3216_v42 = vadd.f32 %v3214_v55, %v3202_v34  ;;  %v6655_v16 = vld [vmem:[#allocation86_spill] sm:$0xff]  ;;  %v3317_v34 = vmul.f32 %v2734_v41, %v6656_v57  ;;  %v3658_v18 = vmul.f32 %v2733_v44, %v6657_v35  ;;  %v6662_v57 = vld [vmem:[#allocation60_spill] sm:$0xff] }
 0x2d2   :  { %v2792_v56 = vsel %vm263_vm3, %v5672_v26, %v2791_v36  ;;  %v2793_v15 = vsel %vm263_vm3, %v2791_v36, %v5672_v26  ;;  %v3558_v52 = vadd.f32 %v3556_v23, %v3544_v38  ;;  %v2974_v30 = vmul.f32 %v2733_v44, %v6655_v16  ;;  %v6661_v23 = vld [vmem:[#allocation59_spill] sm:$0xff] }
 0x2d3   :  { %v2975_v49 = vmul.f32 %v2734_v41, %v6655_v16  ;;  %v3659_v11 = vmul.f32 %v2734_v41, %v6657_v35  ;;  %v3087_v26 = vmul.f32 %v2792_v56, %v6658_v37  ;;  %v3088_v31 = vmul.f32 %v2793_v15, %v6658_v37 }
 0x2d4   :  { %v5787_v51 = vpop.permute.xlu0 %2741  ;;  %v3429_v38 = vmul.f32 %v2792_v56, %v6659_v7  ;;  %v3430_v27 = vmul.f32 %v2793_v15, %v6659_v7  ;;  %v3771_v0 = vmul.f32 %v2792_v56, %v6660_v25  ;;  %v3772_v39 = vmul.f32 %v2793_v15, %v6660_v25  ;;  %v6663_v15 = vld [vmem:[#allocation62_spill] sm:$0xff] }
 0x2d5   :  { %v2679_v32 = vpop.permute.xlu1 %2678  ;;  %v2978_v41 = vcombine.low %v2974_v30, %v2975_v49  ;;  %v3320_v37 = vcombine.low %v3316_v43, %v3317_v34  ;;  %v3662_v7 = vcombine.low %v3658_v18, %v3659_v11  ;;  %v3091_v59 = vcombine.low %v3087_v26, %v3088_v31  ;;  %v6664_v11 = vld [vmem:[#allocation92_spill] sm:$0xff] }
 0x2d6   :  { %v2680_v55 = vsel %vm270_vm4, %v5684_v8, %v2679_v32  ;;  %v2681_v44 = vsel %vm270_vm4, %v2679_v32, %v5684_v8  ;;  %v3433_v47 = vcombine.low %v3429_v38, %v3430_v27  ;;  %v3775_v49 = vcombine.low %v3771_v0, %v3772_v39  ;;  %v6665_v0 = vld [vmem:[#allocation93_spill] sm:$0xff] }
 0x2d7   :  { %v2875_v36 = vmul.f32 %v2680_v55, %v6661_v23  ;;  %v2876_v16 = vmul.f32 %v2681_v44, %v6661_v23  ;;  %v3217_v35 = vmul.f32 %v2680_v55, %v6662_v57  ;;  %v3218_v56 = vmul.f32 %v2681_v44, %v6662_v57 }
 0x2d8   :  { %v3559_v25 = vmul.f32 %v2680_v55, %v6663_v15  ;;  %v5806_v53 = vpop.permute.xlu0 %2800  ;;  %v3560_v8 = vmul.f32 %v2681_v44, %v6663_v15  ;;  %v5819_v38 = vrot.slane %v3761_v14, %v4083_v6  ;;  %v5837_v57 = vrot.slane %v3091_v59, %v4083_v6 }
 0x2d9   :  { %v2879_v13 = vcombine.low %v2875_v36, %v2876_v16  ;;  %v2738_v30 = vpop.permute.xlu1 %2737  ;;  %v3221_v32 = vcombine.low %v3217_v35, %v3218_v56  ;;  %v5833_v36 = vrot.slane %v3662_v7, %v4083_v6  ;;  %v5840_v35 = vrot.slane %v3433_v47, %v4083_v6 }
 0x2da   :  { %v2739_v23 = vsel %vm270_vm4, %v5697_v4, %v2738_v30  ;;  %v2740_v43 = vsel %vm270_vm4, %v2738_v30, %v5697_v4  ;;  %v3563_v18 = vcombine.low %v3559_v25, %v3560_v8  ;;  %v5827_v4 = vrot.slane %v2978_v41, %v4083_v6  ;;  %v6667_v25 = vld [vmem:[#allocation94_spill] sm:$0xff] }
 0x2db   :  { %v2886_v34 = vrot.slane %v2879_v13, %v4083_v6  ;;  %v2988_v26 = vmul.f32 %v2739_v23, %v6664_v11  ;;  %v2989_v31 = vmul.f32 %v2740_v43, %v6664_v11  ;;  %v3228_v27 = vrot.slane %v3221_v32, %v4083_v6  ;;  %6666 = vst [vmem:[#allocation56_spill] sm:$0xff] %v5840_v35  ;;  %v6668_v11 = vld [vmem:[#allocation95_spill] sm:$0xff] }
 0x2dc   :  { %v3330_v39 = vmul.f32 %v2739_v23, %v6665_v0  ;;  %v3331_v55 = vmul.f32 %v2740_v43, %v6665_v0  ;;  %v5824_v44 = vpop.permute.xlu0 %2688  ;;  %v5830_v13 = vrot.slane %v3320_v37, %v4083_v6  ;;  %v3570_v14 = vrot.slane %v3563_v18, %v4083_v6 }
 0x2dd   :  { %v2797_v16 = vpop.permute.xlu1 %2796  ;;  %v5849_v7 = vrot.slane %v3775_v49, %v4083_v6  ;;  %v2888_v56 = vadd.f32 %v2886_v34, %v2874_v58  ;;  %v2992_v15 = vcombine.low %v2988_v26, %v2989_v31  ;;  %v3672_v8 = vmul.f32 %v2739_v23, %v6667_v25  ;;  %v6670_v34 = vld [vmem:[#allocation97_spill] sm:$0xff] }
 0x2de   :  { %v2798_v41 = vsel %vm270_vm4, %v5730_v48, %v2797_v16  ;;  %v2799_v37 = vsel %vm270_vm4, %v2797_v16, %v5730_v48  ;;  %v3230_v59 = vadd.f32 %v3228_v27, %v3216_v42  ;;  %v5852_v30 = vadd.f32 %v3570_v14, %v3558_v52  ;;  %v6669_v48 = vld [vmem:[#allocation96_spill] sm:$0xff] }
 0x2df   :  { %v3334_v47 = vcombine.low %v3330_v39, %v3331_v55  ;;  %v3673_v32 = vmul.f32 %v2740_v43, %v6667_v25  ;;  %v3101_v0 = vmul.f32 %v2798_v41, %v6668_v11  ;;  %v3102_v35 = vmul.f32 %v2799_v37, %v6668_v11  ;;  %v6672_v39 = vld [vmem:[#allocation66_spill] sm:$0xff] }
 0x2e0   :  { %v5855_v18 = vpop.permute.xlu0 %2747  ;;  %v3443_v16 = vmul.f32 %v2798_v41, %v6669_v48  ;;  %v3444_v49 = vmul.f32 %v2799_v37, %v6669_v48  ;;  %v3785_v26 = vmul.f32 %v2798_v41, %v6670_v34  ;;  %v3786_v42 = vmul.f32 %v2799_v37, %v6670_v34 }
 0x2e1   :  { %v2685_v58 = vpop.permute.xlu1 %2684  ;;  %v5870_v43 = vrot.slane %v2992_v15, %v4083_v6  ;;  %v5876_v14 = vrot.slane %v3334_v47, %v4083_v6  ;;  %v3676_v41 = vcombine.low %v3672_v8, %v3673_v32 }
 0x2e2   :  { %v2686_v52 = vsel %vm277_vm5, %v5761_v29, %v2685_v58  ;;  %v2687_v23 = vsel %vm277_vm5, %v2685_v58, %v5761_v29  ;;  %v3105_v29 = vcombine.low %v3101_v0, %v3102_v35  ;;  %v3447_v48 = vcombine.low %v3443_v16, %v3444_v49 }
 0x2e3   :  { %6671 = vst [vmem:[#allocation57_spill] sm:$0xff] %v5870_v43  ;;  %v2889_v31 = vmul.f32 %v2686_v52, %v6614_v46  ;;  %v2890_v27 = vmul.f32 %v2687_v23, %v6614_v46  ;;  %v3231_v55 = vmul.f32 %v2686_v52, %v6672_v39  ;;  %v3232_v37 = vmul.f32 %v2687_v23, %v6672_v39 }
 0x2e4   :  { %v3573_v25 = vmul.f32 %v2686_v52, %v6616_v63  ;;  %v5880_v11 = vpop.permute.xlu0 %2806  ;;  %v3574_v58 = vmul.f32 %v2687_v23, %v6616_v63  ;;  %v3789_v43 = vcombine.low %v3785_v26, %v3786_v42  ;;  %v5893_v63 = vrot.slane %v3676_v41, %v4083_v6 }
 0x2e5   :  { %v2893_v15 = vcombine.low %v2889_v31, %v2890_v27  ;;  %v2744_v34 = vpop.permute.xlu1 %2743  ;;  %v3235_v46 = vcombine.low %v3231_v55, %v3232_v37  ;;  %v5899_v23 = vrot.slane %v3105_v29, %v4083_v6 }
 0x2e6   :  { %v2745_v47 = vsel %vm277_vm5, %v5787_v51, %v2744_v34  ;;  %v2746_v8 = vsel %vm277_vm5, %v2744_v34, %v5787_v51  ;;  %v3577_v52 = vcombine.low %v3573_v25, %v3574_v58  ;;  %v5902_v51 = vrot.slane %v3447_v48, %v4083_v6 }
 0x2e7   :  { %v2900_v32 = vrot.slane %v2893_v15, %v4083_v6  ;;  %v3002_v35 = vmul.f32 %v2745_v47, %v6617_v3  ;;  %v3003_v0 = vmul.f32 %v2746_v8, %v6617_v3  ;;  %v3242_v16 = vrot.slane %v3235_v46, %v4083_v6  ;;  %v6674_v15 = vld [vmem:[#allocation71_spill] sm:$0xff] }
 0x2e8   :  { %v3344_v49 = vmul.f32 %v2745_v47, %v6618_v24  ;;  %v3345_v26 = vmul.f32 %v2746_v8, %v6618_v24  ;;  %v2714_v42 = vpop.permute.xlu0 %2713  ;;  %v3686_v31 = vmul.f32 %v2745_v47, %v6619_v54  ;;  %v3687_v3 = vmul.f32 %v2746_v8, %v6619_v54  ;;  %v6673_v54 = vld [vmem:[#allocation70_spill] sm:$0xff]  ;;  %v6675_v47 = vld [vmem:[#allocation73_spill] sm:$0xff] }
 0x2e9   :  { %v5907_v27 = vrot.slane %v3789_v43, %v4083_v6  ;;  %v5909_v39 = vadd.f32 %v2900_v32, %v2888_v56  ;;  %v2715_v24 = vsel %vm242_vm2, %v5618_v12, %v2714_v42  ;;  %v2716_v55 = vsel %vm242_vm2, %v2714_v42, %v5618_v12  ;;  %v2803_v41 = vpop.permute.xlu1 %2802  ;;  %v6676_v42 = vld [vmem:[#allocation102_spill] sm:$0xff] }
 0x2ea   :  { %v5917_v37 = vadd.f32 %v3242_v16, %v3230_v59  ;;  %v3584_v25 = vrot.slane %v3577_v52, %v4083_v6  ;;  %v3006_v29 = vcombine.low %v3002_v35, %v3003_v0  ;;  %v2932_v48 = vmul.f32 %v2715_v24, %v6673_v54 }
 0x2eb   :  { %v3348_v43 = vcombine.low %v3344_v49, %v3345_v26  ;;  %v2933_v56 = vmul.f32 %v2716_v55, %v6673_v54  ;;  %v3274_v58 = vmul.f32 %v2715_v24, %v6674_v15  ;;  %v3275_v34 = vmul.f32 %v2716_v55, %v6674_v15 }
 0x2ec   :  { %v3690_v46 = vcombine.low %v3686_v31, %v3687_v3  ;;  %v3616_v8 = vmul.f32 %v2715_v24, %v6675_v47  ;;  %v3617_v12 = vmul.f32 %v2716_v55, %v6675_v47  ;;  %v2804_v59 = vsel %vm277_vm5, %v5806_v53, %v2803_v41  ;;  %v2773_v16 = vpop.permute.xlu0 %2772  ;;  %v6677_v47 = vld [vmem:[#allocation74_spill] sm:$0xff] }
 0x2ed   :  { %v2936_v32 = vcombine.low %v2932_v48, %v2933_v56  ;;  %v3278_v52 = vcombine.low %v3274_v58, %v3275_v34  ;;  %v2805_v35 = vsel %vm277_vm5, %v2803_v41, %v5806_v53  ;;  %v3115_v0 = vmul.f32 %v2804_v59, %v6620_v33 }
 0x2ee   :  { %v3620_v49 = vcombine.low %v3616_v8, %v3617_v12  ;;  %v3116_v26 = vmul.f32 %v2805_v35, %v6620_v33  ;;  %v3457_v31 = vmul.f32 %v2804_v59, %v6676_v42  ;;  %v3458_v3 = vmul.f32 %v2805_v35, %v6676_v42 }
 0x2ef   :  { %v2943_v24 = vrot.slane %v2936_v32, %v4083_v6  ;;  %v3285_v55 = vrot.slane %v3278_v52, %v4083_v6  ;;  %v3799_v54 = vmul.f32 %v2804_v59, %v6622_v50  ;;  %v3800_v48 = vmul.f32 %v2805_v35, %v6622_v50  ;;  %v6678_v59 = vld [vmem:[#allocation75_spill] sm:$0xff]  ;;  %v6679_v35 = vld [vmem:[#allocation76_spill] sm:$0xff] }
 0x2f0   :  { %v5941_v53 = vadd.f32 %v3584_v25, %v5852_v30  ;;  %v5944_v41 = vrot.slane %v3006_v29, %v4083_v6  ;;  %v5947_v33 = vrot.slane %v3348_v43, %v4083_v6  ;;  %v2774_v56 = vsel %vm242_vm2, %v5620_v28, %v2773_v16  ;;  %v2691_v30 = vpop.permute.xlu1 %2690 }
 0x2f1   :  { %v5953_v15 = vrot.slane %v3690_v46, %v4083_v6  ;;  %v3627_v58 = vrot.slane %v3620_v49, %v4083_v6  ;;  %v3119_v34 = vcombine.low %v3115_v0, %v3116_v26  ;;  %v2775_v50 = vsel %vm242_vm2, %v2773_v16, %v5620_v28  ;;  %v6680_v26 = vld [vmem:[#allocation104_spill] sm:$0xff] }
 0x2f2   :  { %v2945_v25 = vadd.f32 %v2943_v24, %v5701_v1  ;;  %v5961_v29 = vadd.f32 %v3285_v55, %v5705_v60  ;;  %v3461_v43 = vcombine.low %v3457_v31, %v3458_v3  ;;  %v3045_v8 = vmul.f32 %v2774_v56, %v6677_v47  ;;  %v2720_v3 = vpop.permute.xlu0 %2719 }
 0x2f3   :  { %v3803_v12 = vcombine.low %v3799_v54, %v3800_v48  ;;  %v3046_v46 = vmul.f32 %v2775_v50, %v6677_v47  ;;  %v3387_v32 = vmul.f32 %v2774_v56, %v6678_v59  ;;  %v3388_v52 = vmul.f32 %v2775_v50, %v6678_v59  ;;  %v6681_v54 = vld [vmem:[#allocation105_spill] sm:$0xff] }
 0x2f4   :  { %v3729_v0 = vmul.f32 %v2774_v56, %v6679_v35  ;;  %v3730_v28 = vmul.f32 %v2775_v50, %v6679_v35  ;;  %v2692_v1 = vsel %vm284_vm6, %v5824_v44, %v2691_v30  ;;  %v2693_v60 = vsel %vm284_vm6, %v2691_v30, %v5824_v44 }
 0x2f5   :  { %v3049_v16 = vcombine.low %v3045_v8, %v3046_v46  ;;  %v3391_v49 = vcombine.low %v3387_v32, %v3388_v52  ;;  %v2903_v42 = vmul.f32 %v2692_v1, %v6680_v26  ;;  %v2904_v31 = vmul.f32 %v2693_v60, %v6680_v26  ;;  %v2750_v8 = vpop.permute.xlu1 %2749 }
 0x2f6   :  { %v3629_v24 = vadd.f32 %v3627_v58, %v5709_v10  ;;  %v3733_v55 = vcombine.low %v3729_v0, %v3730_v28  ;;  %v3245_v48 = vmul.f32 %v2692_v1, %v6681_v54  ;;  %v3246_v56 = vmul.f32 %v2693_v60, %v6681_v54  ;;  %v6682_v0 = vld [vmem:[#allocation77_spill] sm:$0xff] }
 0x2f7   :  { %v5981_v50 = vrot.slane %v3119_v34, %v4083_v6  ;;  %v3056_v47 = vrot.slane %v3049_v16, %v4083_v6  ;;  %v3398_v44 = vrot.slane %v3391_v49, %v4083_v6  ;;  %v2907_v30 = vcombine.low %v2903_v42, %v2904_v31  ;;  %v6684_v31 = vld [vmem:[#allocation79_spill] sm:$0xff] }
 0x2f8   :  { %v5986_v46 = vrot.slane %v3461_v43, %v4083_v6  ;;  %v5989_v59 = vrot.slane %v3803_v12, %v4083_v6  ;;  %v2721_v10 = vsel %vm249_vm0, %v5622_v61, %v2720_v3  ;;  %v2722_v58 = vsel %vm249_vm0, %v2720_v3, %v5622_v61  ;;  %v6683_v61 = vld [vmem:[#allocation78_spill] sm:$0xff] }
 0x2f9   :  { %v3740_v34 = vrot.slane %v3733_v55, %v4083_v6  ;;  %v3249_v32 = vcombine.low %v3245_v48, %v3246_v56  ;;  %v3587_v52 = vmul.f32 %v2692_v1, %v6625_v9  ;;  %v3588_v35 = vmul.f32 %v2693_v60, %v6625_v9  ;;  %v2779_v60 = vpop.permute.xlu0 %2778  ;;  %v6685_v48 = vld [vmem:[#allocation107_spill] sm:$0xff] }
 0x2fa   :  { %v3058_v43 = vadd.f32 %v3056_v47, %v5713_v2  ;;  %v6002_v12 = vadd.f32 %v3398_v44, %v5741_v19  ;;  %v2946_v28 = vmul.f32 %v2721_v10, %v6682_v0  ;;  %v2947_v16 = vmul.f32 %v2722_v58, %v6682_v0  ;;  %v2809_v44 = vpop.permute.xlu1 %2808 }
 0x2fb   :  { %v6007_v49 = vrot.slane %v2907_v30, %v4083_v6  ;;  %v3288_v26 = vmul.f32 %v2721_v10, %v6683_v61  ;;  %v3289_v42 = vmul.f32 %v2722_v58, %v6683_v61  ;;  %v3630_v1 = vmul.f32 %v2721_v10, %v6684_v31 }
 0x2fc   :  { %v2950_v3 = vcombine.low %v2946_v28, %v2947_v16  ;;  %v3631_v9 = vmul.f32 %v2722_v58, %v6684_v31  ;;  %v2751_v2 = vsel %vm284_vm6, %v5855_v18, %v2750_v8  ;;  %v2752_v19 = vsel %vm284_vm6, %v2750_v8, %v5855_v18  ;;  %v6686_v58 = vld [vmem:[#allocation108_spill] sm:$0xff] }
 0x2fd   :  { %v3591_v55 = vcombine.low %v3587_v52, %v3588_v35  ;;  %v3292_v54 = vcombine.low %v3288_v26, %v3289_v42  ;;  %v3016_v56 = vmul.f32 %v2751_v2, %v6685_v48  ;;  %v3017_v47 = vmul.f32 %v2752_v19, %v6685_v48 }
 0x2fe   :  { %v2957_v30 = vrot.slane %v2950_v3, %v4083_v6  ;;  %v3634_v10 = vcombine.low %v3630_v1, %v3631_v9  ;;  %v3358_v0 = vmul.f32 %v2751_v2, %v6686_v58  ;;  %v3359_v28 = vmul.f32 %v2752_v19, %v6686_v58  ;;  %v6688_v1 = vld [vmem:[#allocation80_spill] sm:$0xff] }
 0x2ff   :  { %v3742_v16 = vadd.f32 %v3740_v34, %v5745_v40  ;;  %v6026_v61 = vrot.slane %v3249_v32, %v4083_v6  ;;  %v3299_v18 = vrot.slane %v3292_v54, %v4083_v6  ;;  %v2780_v8 = vsel %vm249_vm0, %v5624_v62, %v2779_v60  ;;  %v6687_v40 = vld [vmem:[#allocation109_spill] sm:$0xff] }
 0x300   :  { %v2959_v52 = vadd.f32 %v2957_v30, %v2945_v25  ;;  %v3641_v35 = vrot.slane %v3634_v10, %v4083_v6  ;;  %v3020_v26 = vcombine.low %v3016_v56, %v3017_v47  ;;  %v2781_v42 = vsel %vm249_vm0, %v2779_v60, %v5624_v62  ;;  %v6689_v62 = vld [vmem:[#allocation81_spill] sm:$0xff]  ;;  %v2697_v30 = vpop.permute.xlu1 %2696 }
 0x301   :  { %v3301_v31 = vadd.f32 %v3299_v18, %v5961_v29  ;;  %v3700_v34 = vmul.f32 %v2751_v2, %v6687_v40  ;;  %v3701_v32 = vmul.f32 %v2752_v19, %v6687_v40  ;;  %v3059_v3 = vmul.f32 %v2780_v8, %v6688_v1  ;;  %v2695_v2 = vpop.permute.xlu0 %2694  ;;  %v6692_v40 = vld [vmem:[#allocation111_spill] sm:$0xff] }
 0x302   :  { %v2973_v9 = vadd.f32 %v5748_v20, %v2959_v52  ;;  %v3643_v54 = vadd.f32 %v3641_v35, %v3629_v24  ;;  %v3362_v48 = vcombine.low %v3358_v0, %v3359_v28  ;;  %v3060_v25 = vmul.f32 %v2781_v42, %v6688_v1  ;;  %v6690_v24 = vld [vmem:[#allocation82_spill] sm:$0xff] }
 0x303   :  { %v6043_v56 = vrot.slane %v3591_v55, %v4083_v6  ;;  %v3315_v47 = vadd.f32 %v5752_v5, %v3301_v31  ;;  %v3401_v60 = vmul.f32 %v2780_v8, %v6689_v62  ;;  %v3402_v29 = vmul.f32 %v2781_v42, %v6689_v62  ;;  %v6691_v35 = vld [vmem:[#allocation110_spill] sm:$0xff] }
 0x304   :  { %v3657_v19 = vadd.f32 %v5764_v45, %v3643_v54  ;;  %v6050_v10 = vrot.slane %v3020_v26, %v4083_v6  ;;  %v3063_v20 = vcombine.low %v3059_v3, %v3060_v25  ;;  %v3743_v58 = vmul.f32 %v2780_v8, %v6690_v24  ;;  %v6693_v3 = vld [vmem:[#allocation112_spill] sm:$0xff] }
 0x305   :  { %v3704_v0 = vcombine.low %v3700_v34, %v3701_v32  ;;  %v3405_v28 = vcombine.low %v3401_v60, %v3402_v29  ;;  %v3744_v55 = vmul.f32 %v2781_v42, %v6690_v24  ;;  %v2810_v5 = vsel %vm284_vm6, %v5880_v11, %v2809_v44  ;;  %v2754_v60 = vpop.permute.xlu0 %2753  ;;  %v2756_v29 = vpop.permute.xlu1 %2755 }
 0x306   :  { %v6058_v18 = vrot.slane %v3362_v48, %v4083_v6  ;;  %v3070_v52 = vrot.slane %v3063_v20, %v4083_v6  ;;  %v2811_v45 = vsel %vm284_vm6, %v2809_v44, %v5880_v11  ;;  %v3129_v26 = vmul.f32 %v2810_v5, %v6691_v35 }
 0x307   :  { %v3412_v8 = vrot.slane %v3405_v28, %v4083_v6  ;;  %v3747_v31 = vcombine.low %v3743_v58, %v3744_v55  ;;  %v3130_v42 = vmul.f32 %v2811_v45, %v6691_v35  ;;  %v3471_v34 = vmul.f32 %v2810_v5, %v6692_v40  ;;  %v6694_v35 = vld [vmem:[#allocation113_spill] sm:$0xff] }
 0x308   :  { %v3072_v32 = vadd.f32 %v3070_v52, %v3058_v43  ;;  %v3472_v1 = vmul.f32 %v2811_v45, %v6692_v40  ;;  %v3813_v54 = vmul.f32 %v2810_v5, %v6693_v3  ;;  %v3814_v48 = vmul.f32 %v2811_v45, %v6693_v3 }
 0x309   :  { %v3414_v25 = vadd.f32 %v3412_v8, %v6002_v12  ;;  %v3754_v11 = vrot.slane %v3747_v31, %v4083_v6  ;;  %v3133_v44 = vcombine.low %v3129_v26, %v3130_v42  ;;  %v2698_v62 = vsel %vm291_vm7, %v2695_v2, %v2697_v30  ;;  %v6697_v31 = vld [vmem:[#allocation116_spill] sm:$0xff]  ;;  %v2813_v40 = vpop.permute.xlu0 %2812 }
 0x30a   :  { %v2987_v20 = vadd.f32 %v5827_v4, %v2973_v9  ;;  %v6077_v43 = vrot.slane %v3704_v0, %v4083_v6  ;;  %v3086_v24 = vadd.f32 %v5770_v21, %v3072_v32  ;;  %v2699_v58 = vsel %vm291_vm7, %v2697_v30, %v2695_v2  ;;  %v6695_v0 = vld [vmem:[#allocation114_spill] sm:$0xff] }
 0x30b   :  { %v3428_v12 = vadd.f32 %v5779_v22, %v3414_v25  ;;  %v3756_v28 = vadd.f32 %v3754_v11, %v3742_v16  ;;  %v3475_v55 = vcombine.low %v3471_v34, %v3472_v1  ;;  %v3817_v5 = vcombine.low %v3813_v54, %v3814_v48  ;;  %v6696_v16 = vld [vmem:[#allocation115_spill] sm:$0xff]  ;;  %v2815_v34 = vpop.permute.xlu1 %2814  ;;  %v6699_v54 = vld [vmem:[#allocation117_spill] sm:$0xff] }
 0x30c   :  { %v3329_v52 = vadd.f32 %v5830_v13, %v3315_v47  ;;  %v3671_v45 = vadd.f32 %v5833_v36, %v3657_v19  ;;  %v2917_v26 = vmul.f32 %v2698_v62, %v6694_v35  ;;  %v2918_v4 = vmul.f32 %v2699_v58, %v6694_v35 }
 0x30d   :  { %v3770_v9 = vadd.f32 %v5819_v38, %v3756_v28  ;;  %v3140_v21 = vrot.slane %v3133_v44, %v4083_v6  ;;  %v3259_v8 = vmul.f32 %v2698_v62, %v6695_v0  ;;  %v3260_v2 = vmul.f32 %v2699_v58, %v6695_v0  ;;  %v6700_v44 = vld [vmem:[#allocation118_spill] sm:$0xff]  ;;  %v6702_v0 = vld [vmem:[#allocation120_spill] sm:$0xff] }
 0x30e   :  { %v3100_v22 = vadd.f32 %v5837_v57, %v3086_v24  ;;  %v3601_v30 = vmul.f32 %v2698_v62, %v6696_v16  ;;  %v3602_v13 = vmul.f32 %v2699_v58, %v6696_v16  ;;  %v2757_v36 = vsel %vm291_vm7, %v2754_v60, %v2756_v29  ;;  %v6698_v57 = vld [vmem:[#allocation56_spill] sm:$0xff]  ;;  %v6703_v16 = vld [vmem:[#allocation121_spill] sm:$0xff] }
 0x30f   :  { %v3482_v47 = vrot.slane %v3475_v55, %v4083_v6  ;;  %v6098_v19 = vrot.slane %v3817_v5, %v4083_v6  ;;  %v2758_v38 = vsel %vm291_vm7, %v2756_v29, %v2754_v60  ;;  %v3030_v42 = vmul.f32 %v2757_v36, %v6697_v31  ;;  %v6701_v5 = vld [vmem:[#allocation119_spill] sm:$0xff] }
 0x310   :  { %v3442_v32 = vadd.f32 %v6698_v57, %v3428_v12  ;;  %v2921_v1 = vcombine.low %v2917_v26, %v2918_v4  ;;  %v3031_v3 = vmul.f32 %v2758_v38, %v6697_v31  ;;  %v3372_v48 = vmul.f32 %v2757_v36, %v6699_v54 }
 0x311   :  { %v3263_v25 = vcombine.low %v3259_v8, %v3260_v2  ;;  %v3373_v11 = vmul.f32 %v2758_v38, %v6699_v54  ;;  %v3714_v62 = vmul.f32 %v2757_v36, %v6700_v44  ;;  %v3715_v24 = vmul.f32 %v2758_v38, %v6700_v44 }
 0x312   :  { %v3605_v58 = vcombine.low %v3601_v30, %v3602_v13  ;;  %v3034_v60 = vcombine.low %v3030_v42, %v3031_v3  ;;  %v2816_v29 = vsel %vm291_vm7, %v2813_v40, %v2815_v34  ;;  %v2817_v12 = vsel %vm291_vm7, %v2815_v34, %v2813_v40  ;;  %v6704_v40 = vld [vmem:[#allocation57_spill] sm:$0xff] }
 0x313   :  { %v3376_v28 = vcombine.low %v3372_v48, %v3373_v11  ;;  %v3718_v55 = vcombine.low %v3714_v62, %v3715_v24  ;;  %v3143_v35 = vmul.f32 %v2816_v29, %v6701_v5  ;;  %v3144_v26 = vmul.f32 %v2817_v12, %v6701_v5 }
 0x314   :  { %v3784_v4 = vadd.f32 %v5849_v7, %v3770_v9  ;;  %v3485_v8 = vmul.f32 %v2816_v29, %v6702_v0  ;;  %v3486_v2 = vmul.f32 %v2817_v12, %v6702_v0  ;;  %v3827_v30 = vmul.f32 %v2816_v29, %v6703_v16 }
 0x315   :  { %v2928_v13 = vrot.slane %v2921_v1, %v4083_v6  ;;  %v3270_v36 = vrot.slane %v3263_v25, %v4083_v6  ;;  %v3147_v17 = vcombine.low %v3143_v35, %v3144_v26  ;;  %v3828_v38 = vmul.f32 %v2817_v12, %v6703_v16  ;;  %v6707_v26 = vld [vmem:[#allocation123_spill] sm:$0xff] }
 0x316   :  { %v3612_v31 = vrot.slane %v3605_v58, %v4083_v6  ;;  %v3489_v42 = vcombine.low %v3485_v8, %v3486_v2  ;;  %v3001_v34 = vadd.f32 %v6704_v40, %v2987_v20  ;;  %v3114_v7 = vadd.f32 %v5899_v23, %v3100_v22 }
 0x317   :  { %v3041_v9 = vrot.slane %v3034_v60, %v4083_v6  ;;  %v3383_v57 = vrot.slane %v3376_v28, %v4083_v6  ;;  %v3725_v3 = vrot.slane %v3718_v55, %v4083_v6  ;;  %v3343_v1 = vadd.f32 %v5876_v14, %v3329_v52  ;;  %v6706_v55 = vld [vmem:[#allocation83_spill] sm:$0xff] }
 0x318   :  { %v3154_v54 = vrot.slane %v3147_v17, %v4083_v6  ;;  %v3831_v48 = vcombine.low %v3827_v30, %v3828_v38  ;;  %v3015_v25 = vadd.f32 %v5944_v41, %v3001_v34  ;;  %v3128_v11 = vadd.f32 %v5981_v50, %v3114_v7 }
 0x319   :  { %v2916_v20 = vadd.f32 %v6007_v49, %v5909_v39  ;;  %v3258_v23 = vadd.f32 %v6026_v61, %v5917_v37  ;;  %v3357_v22 = vadd.f32 %v5947_v33, %v3343_v1  ;;  %v3456_v44 = vadd.f32 %v5902_v51, %v3442_v32 }
 0x31a   :  { %v3496_v62 = vrot.slane %v3489_v42, %v4083_v6  ;;  %v3029_v14 = vadd.f32 %v6050_v10, %v3015_v25  ;;  %v3142_v52 = vadd.f32 %v3140_v21, %v3128_v11  ;;  %v3685_v24 = vadd.f32 %v5893_v63, %v3671_v45  ;;  %v6705_v63 = vld [vmem:[#allocation122_spill] sm:$0xff] }
 0x31b   :  { %v2930_v41 = vadd.f32 %v2928_v13, %v2916_v20  ;;  %v3371_v50 = vadd.f32 %v6058_v18, %v3357_v22  ;;  %v3470_v58 = vadd.f32 %v5986_v46, %v3456_v44  ;;  %v3798_v39 = vadd.f32 %v5907_v27, %v3784_v4 }
 0x31c   :  { %v3838_v37 = vrot.slane %v3831_v48, %v4083_v6  ;;  %v3043_v49 = vadd.f32 %v3041_v9, %v3029_v14  ;;  %v3156_v33 = vadd.f32 %v3154_v54, %v3142_v52  ;;  %v3699_v51 = vadd.f32 %v5953_v15, %v3685_v24 }
 0x31d   :  { %v3272_v61 = vadd.f32 %v3270_v36, %v3258_v23  ;;  %v3385_v32 = vadd.f32 %v3383_v57, %v3371_v50  ;;  %v3484_v60 = vadd.f32 %v3482_v47, %v3470_v58  ;;  %v3812_v10 = vadd.f32 %v5989_v59, %v3798_v39 }
 0x31e   :  { %v3157_v21 = vadd.f32 %v3043_v49, %v2930_v41  ;;  %v3158_v45 = vadd.f32 %v3156_v33, %v6705_v63  ;;  %v3600_v18 = vadd.f32 %v6043_v56, %v5941_v53  ;;  %v3713_v46 = vadd.f32 %v6077_v43, %v3699_v51 }
 0x31f   :  { %v3498_v27 = vadd.f32 %v3496_v62, %v3484_v60  ;;  %v3499_v29 = vadd.f32 %v3385_v32, %v3272_v61  ;;  %v3826_v6 = vadd.f32 %v6098_v19, %v3812_v10 }
 0x320   :  { %v3159_v12 = vadd.f32 %v3158_v45, %v3157_v21  ;;  %v3614_v28 = vadd.f32 %v3612_v31, %v3600_v18  ;;  %v3727_v15 = vadd.f32 %v3725_v3, %v3713_v46 }
 0x321   :  { %v3500_v5 = vadd.f32 %v3498_v27, %v6706_v55  ;;  %v3840_v47 = vadd.f32 %v3838_v37, %v3826_v6 }
 0x322   :  { %v3841_v35 = vadd.f32 %v3727_v15, %v3614_v28  ;;  %3844 = vst [vmem:[#allocation9] sm:$0xf] %v3159_v12 }
 0x323   :  { %v3501_v59 = vadd.f32 %v3500_v5, %v3499_v29  ;;  %v3842_v4 = vadd.f32 %v3840_v47, %v6707_v26 }
 0x325   :  { %v3843_v53 = vadd.f32 %v3842_v4, %v3841_v35  ;;  %3846 = vst [vmem:[#allocation9 + $0x4] sm:$0xf] %v3501_v59 }
 0x327   :  { %3848 = vst [vmem:[#allocation9 + $0x8] sm:$0xf] %v3843_v53 }
 0x328   :  { %4016 = shalt.err (!%p4013_p0)
}
 0x329   :  { %s6708_s1 = smov 4   ;;  %s6709_s26 = smov 64  }
 0x32a   :  { %s6710_s5 = sld [smem:[#allocation128_spill]] }
 0x330   :  { %3860 = dma.vmem_to_hbm [thread:$0]  %s3855_s17, 192, %s6710_s5, [#allocation4], %s6709_s26, %s6709_s26, %s6708_s1  }
 0x331   :  { %4031 = dma.done.wait [#allocation4], 192  }
 0x332   :  { %4032 = vsyncadd [#allocation4], 4294967104 }
 0x333   :  { %3864 = vsyncpa [#allocation3], 1 }
 0x334   :  { %3865 = vsyncpa [#allocation4], 1 }
 0x335   :  { %3866 = vsyncpa [#allocation5], 1 }
 0x336   :  { %3867 = vsyncpa [#allocation6], 1 }

</bundles_post_ra>
